<compile_context>
chip_gen: v7x
topology: tpu7x:2x2x1
jax: 0.10.0
libtpu: 0.0.40
codegen_flags: <defaults>
</compile_context>

<pallas_src>
import functools

import jax
import jax.numpy as jnp
from jax.experimental import pallas as pl
from jax.experimental.pallas import tpu as pltpu


def _round_up(x, m):
    return ((x + m - 1) // m) * m


def _choose_hw_block(hw, cap=2048):
    """Pick a lane-dense (multiple-of-128) H*W tile, preferring exact divisors."""
    if hw % 128 == 0:
        blk = min(hw, cap)
        while hw % blk != 0:
            blk -= 128
        return blk
    return min(_round_up(hw, 128), cap)


def _vq_kernel(x_ref, e_ref, et_ref, esq_ref, q_ref, sq_ref, *, kp, hw_valid):
    """One (D, hw_blk) tile of one image: nearest-codebook lookup + loss partial.

    x_ref  : (1, D, hw_blk)   latent tile (native NCHW slice)
    e_ref  : (Kp, D)          padded codebook, VMEM-resident
    et_ref : (D, Kp)          codebook transpose, VMEM-resident
    esq_ref: (Kp, 1)          ||e_k||^2 (padded rows = 1e30), VMEM-resident
    q_ref  : (1, D, hw_blk)   quantized tile (output, NCHW slice)
    sq_ref : (1, 1, 1, 1)     sum((q - x)^2) over the valid part of the tile
    """
    x = x_ref[0]          # (D, hw)
    e = e_ref[...]        # (Kp, D)
    et = et_ref[...]      # (D, Kp)

    # ||x||^2 is constant per column and does not affect the argmin, so the
    # distance is computed only up to that constant:  ||e||^2 - 2 <e, x>.
    dots = jax.lax.dot_general(
        e, x, (((1,), (0,)), ((), ())), preferred_element_type=jnp.float32
    )                                                  # (Kp, hw)
    dist = esq_ref[...] - 2.0 * dots                   # (Kp,1) broadcast over lanes

    # argmin over the codebook (sublane) axis, first-index tie-breaking
    # (matches torch.topk(..., largest=False) / argmin).
    k_iota = jax.lax.broadcasted_iota(jnp.int32, dist.shape, 0)
    min_d = jnp.min(dist, axis=0, keepdims=True)       # (1, hw)
    idx = jnp.min(jnp.where(dist == min_d, k_iota, kp), axis=0, keepdims=True)
    one_hot = (k_iota == idx).astype(jnp.float32)      # (Kp, hw)

    # Codebook gather as E^T @ one_hot on the MXU; HIGHEST precision keeps the
    # gathered rows (near) bit-exact copies of the codebook entries.
    q = jax.lax.dot_general(
        et, one_hot, (((1,), (0,)), ((), ())),
        preferred_element_type=jnp.float32,
        precision=jax.lax.Precision.HIGHEST,
    )                                                  # (D, hw)
    q_ref[0] = q.astype(q_ref.dtype)

    # Fused MSE partial: sum of squared error over the (valid) tile.
    diff = q - x
    if hw_valid is not None:  # static branch: only when H*W was padded
        hw_blk = x_ref.shape[2]
        col = pl.program_id(1) * hw_blk + jax.lax.broadcasted_iota(
            jnp.int32, diff.shape, 1
        )
        diff = jnp.where(col < hw_valid, diff, 0.0)
    sq = jnp.sum(diff * diff, axis=1, keepdims=True)   # (D, 1)  cross-lane
    sq = jnp.sum(sq, axis=0, keepdims=True)            # (1, 1)  cross-sublane
    sq_ref[0, 0] = sq


def vector_quantizer_forward(latents, embedding, beta=0.25, hw_block_cap=2048):
    """Forward pass of VectorQuantizer (values only).

    latents  : (B, D, H, W) float32
    embedding: (K, D)       float32 codebook
    returns  : (quantized (B, D, H, W), commitment_loss*beta, embedding_loss)
    """
    B, D, H, W = latents.shape
    K, D2 = embedding.shape
    assert D == D2, "latent channel dim must equal embedding_dim"

    HW = H * W
    x = latents.reshape(B, D, HW)          # free view, stays in NCHW layout

    # Pad codebook rows to a lane/sublane-dense Kp (multiple of 128); padded
    # ||e||^2 is huge so padded entries never win the argmin.
    Kp = _round_up(max(K, 1), 128)
    e_pad = jnp.pad(embedding.astype(jnp.float32), ((0, Kp - K), (0, 0)))
    e_t = jnp.transpose(e_pad)                                    # (D, Kp), tiny
    e_sq = jnp.sum(e_pad * e_pad, axis=1, keepdims=True)          # (Kp, 1)
    e_sq = jnp.where(jnp.arange(Kp)[:, None] < K, e_sq, jnp.float32(1e30))

    hw_blk = _choose_hw_block(HW, hw_block_cap)
    HWp = _round_up(HW, hw_blk)
    if HWp != HW:
        x_in = jnp.pad(x, ((0, 0), (0, 0), (0, HWp - HW)))
        hw_valid = HW
    else:
        x_in = x
        hw_valid = None
    n_hw = HWp // hw_blk

    kernel = functools.partial(_vq_kernel, kp=Kp, hw_valid=hw_valid)

    quant_p, sq_partials = pl.pallas_call(
        kernel,
        out_shape=(
            jax.ShapeDtypeStruct((B, D, HWp), jnp.float32),
            jax.ShapeDtypeStruct((B, n_hw, 1, 1), jnp.float32),
        ),
        grid_spec=pltpu.PrefetchScalarGridSpec(
            num_scalar_prefetch=0,
            grid=(B, n_hw),
            in_specs=[
                pl.BlockSpec((1, D, hw_blk), lambda b, j: (b, 0, j)),  # latents
                pl.BlockSpec((Kp, D), lambda b, j: (0, 0)),            # E (resident)
                pl.BlockSpec((D, Kp), lambda b, j: (0, 0)),            # E^T (resident)
                pl.BlockSpec((Kp, 1), lambda b, j: (0, 0)),            # ||e||^2
            ],
            out_specs=[
                pl.BlockSpec((1, D, hw_blk), lambda b, j: (b, 0, j)),
                pl.BlockSpec((1, 1, 1, 1), lambda b, j: (b, j, 0, 0)),
            ],
        ),
        compiler_params=pltpu.CompilerParams(
            dimension_semantics=("parallel", "parallel"),
        ),
    )(x_in, e_pad, e_t, e_sq)

    if HWp != HW:
        quant_p = quant_p[:, :, :HW]
    quantized = quant_p.reshape(B, D, H, W)

    # Both losses share the same forward value (detach() only changes grads).
    mse = jnp.sum(sq_partials) / (B * D * H * W)
    commitment_loss = beta * mse
    embedding_loss = mse

    # Straight-through estimator: forward value == quantized (already NCHW).
    # TODO(synk): the .detach()-based gradient routing is autograd-only and has
    # no forward-pass equivalent to implement here.
    return quantized, commitment_loss, embedding_loss


def _reference(latents, embedding, beta):
    """Pure-JAX reference mirroring the torch forward semantics."""
    B, D, H, W = latents.shape
    lat = jnp.transpose(latents, (0, 2, 3, 1))
    flat = lat.reshape(-1, D)
    dist = (
        jnp.sum(flat * flat, axis=1, keepdims=True)
        + jnp.sum(embedding * embedding, axis=1)
        - 2.0 * flat @ embedding.T
    )
    idx = jnp.argmin(dist, axis=1)             # torch.topk(2, largest=False)[:, 0]
    quant = embedding[idx].reshape(lat.shape)
    mse = jnp.mean(jnp.square(quant - lat))
    return jnp.transpose(quant, (0, 3, 1, 2)), beta * mse, mse


if __name__ == "__main__":
    key = jax.random.PRNGKey(0)
    k_lat, k_emb = jax.random.split(key)

    # Module defaults: num_embeddings=50, embedding_dim=256; small spatial grid.
    B, D, H, W = 2, 256, 16, 16
    K = 50
    beta = 0.25

    latents = jax.random.normal(k_lat, (B, D, H, W), dtype=jnp.float32)
    embedding = jax.random.uniform(
        k_emb, (K, D), dtype=jnp.float32, minval=-1.0 / K, maxval=1.0 / K
    )

    quant, c_loss, e_loss = vector_quantizer_forward(latents, embedding, beta=beta)
    quant = jax.block_until_ready(quant)

    q_ref, c_ref, e_ref = _reference(latents, embedding, beta)
    assert quant.shape == (B, D, H, W)
    assert jnp.allclose(quant, q_ref, atol=1e-5, rtol=1e-5)
    assert jnp.allclose(c_loss, c_ref, atol=1e-6, rtol=1e-4)
    assert jnp.allclose(e_loss, e_ref, atol=1e-6, rtol=1e-4)

    print("KERNEL_OK")
</pallas_src>

<mosaic_0001>
module attributes {stable_mosaic.version = 11 : i64} {
  func.func @_vq_kernel(%arg0: i32, %arg1: i32, %arg2: memref<1x256x256xf32, #tpu.memory_space<vmem>>, %arg3: memref<128x256xf32, #tpu.memory_space<vmem>>, %arg4: memref<256x128xf32, #tpu.memory_space<vmem>>, %arg5: memref<128x1xf32, #tpu.memory_space<vmem>>, %arg6: memref<1x256x256xf32, #tpu.memory_space<vmem>>, %arg7: memref<1x1x1x1xf32, #tpu.memory_space<vmem>>) attributes {dimension_semantics = [#tpu.dimension_semantics<parallel>, #tpu.dimension_semantics<parallel>], iteration_bounds = array<i64: 2, 1>, scalar_prefetch = 0 : i64, scratch_operands = 0 : i64, tpu.core_type = #tpu.core_type<tc>, window_params = [{transform_indices = @transform_0, window_bounds = array<i64: 1, 256, 256>}, {pipeline_mode = #tpu.pipeline_mode<synchronous>, transform_indices = @transform_1, window_bounds = array<i64: 128, 256>}, {pipeline_mode = #tpu.pipeline_mode<synchronous>, transform_indices = @transform_2, window_bounds = array<i64: 256, 128>}, {pipeline_mode = #tpu.pipeline_mode<synchronous>, transform_indices = @transform_3, window_bounds = array<i64: 128, 1>}, {transform_indices = @transform_4, window_bounds = array<i64: 1, 256, 256>}, {transform_indices = @transform_5, window_bounds = array<i64: 1, 1, 1, 1>}]} {
    %c0 = arith.constant 0 : index
    %c0_0 = arith.constant 0 : index
    %c0_1 = arith.constant 0 : index
    %0 = vector.load %arg2[%c0, %c0_0, %c0_1] : memref<1x256x256xf32, #tpu.memory_space<vmem>>, vector<1x256x256xf32>
    %1 = vector.shape_cast %0 : vector<1x256x256xf32> to vector<256x256xf32>
    %c0_2 = arith.constant 0 : index
    %c0_3 = arith.constant 0 : index
    %2 = vector.load %arg3[%c0_2, %c0_3] : memref<128x256xf32, #tpu.memory_space<vmem>>, vector<128x256xf32>
    %c0_4 = arith.constant 0 : index
    %c0_5 = arith.constant 0 : index
    %3 = vector.load %arg4[%c0_4, %c0_5] : memref<256x128xf32, #tpu.memory_space<vmem>>, vector<256x128xf32>
    %cst = arith.constant dense<0.000000e+00> : vector<128x256xf32>
    %4 = tpu.matmul %2, %1, %cst {dimension_numbers = #tpu.dot_dimension_numbers<[1], [0], [0], [1], [0, 0, 1, 1], [], []>} : vector<128x256xf32>, vector<256x256xf32>, vector<128x256xf32> -> vector<128x256xf32>
    %c0_6 = arith.constant 0 : index
    %c0_7 = arith.constant 0 : index
    %5 = vector.load %arg5[%c0_6, %c0_7] : memref<128x1xf32, #tpu.memory_space<vmem>>, vector<128x1xf32>
    %cst_8 = arith.constant 2.000000e+00 : f32
    %6 = vector.broadcast %cst_8 : f32 to vector<128x256xf32>
    %7 = arith.mulf %6, %4 : vector<128x256xf32>
    %8 = vector.broadcast %5 : vector<128x1xf32> to vector<128x256xf32>
    %9 = arith.subf %8, %7 : vector<128x256xf32>
    %10 = tpu.iota {dimensions = array<i32: 0>} : vector<128x256xi32>
    %cst_9 = arith.constant dense<0x7F800000> : vector<256xf32>
    %11 = vector.multi_reduction <minimumf>, %9, %cst_9 [0] : vector<128x256xf32> to vector<256xf32>
    %12 = vector.shape_cast %11 : vector<256xf32> to vector<1x256xf32>
    %13 = vector.broadcast %12 : vector<1x256xf32> to vector<128x256xf32>
    %14 = arith.cmpf oeq, %9, %13 : vector<128x256xf32>
    %c128_i32 = arith.constant 128 : i32
    %15 = vector.broadcast %c128_i32 : i32 to vector<128x256xi32>
    %16 = arith.select %14, %10, %15 : vector<128x256xi1>, vector<128x256xi32>
    %cst_10 = arith.constant dense<2147483647> : vector<256xi32>
    %17 = vector.multi_reduction <minsi>, %16, %cst_10 [0] : vector<128x256xi32> to vector<256xi32>
    %18 = vector.shape_cast %17 : vector<256xi32> to vector<1x256xi32>
    %19 = vector.broadcast %18 : vector<1x256xi32> to vector<128x256xi32>
    %20 = arith.cmpi eq, %10, %19 : vector<128x256xi32>
    %21 = arith.extui %20 : vector<128x256xi1> to vector<128x256xi32>
    %22 = arith.sitofp %21 : vector<128x256xi32> to vector<128x256xf32>
    %cst_11 = arith.constant dense<0.000000e+00> : vector<256x256xf32>
    %23 = tpu.matmul %3, %22, %cst_11 {dimension_numbers = #tpu.dot_dimension_numbers<[1], [0], [0], [1], [0, 0, 1, 1], [], []>, precision = #tpu.contract_precision<fp32>} : vector<256x128xf32>, vector<128x256xf32>, vector<256x256xf32> -> vector<256x256xf32>
    %c0_12 = arith.constant 0 : index
    %c0_13 = arith.constant 0 : index
    %c0_14 = arith.constant 0 : index
    %24 = vector.load %arg6[%c0_12, %c0_13, %c0_14] : memref<1x256x256xf32, #tpu.memory_space<vmem>>, vector<1x256x256xf32>
    %25 = vector.shape_cast %24 : vector<1x256x256xf32> to vector<256x256xf32>
    %26 = vector.shape_cast %23 : vector<256x256xf32> to vector<1x256x256xf32>
    tpu.vector_store %arg6[%c0_12, %c0_13, %c0_14], %26 {strides = array<i32>} : memref<1x256x256xf32, #tpu.memory_space<vmem>>, vector<1x256x256xf32>,
    %27 = arith.subf %23, %1 : vector<256x256xf32>
    %28 = arith.mulf %27, %27 : vector<256x256xf32>
    %cst_15 = arith.constant dense<0.000000e+00> : vector<256xf32>
    %29 = vector.multi_reduction <add>, %28, %cst_15 [1] : vector<256x256xf32> to vector<256xf32>
    %30 = vector.shape_cast %29 : vector<256xf32> to vector<256x1xf32>
    %cst_16 = arith.constant dense<0.000000e+00> : vector<1xf32>
    %31 = vector.multi_reduction <add>, %30, %cst_16 [0] : vector<256x1xf32> to vector<1xf32>
    %32 = vector.shape_cast %31 : vector<1xf32> to vector<1x1xf32>
    %c0_17 = arith.constant 0 : index
    %c0_18 = arith.constant 0 : index
    %c0_19 = arith.constant 0 : index
    %c0_20 = arith.constant 0 : index
    %33 = vector.load %arg7[%c0_17, %c0_18, %c0_19, %c0_20] : memref<1x1x1x1xf32, #tpu.memory_space<vmem>>, vector<1x1x1x1xf32>
    %34 = vector.shape_cast %33 : vector<1x1x1x1xf32> to vector<1x1xf32>
    %35 = vector.shape_cast %32 : vector<1x1xf32> to vector<1x1x1x1xf32>
    tpu.vector_store %arg7[%c0_17, %c0_18, %c0_19, %c0_20], %35 {strides = array<i32>} : memref<1x1x1x1xf32, #tpu.memory_space<vmem>>, vector<1x1x1x1xf32>,
    return
  }
  func.func @transform_0(%arg0: i32, %arg1: i32) -> (i32, i32, i32) {
    %c0_i32 = arith.constant 0 : i32
    %c0_i32_0 = arith.constant 0 : i32
    return %arg0, %c0_i32, %arg1 : i32, i32, i32
  }
  func.func @transform_1(%arg0: i32, %arg1: i32) -> (i32, i32) {
    %c0_i32 = arith.constant 0 : i32
    %c0_i32_0 = arith.constant 0 : i32
    %c0_i32_1 = arith.constant 0 : i32
    return %c0_i32, %c0_i32_0 : i32, i32
  }
  func.func @transform_2(%arg0: i32, %arg1: i32) -> (i32, i32) {
    %c0_i32 = arith.constant 0 : i32
    %c0_i32_0 = arith.constant 0 : i32
    %c0_i32_1 = arith.constant 0 : i32
    return %c0_i32, %c0_i32_0 : i32, i32
  }
  func.func @transform_3(%arg0: i32, %arg1: i32) -> (i32, i32) {
    %c0_i32 = arith.constant 0 : i32
    %c0_i32_0 = arith.constant 0 : i32
    %c0_i32_1 = arith.constant 0 : i32
    return %c0_i32, %c0_i32_0 : i32, i32
  }
  func.func @transform_4(%arg0: i32, %arg1: i32) -> (i32, i32, i32) {
    %c0_i32 = arith.constant 0 : i32
    %c0_i32_0 = arith.constant 0 : i32
    return %arg0, %c0_i32, %arg1 : i32, i32, i32
  }
  func.func @transform_5(%arg0: i32, %arg1: i32) -> (i32, i32, i32, i32) {
    %c0_i32 = arith.constant 0 : i32
    %c0_i32_0 = arith.constant 0 : i32
    %c0_i32_1 = arith.constant 0 : i32
    return %arg0, %arg1, %c0_i32, %c0_i32_0 : i32, i32, i32, i32
  }
}

</mosaic_0001>

<bundles_post_ra>
// kernel: tpu_custom_call.1
= control target key start
LH: loop header
LB: loop body
LE: loop exit
PB: predicated region body
PF: predicated region fallthrough
CT: control target
= control target key end

     0   :  { %11 = vsyncpa [#allocation3], 0  ;;  %s7605_s0 = inlined_call_operand.hbm [shape: f32[2,256,256], index: 0, kind: input, shape index: {}]   ;;  %s7606_s1 = inlined_call_operand.hbm [shape: f32[128,256], index: 1, kind: input, shape index: {}]   ;;  %s7607_s2 = inlined_call_operand.hbm [shape: f32[256,128], index: 2, kind: input, shape index: {}]   ;;  %s7608_s3 = inlined_call_operand.vmem [shape: f32[128,1], index: 3, kind: input, shape index: {}]   ;;  %s7609_s4 = inlined_call_operand.hbm [shape: f32[2,256,256], index: 4, kind: output, shape index: {0}]   ;;  %s7610_s5 = inlined_call_operand.vmem [shape: f32[2,1,1,1], index: 5, kind: output, shape index: {1}]  }
   0x1   :  { %13 = vsyncpa [#allocation3 + $0x1], 0 }
   0x2   :  { %14 = vsyncpa [#allocation6], 0 }
   0x3   :  { %15 = vsyncpa [#allocation4], 0 }
   0x4   :  { %17 = vsyncpa [#allocation4 + $0x1], 0  ;;  %s5029_s18 = smov 0   ;;  %s5031_s19 = smov 0  }
   0x5   :  { %s5033_s20 = smov 0   ;;  %s5035_s21 = smov 0  }
   0x6   :  { %s5037_s22 = smov 0   ;;  %s5039_s23 = smov 0  }
   0x7 LB: > { %s3913_s24 = sadd.s32 4294967295, %s4984_s23   ;;  %s3914_s25 = sadd.s32 4294967294, %s4984_s23   ;;  %s4984_s23 = sphi %s5039_s23, %s23_s23   ;;  %s4980_s22 = sphi %s5037_s22, %s8147_s22   ;;  %s4976_s21 = sphi %s5035_s21, %s8146_s21   ;;  %s4972_s20 = sphi %s5033_s20, %s8145_s20   ;;  %s4968_s19 = sphi %s5031_s19, %s8144_s19   ;;  %s4964_s18 = sphi %s5029_s18, %s8143_s18  }
   0x8   : > { %p57_p0 = scmp.ne.s32.totalorder %s4968_s19, %s4964_s18  ;;  %p5063_p1 = scmp.eq.s32.totalorder %s3913_s24, 0 }
   0x9   : > { %p5067_p2 = scmp.eq.s32.totalorder %s3913_s24, 1  ;;  %p152_p3 = scmp.eq.s32.totalorder %s3914_s25, 1 }
   0xa   : > { %s7789_s26 = scalar_select %p5063_p1, 1, 0 }
   0xb   : > { %p5073_p4 = por %p5063_p1, %p57_p0  ;;  %p3915_p5 = scmp.ge.s32.totalorder %s4984_s23, 1 }
   0xc   : > { %p5078_p6 = por %p152_p3, %p57_p0  ;;  %p187_p7 = scmp.lt.s32.totalorder %s4984_s23, 3 }
   0xd   : > { %s7791_s28 = scalar_select %p5073_p4, 1, 0 }
   0xe   : > { %s7792_s29 = scalar_select %p5078_p6, 1, 0 }
   0xf   : > { %p5083_p8 = pnand %p3915_p5, %p187_p7  ;;  %s4986_s6 = smov [#allocation5]  }
  0x10   : > { %s199_s7 = sshll.u32 %s4986_s6, 4  ;;  %s4987_s9 = smov [#allocation7]   ;;  %s5087_s7 = int_to_ptr.vmem [resolvable:$true] %s199_s7 }
  0x11   : > { %p4666_p9 = pneg %p5083_p8  ;;  %s212_s10 = sshll.u32 %s4987_s9, 4  ;;  %s5098_s10 = int_to_ptr.vmem [resolvable:$true] %s212_s10 }
  0x12   : > { %s4812_s13 = scalar_lea.hbm %s7606_s1, 4096 }
  0x13   : > { %p5094_p11 = pnand %p4666_p9, %p5063_p1  ;;  %p4813_p12 = scmp.ne.s32.totalorder %s7606_s1, %s4812_s13 }
  0x14   : > { %p4819_p5 = scmp.lt.u32.totalorder %s4812_s13, %s7606_s1 }
  0x15   : > { %p4814_p13 = pneg %p5094_p11 }
  0x17   : > { %p4815_p0 = pnand %p4814_p13, %p4813_p12 }
  0x19   : > { %p4816_p3 = pneg %p4815_p0 }
  0x1b   : > { %p4821_p7 = pnand %p4819_p5, %p4816_p3 }
  0x1d   : > { %4824 = shalt.err (!%p4821_p7)
}
  0x1e   : > { %s4825_s24 = scalar_lea.vmem %s5087_s7, 4096  ;;  %p4833_p1 = scmp.lt.s32.totalorder %s5087_s7, %s5087_s7 }
  0x1f   : > { %p4826_p9 = scmp.ne.s32.totalorder %s5087_s7, %s4825_s24  ;;  %p4834_p12 = scmp.lt.s32.totalorder %s4825_s24, %s4825_s24 }
  0x21   : > { %p4828_p10 = pnand %p4826_p9, %p4814_p13  ;;  %p4835_p0 = por %p4834_p12, %p4833_p1 }
  0x23   : > { %p4829_p6 = pneg %p4828_p10 }
  0x25   : > { %p4836_p4 = pnand %p4835_p0, %p4829_p6 }
  0x27   : > { %4839 = shalt.err (!%p4836_p4)
}
  0x28   : > { %s7614_s25 = smov 256   ;;  %s4989_s6 = smov 16  }
  0x29   : > { %4669 = dma.hbm_to_vmem [thread:$0]  (!%p5094_p11), %s7606_s1, 4096, %s5087_s7, [#allocation6], %s7614_s25, %s7614_s25, %s4989_s6  }
  0x2a   : > { %s4840_s14 = scalar_lea.hbm %s7607_s2, 4096 }
  0x2b   : > { %p4841_p1 = scmp.ne.s32.totalorder %s7607_s2, %s4840_s14  ;;  %p4847_p10 = scmp.lt.u32.totalorder %s4840_s14, %s7607_s2 }
  0x2d   : > { %p4843_p4 = pnand %p4841_p1, %p4814_p13 }
  0x2f   : > { %p4844_p6 = pneg %p4843_p4 }
  0x31   : > { %p4849_p3 = pnand %p4847_p10, %p4844_p6 }
  0x33   : > { %4852 = shalt.err (!%p4849_p3)
}
  0x34   : > { %s4853_s7 = scalar_lea.vmem %s5098_s10, 4096  ;;  %p4861_p12 = scmp.lt.s32.totalorder %s5098_s10, %s5098_s10 }
  0x35   : > { %p4854_p5 = scmp.ne.s32.totalorder %s5098_s10, %s4853_s7  ;;  %p4862_p0 = scmp.lt.s32.totalorder %s4853_s7, %s4853_s7 }
  0x37   : > { %p4856_p7 = pnand %p4854_p5, %p4814_p13  ;;  %p4863_p1 = por %p4862_p0, %p4861_p12 }
  0x39   : > { %p4857_p9 = pneg %p4856_p7 }
  0x3b   : > { %p4864_p4 = pnand %p4863_p1, %p4857_p9 }
  0x3d   : > { %4867 = shalt.err (!%p4864_p4)
}
  0x3e   : > { %s4990_s9 = smov 128   ;;  %s4991_s11 = smov 8  }
  0x3f   : > { %4672 = dma.hbm_to_vmem [thread:$0]  (!%p5094_p11), %s7607_s2, 4096, %s5098_s10, [#allocation6], %s4990_s9, %s4990_s9, %s4991_s11  }
  0x40   : > { %s35_s14 = sadd.s32 1, %s4980_s22  ;;  %s44_s15 = sadd.s32 1, %s4972_s20 }
  0x41   : > { %p37_p13 = scmp.ge.s32.totalorder %s35_s14, 2  ;;  %p51_p6 = scmp.ne.s32.totalorder %s4972_s20, %s4968_s19 }
  0x42   : > { %p52_p10 = scmp.eq.s32.totalorder %s4984_s23, 0  ;;  %p4683_p3 = scmp.lt.s32.totalorder %s4984_s23, 2 }
  0x43   : > { %s8149_s14 = smov (%p37_p13, %s35_s14), 0  ;;  %p5165_p7 = por %p5067_p2, %p51_p6 }
  0x44   : > { %p53_p5 = por %p52_p10, %p51_p6  ;;  %s39_s8 = ssub.s32 %s4980_s22, %s8149_s14 }
  0x45   : > { %s7795_s16 = scalar_select %p5165_p7, 1, 0 }
  0x46   : > { %s229_s17 = sand.u32 1, %s4972_s20   ;;  %p42_p9 = scmp.eq.s32.totalorder %s39_s8, 0 }
  0x47   : > { %s3919_s10 = sshll.u32 %s229_s17, 9  ;;  %s4060_s24 = sshll.u32 %s4980_s22, 13 }
  0x48   : > { %s5174_s7 = scalar_select %p42_p9, %s4972_s20, %s44_s15  }
  0x49   : > { %s5179_s12 = scalar_lea.hbm %s7605_s0, %s4060_s24  ;;  %s233_s27 = scalar_lea.vmem [#allocation2], %s3919_s10 }
  0x4a   : > { %s242_s13 = sshll.u32 %s233_s27, 4  ;;  %p5183_p2 = pnand %p4683_p3, %p53_p5  ;;  %s5187_s13 = int_to_ptr.vmem [resolvable:$true] %s242_s13 }
  0x4b   : > { %s5189_s15 = scalar_lea.sflag [#allocation3], %s229_s17  ;;  %s4868_s8 = scalar_lea.hbm %s5179_s12, 8192 }
  0x4c   : > { %p4869_p11 = scmp.ne.s32.totalorder %s5179_s12, %s4868_s8  ;;  %p4870_p12 = pneg %p5183_p2 }
  0x4d   : > { %s4873_s9 = scalar_lea.hbm %s7605_s0, 16384  ;;  %p4874_p4 = scmp.lt.u32.totalorder %s5179_s12, %s7605_s0 }
  0x4e   : > { %p4871_p0 = pnand %p4870_p12, %p4869_p11  ;;  %p4875_p13 = scmp.lt.u32.totalorder %s4873_s9, %s4868_s8 }
  0x4f   : > { %p4877_p10 = scmp.lt.u32.totalorder %s4868_s8, %s5179_s12 }
  0x50   : > { %p4872_p1 = pneg %p4871_p0  ;;  %p4876_p6 = por %p4875_p13, %p4874_p4 }
  0x52   : > { %p4878_p3 = por %p4877_p10, %p4876_p6 }
  0x54   : > { %p4879_p5 = pnand %p4878_p3, %p4872_p1 }
  0x56   : > { %4882 = shalt.err (!%p4879_p5)
}
  0x57   : > { %s4883_s17 = scalar_lea.vmem %s5187_s13, 8192  ;;  %s4992_s10 = smov [#allocation2]  }
  0x58   : > { %p4884_p9 = scmp.ne.s32.totalorder %s5187_s13, %s4883_s17  ;;  %s4888_s24 = sshll.u32 %s4992_s10, 4  ;;  %s4889_s24 = int_to_ptr.vmem [resolvable:$false] %s4888_s24 }
  0x59   : > { %s4890_s11 = scalar_lea.vmem %s4889_s24, 16384  ;;  %p4891_p7 = scmp.lt.s32.totalorder %s5187_s13, %s4889_s24 }
  0x5a   : > { %p4886_p11 = pnand %p4884_p9, %p4870_p12  ;;  %p4892_p4 = scmp.lt.s32.totalorder %s4890_s11, %s4883_s17 }
  0x5c   : > { %p4887_p0 = pneg %p4886_p11  ;;  %p4893_p13 = por %p4892_p4, %p4891_p7 }
  0x5e   : > { %p4894_p6 = pnand %p4893_p13, %p4887_p0 }
  0x60   : > { %4897 = shalt.err (!%p4894_p6)
}
  0x61   : > { %s7797_s8 = smov 256   ;;  %254 = sbr.rel (%p5083_p8) target bundleno = 1376 (0x560), region = 36 }
  0x62   : > { %4676 = dma.hbm_to_vmem [thread:$0]  (!%p5183_p2), %s5179_s12, 8192, %s5187_s13, %s5189_s15, %s7797_s8, %s7797_s8, %s4989_s6  }
  0x68   : > { %s5223_s9 = sand.u32 1, %s4968_s19   ;;  %p7798_p7 = scmp.ne.s32.totalorder %s7791_s28, 0 }
  0x69   : > { %s3923_s27 = sshll.u32 %s5223_s9, 9  ;;  %s257_s17 = scalar_lea.sflag [#allocation3], %s5223_s9 }
  0x6a   : > { %s5229_s25 = scalar_lea.vmem [#allocation2], %s3923_s27 }
  0x6b   : > { %4951 = dma.done.wait (%p7798_p7), %s257_s17, 8192  }
  0x6c   : > { %4953 = vsyncadd (%p7798_p7), %s257_s17, 4294959104  ;;  %p7799_p2 = scmp.ne.s32.totalorder %s7789_s26, 0 }
  0x6e   : > { %4955 = dma.done.wait (%p7799_p2), [#allocation6], 8192  }
  0x6f   : > { %4957 = vsyncadd (%p7799_p2), [#allocation6], 4294959104  ;;  %v310_v0 = vld [vmem:[%s5229_s25 + $0x8] sm:$0xff]  ;;  %v312_v1 = vld [vmem:[%s5229_s25 + $0x18] sm:$0xff]  ;;  %v4993_v3 = vmov 0   ;;  %s7332_s24 = scalar_lea.vmem [#allocation8], %s3923_s27 }
  0x70   : > { %v309_v2 = vld [vmem:[%s5229_s25] sm:$0xff]  ;;  %4746 = vset.pattern.permute.xlu0 %v4993_v3  ;;  %4747 = vset.pattern.permute.xlu1 %v4993_v3  ;;  %v4062_v4 = vpack.c.bf16 %v312_v1, %v310_v0  ;;  %v311_v5 = vld [vmem:[%s5229_s25 + $0x10] sm:$0xff]  ;;  %v314_v6 = vld [vmem:[%s5229_s25 + $0x28] sm:$0xff]  ;;  %s4061_s27 = sshll.u32 %s4976_s21, 13  ;;  %s3778_s26 = sshll.u32 %s7332_s24, 4  ;;  %s7551_s26 = int_to_ptr.vmem [resolvable:$true] %s3778_s26 }
  0x71   : > { %v316_v7 = vld [vmem:[%s5229_s25 + $0x38] sm:$0xff]  ;;  %v4064_v8 = vpack.c.bf16 %v311_v5, %v309_v2  ;;  %v313_v10 = vld [vmem:[%s5229_s25 + $0x20] sm:$0xff]  ;;  %v315_v11 = vld [vmem:[%s5229_s25 + $0x30] sm:$0xff]  ;;  %s7548_s17 = scalar_lea.hbm %s7609_s4, %s4061_s27  ;;  %s4898_s28 = scalar_lea.vmem %s7551_s26, 8192 }
  0x72   : > { %v4066_v9 = vpack.c.bf16 %v316_v7, %v314_v6  ;;  %v318_v12 = vld [vmem:[%s5229_s25 + $0x48] sm:$0xff]  ;;  %4063 = vmatprep.subr.bf16.mxu0 %v4062_v4  ;;  %v320_v13 = vld [vmem:[%s5229_s25 + $0x58] sm:$0xff]  ;;  %v4068_v14 = vpack.c.bf16 %v315_v11, %v313_v10  ;;  %v317_v16 = vld [vmem:[%s5229_s25 + $0x40] sm:$0xff]  ;;  %p4899_p8 = scmp.ne.s32.totalorder %s7551_s26, %s4898_s28  ;;  %p8140_p12 = scmp.ne.s32.totalorder %s7795_s16, 0 }
  0x73   : > { %4065 = vmatpush1.bf16.msra.mxu0 %v4064_v8  ;;  %v4070_v15 = vpack.c.bf16 %v320_v13, %v318_v12  ;;  %v319_v17 = vld [vmem:[%s5229_s25 + $0x50] sm:$0xff]  ;;  %v322_v18 = vld [vmem:[%s5229_s25 + $0x68] sm:$0xff]  ;;  %v324_v19 = vld [vmem:[%s5229_s25 + $0x78] sm:$0xff]  ;;  %s4996_s30 = smov [#allocation8]  }
  0x74   : > { %4067 = vmatprep.subr.bf16.mxu0 %v4066_v9  ;;  %v4072_v20 = vpack.c.bf16 %v319_v17, %v317_v16  ;;  %v4074_v21 = vpack.c.bf16 %v324_v19, %v322_v18  ;;  %v321_v22 = vld [vmem:[%s5229_s25 + $0x60] sm:$0xff]  ;;  %v323_v23 = vld [vmem:[%s5229_s25 + $0x70] sm:$0xff]  ;;  %v326_v24 = vld [vmem:[%s5229_s25 + $0x88] sm:$0xff]  ;;  %p4900_p1 = pnand %p4899_p8, %p8140_p12  ;;  %s4902_s6 = sshll.u32 %s4996_s30, 4  ;;  %s4903_s6 = int_to_ptr.vmem [resolvable:$false] %s4902_s6 }
  0x75   : > { %v328_v25 = vld [vmem:[%s5229_s25 + $0x98] sm:$0xff]  ;;  %v4076_v26 = vpack.c.bf16 %v323_v23, %v321_v22  ;;  %v325_v28 = vld [vmem:[%s5229_s25 + $0x80] sm:$0xff]  ;;  %v327_v29 = vld [vmem:[%s5229_s25 + $0x90] sm:$0xff]  ;;  %s4904_s12 = scalar_lea.vmem %s4903_s6, 16384  ;;  %p4905_p3 = scmp.lt.s32.totalorder %s7551_s26, %s4903_s6 }
  0x76   : > { %v4078_v27 = vpack.c.bf16 %v328_v25, %v326_v24  ;;  %v330_v30 = vld [vmem:[%s5229_s25 + $0xa8] sm:$0xff]  ;;  %v332_v31 = vld [vmem:[%s5229_s25 + $0xb8] sm:$0xff]  ;;  %v4080_v32 = vpack.c.bf16 %v327_v29, %v325_v28  ;;  %v329_v34 = vld [vmem:[%s5229_s25 + $0xa0] sm:$0xff]  ;;  %p4901_p10 = pneg %p4900_p1  ;;  %p4906_p5 = scmp.lt.s32.totalorder %s4904_s12, %s4898_s28 }
  0x77   : > { %4069 = vmatpush1.bf16.msra.mxu0 %v4068_v14  ;;  %v4082_v33 = vpack.c.bf16 %v332_v31, %v330_v30  ;;  %v331_v35 = vld [vmem:[%s5229_s25 + $0xb0] sm:$0xff]  ;;  %v334_v36 = vld [vmem:[%s5229_s25 + $0xc8] sm:$0xff]  ;;  %v336_v37 = vld [vmem:[%s5229_s25 + $0xd8] sm:$0xff] }
  0x78   : > { %4071 = vmatprep.subr.bf16.mxu0 %v4070_v15  ;;  %v4084_v38 = vpack.c.bf16 %v331_v35, %v329_v34  ;;  %v4086_v39 = vpack.c.bf16 %v336_v37, %v334_v36  ;;  %v333_v40 = vld [vmem:[%s5229_s25 + $0xc0] sm:$0xff]  ;;  %v335_v41 = vld [vmem:[%s5229_s25 + $0xd0] sm:$0xff]  ;;  %v374_v42 = vld [vmem:[#allocation5 + $0x8] sm:$0xff]  ;;  %p4907_p9 = por %p4906_p5, %p4905_p3 }
  0x79   : > { %v338_v43 = vld [vmem:[%s5229_s25 + $0xe8] sm:$0xff]  ;;  %v340_v44 = vld [vmem:[%s5229_s25 + $0xf8] sm:$0xff]  ;;  %501 = vmatprep.mubr.f32.mxu0 %v374_v42  ;;  %v4088_v45 = vpack.c.bf16 %v335_v41, %v333_v40  ;;  %v337_v47 = vld [vmem:[%s5229_s25 + $0xe0] sm:$0xff] }
  0x7a   : > { %v4090_v46 = vpack.c.bf16 %v340_v44, %v338_v43  ;;  %v339_v48 = vld [vmem:[%s5229_s25 + $0xf0] sm:$0xff]  ;;  %v342_v49 = vld [vmem:[%s5229_s25 + $0x108] sm:$0xff]  ;;  %v344_v50 = vld [vmem:[%s5229_s25 + $0x118] sm:$0xff]  ;;  %p4908_p11 = pnand %p4907_p9, %p4901_p10 }
  0x7b   : > { %4073 = vmatpush1.bf16.msra.mxu0 %v4072_v20  ;;  %v4092_v51 = vpack.c.bf16 %v339_v48, %v337_v47  ;;  %v4094_v52 = vpack.c.bf16 %v344_v50, %v342_v49  ;;  %v341_v53 = vld [vmem:[%s5229_s25 + $0x100] sm:$0xff]  ;;  %v343_v54 = vld [vmem:[%s5229_s25 + $0x110] sm:$0xff]  ;;  %v346_v55 = vld [vmem:[%s5229_s25 + $0x128] sm:$0xff] }
  0x7c   : > { %4075 = vmatprep.subr.bf16.mxu0 %v4074_v21  ;;  %v348_v56 = vld [vmem:[%s5229_s25 + $0x138] sm:$0xff]  ;;  %v4096_v57 = vpack.c.bf16 %v343_v54, %v341_v53  ;;  %v598_v58 = vld [vmem:[%s7608_s3] sm:$0xff]  ;;  %v600_v59 = vld [vmem:[%s7608_s3 + $0x10] sm:$0xff] }
  0x7d   : > { %v4098_v60 = vpack.c.bf16 %v348_v56, %v346_v55  ;;  %v345_v61 = vld [vmem:[%s5229_s25 + $0x120] sm:$0xff]  ;;  %v347_v62 = vld [vmem:[%s5229_s25 + $0x130] sm:$0xff]  ;;  %648 = vperm.xlu0 %4746, %v598_v58   ;;  %v350_v63 = vld [vmem:[%s5229_s25 + $0x148] sm:$0xff]  ;;  %658 = vperm.xlu1 %4747, %v600_v59  }
  0x7e   : > { %v352_v0 = vld [vmem:[%s5229_s25 + $0x158] sm:$0xff]  ;;  %v599_v1 = vld [vmem:[%s7608_s3 + $0x8] sm:$0xff]  ;;  %v4100_v3 = vpack.c.bf16 %v347_v62, %v345_v61  ;;  %v349_v5 = vld [vmem:[%s5229_s25 + $0x140] sm:$0xff] }
  0x7f   : > { %4077 = vmatpush1.bf16.msra.mxu0 %v4076_v26  ;;  %v601_v2 = vld [vmem:[%s7608_s3 + $0x18] sm:$0xff]  ;;  %v4102_v4 = vpack.c.bf16 %v352_v0, %v350_v63  ;;  %v351_v6 = vld [vmem:[%s5229_s25 + $0x150] sm:$0xff]  ;;  %v354_v7 = vld [vmem:[%s5229_s25 + $0x168] sm:$0xff] }
  0x80   : > { %4079 = vmatprep.subr.bf16.mxu0 %v4078_v27  ;;  %v356_v8 = vld [vmem:[%s5229_s25 + $0x178] sm:$0xff]  ;;  %v602_v9 = vld [vmem:[%s7608_s3 + $0x20] sm:$0xff]  ;;  %v603_v10 = vld [vmem:[%s7608_s3 + $0x28] sm:$0xff]  ;;  %v4104_v11 = vpack.c.bf16 %v351_v6, %v349_v5 }
  0x81   : > { %653 = vperm.xlu0 %4746, %v599_v1   ;;  %663 = vperm.xlu1 %4747, %v601_v2   ;;  %v4106_v12 = vpack.c.bf16 %v356_v8, %v354_v7  ;;  %v353_v13 = vld [vmem:[%s5229_s25 + $0x160] sm:$0xff]  ;;  %v355_v14 = vld [vmem:[%s5229_s25 + $0x170] sm:$0xff]  ;;  %v358_v15 = vld [vmem:[%s5229_s25 + $0x188] sm:$0xff] }
  0x82   : > { %v360_v16 = vld [vmem:[%s5229_s25 + $0x198] sm:$0xff]  ;;  %v604_v17 = vld [vmem:[%s7608_s3 + $0x30] sm:$0xff]  ;;  %v4108_v19 = vpack.c.bf16 %v355_v14, %v353_v13  ;;  %v357_v21 = vld [vmem:[%s5229_s25 + $0x180] sm:$0xff] }
  0x83   : > { %4081 = vmatpush1.bf16.msra.mxu0 %v4080_v32  ;;  %v605_v18 = vld [vmem:[%s7608_s3 + $0x38] sm:$0xff]  ;;  %v4110_v20 = vpack.c.bf16 %v360_v16, %v358_v15  ;;  %v359_v22 = vld [vmem:[%s5229_s25 + $0x190] sm:$0xff]  ;;  %v362_v23 = vld [vmem:[%s5229_s25 + $0x1a8] sm:$0xff] }
  0x84   : > { %4083 = vmatprep.subr.bf16.mxu0 %v4082_v33  ;;  %v364_v24 = vld [vmem:[%s5229_s25 + $0x1b8] sm:$0xff]  ;;  %v606_v25 = vld [vmem:[%s7608_s3 + $0x40] sm:$0xff]  ;;  %v607_v26 = vld [vmem:[%s7608_s3 + $0x48] sm:$0xff]  ;;  %v4112_v27 = vpack.c.bf16 %v359_v22, %v357_v21  ;;  %v7629_v21 = vmov 0.0  }
  0x85   : > { %668 = vperm.xlu0 %4746, %v602_v9   ;;  %673 = vperm.xlu1 %4747, %v603_v10   ;;  %v4114_v28 = vpack.c.bf16 %v364_v24, %v362_v23  ;;  %v361_v29 = vld [vmem:[%s5229_s25 + $0x1a0] sm:$0xff]  ;;  %v363_v30 = vld [vmem:[%s5229_s25 + $0x1b0] sm:$0xff]  ;;  %v366_v31 = vld [vmem:[%s5229_s25 + $0x1c8] sm:$0xff] }
  0x86   : > { %v368_v32 = vld [vmem:[%s5229_s25 + $0x1d8] sm:$0xff]  ;;  %v608_v33 = vld [vmem:[%s7608_s3 + $0x50] sm:$0xff]  ;;  %v4116_v35 = vpack.c.bf16 %v363_v30, %v361_v29  ;;  %v365_v37 = vld [vmem:[%s5229_s25 + $0x1c0] sm:$0xff]  ;;  %2241 = vmatprep.mubr.f32.mxu1 %v7629_v21 }
  0x87   : > { %4085 = vmatpush1.bf16.msra.mxu0 %v4084_v38  ;;  %v609_v34 = vld [vmem:[%s7608_s3 + $0x58] sm:$0xff]  ;;  %v4118_v36 = vpack.c.bf16 %v368_v32, %v366_v31  ;;  %v367_v38 = vld [vmem:[%s5229_s25 + $0x1d0] sm:$0xff]  ;;  %v610_v41 = vld [vmem:[%s7608_s3 + $0x60] sm:$0xff] }
  0x88   : > { %4087 = vmatprep.subr.bf16.mxu0 %v4086_v39  ;;  %v370_v39 = vld [vmem:[%s5229_s25 + $0x1e8] sm:$0xff]  ;;  %v372_v40 = vld [vmem:[%s5229_s25 + $0x1f8] sm:$0xff]  ;;  %v4120_v43 = vpack.c.bf16 %v367_v38, %v365_v37  ;;  %v612_v47 = vld [vmem:[%s7608_s3 + $0x70] sm:$0xff] }
  0x89   : > { %678 = vperm.xlu0 %4746, %v604_v17   ;;  %683 = vperm.xlu1 %4747, %v605_v18   ;;  %v611_v42 = vld [vmem:[%s7608_s3 + $0x68] sm:$0xff]  ;;  %v4122_v44 = vpack.c.bf16 %v372_v40, %v370_v39  ;;  %v613_v48 = vld [vmem:[%s7608_s3 + $0x78] sm:$0xff]  ;;  %v373_v50 = vld [vmem:[#allocation5] sm:$0xff] }
  0x8a   : > { %v378_v53 = vld [vmem:[#allocation5 + $0x28] sm:$0xff]  ;;  %v377_v54 = vld [vmem:[#allocation5 + $0x20] sm:$0xff]  ;;  %v380_v55 = vld [vmem:[#allocation5 + $0x38] sm:$0xff] }
  0x8b   : > { %4089 = vmatpush1.bf16.msra.mxu0 %v4088_v45  ;;  %v369_v45 = vld [vmem:[%s5229_s25 + $0x1e0] sm:$0xff]  ;;  %v379_v56 = vld [vmem:[#allocation5 + $0x30] sm:$0xff]  ;;  %v384_v59 = vld [vmem:[#allocation5 + $0x58] sm:$0xff] }
  0x8c   : > { %4091 = vmatprep.subr.bf16.mxu0 %v4090_v46  ;;  %v371_v46 = vld [vmem:[%s5229_s25 + $0x1f0] sm:$0xff]  ;;  %v381_v58 = vld [vmem:[#allocation5 + $0x40] sm:$0xff]  ;;  %v386_v61 = vld [vmem:[#allocation5 + $0x68] sm:$0xff] }
  0x8d   : > { %688 = vperm.xlu0 %4746, %v606_v25   ;;  %693 = vperm.xlu1 %4747, %v607_v26   ;;  %v4124_v49 = vpack.c.bf16 %v371_v46, %v369_v45  ;;  %v385_v62 = vld [vmem:[#allocation5 + $0x60] sm:$0xff]  ;;  %v388_v63 = vld [vmem:[#allocation5 + $0x78] sm:$0xff]  ;;  %v387_v0 = vld [vmem:[#allocation5 + $0x70] sm:$0xff] }
  0x8e   : > { %v390_v1 = vld [vmem:[#allocation5 + $0x88] sm:$0xff]  ;;  %v389_v2 = vld [vmem:[#allocation5 + $0x80] sm:$0xff]  ;;  %v396_v7 = vld [vmem:[#allocation5 + $0xb8] sm:$0xff] }
  0x8f   : > { %4093 = vmatpush1.bf16.msra.mxu0 %v4092_v51  ;;  %v376_v51 = vld [vmem:[#allocation5 + $0x18] sm:$0xff]  ;;  %v394_v5 = vld [vmem:[#allocation5 + $0xa8] sm:$0xff]  ;;  %v393_v6 = vld [vmem:[#allocation5 + $0xa0] sm:$0xff] }
  0x90   : > { %4095 = vmatprep.subr.bf16.mxu0 %v4094_v52  ;;  %v375_v52 = vld [vmem:[#allocation5 + $0x10] sm:$0xff]  ;;  %v398_v9 = vld [vmem:[#allocation5 + $0xc8] sm:$0xff]  ;;  %v397_v10 = vld [vmem:[#allocation5 + $0xc0] sm:$0xff] }
  0x91   : > { %698 = vperm.xlu0 %4746, %v608_v33   ;;  %703 = vperm.xlu1 %4747, %v609_v34   ;;  %v395_v8 = vld [vmem:[#allocation5 + $0xb0] sm:$0xff]  ;;  %v402_v13 = vld [vmem:[#allocation5 + $0xe8] sm:$0xff]  ;;  %v401_v14 = vld [vmem:[#allocation5 + $0xe0] sm:$0xff] }
  0x92   : > { %v404_v15 = vld [vmem:[#allocation5 + $0xf8] sm:$0xff]  ;;  %v403_v16 = vld [vmem:[#allocation5 + $0xf0] sm:$0xff] }
  0x93   : > { %4097 = vmatpush1.bf16.msra.mxu0 %v4096_v57  ;;  %v382_v57 = vld [vmem:[#allocation5 + $0x48] sm:$0xff] }
  0x94   : > { %4099 = vmatprep.subr.bf16.mxu0 %v4098_v60  ;;  %v383_v60 = vld [vmem:[#allocation5 + $0x50] sm:$0xff] }
  0x95   : > { %708 = vperm.xlu0 %4746, %v610_v41   ;;  %713 = vperm.xlu1 %4747, %v611_v42  }
  0x97   : > { %4101 = vmatpush1.bf16.msra.mxu0 %v4100_v3  ;;  %v392_v3 = vld [vmem:[#allocation5 + $0x98] sm:$0xff] }
  0x98   : > { %4103 = vmatprep.subr.bf16.mxu0 %v4102_v4  ;;  %v391_v4 = vld [vmem:[#allocation5 + $0x90] sm:$0xff] }
  0x99   : > { %718 = vperm.xlu0 %4746, %v612_v47   ;;  %723 = vperm.xlu1 %4747, %v613_v48  }
  0x9b   : > { %4105 = vmatpush1.bf16.msra.mxu0 %v4104_v11  ;;  %v400_v11 = vld [vmem:[#allocation5 + $0xd8] sm:$0xff] }
  0x9c   : > { %4107 = vmatprep.subr.bf16.mxu0 %v4106_v12  ;;  %v399_v12 = vld [vmem:[#allocation5 + $0xd0] sm:$0xff] }
  0x9f   : > { %4109 = vmatpush1.bf16.msra.mxu0 %v4108_v19 }
  0xa0   : > { %4111 = vmatprep.subr.bf16.mxu0 %v4110_v20 }
  0xa3   : > { %4113 = vmatpush1.bf16.msra.mxu0 %v4112_v27 }
  0xa4   : > { %4115 = vmatprep.subr.bf16.mxu0 %v4114_v28 }
  0xa7   : > { %4117 = vmatpush1.bf16.msra.mxu0 %v4116_v35 }
  0xa8   : > { %4119 = vmatprep.subr.bf16.mxu0 %v4118_v36 }
  0xab   : > { %4121 = vmatpush1.bf16.msra.mxu0 %v4120_v43 }
  0xac   : > { %4123 = vmatprep.subr.bf16.mxu0 %v4122_v44 }
  0xaf   : > { %4125 = vmatpush1.bf16.msra.mxu0 %v4124_v49 }
  0xb2   : > { %502 = vmatmul.mubr.f32.vlgmr.msra.gmra.mrb[0].mxu0 %v373_v50 }
  0xb3   : > { %507 = vmatprep.mubr.f32.mxu0 %v376_v51 }
  0xb6   : > { %508 = vmatmul.mubr.f32.gmra.mrb[2].mxu0 %v375_v52 }
  0xb7   : > { %513 = vmatprep.mubr.f32.mxu0 %v378_v53 }
  0xba   : > { %514 = vmatmul.mubr.f32.gmra.mrb[4].mxu0 %v377_v54 }
  0xbb   : > { %519 = vmatprep.mubr.f32.mxu0 %v380_v55 }
  0xbe   : > { %520 = vmatmul.mubr.f32.gmra.mrb[6].mxu0 %v379_v56 }
  0xbf   : > { %525 = vmatprep.mubr.f32.mxu0 %v382_v57 }
  0xc2   : > { %526 = vmatmul.mubr.f32.gmra.mrb[8].mxu0 %v381_v58 }
  0xc3   : > { %531 = vmatprep.mubr.f32.mxu0 %v384_v59 }
  0xc6   : > { %532 = vmatmul.mubr.f32.gmra.mrb[10].mxu0 %v383_v60 }
  0xc7   : > { %537 = vmatprep.mubr.f32.mxu0 %v386_v61 }
  0xca   : > { %538 = vmatmul.mubr.f32.gmra.mrb[12].mxu0 %v385_v62 }
  0xcb   : > { %543 = vmatprep.mubr.f32.mxu0 %v388_v63 }
  0xce   : > { %544 = vmatmul.mubr.f32.gmra.mrb[14].mxu0 %v387_v0 }
  0xcf   : > { %549 = vmatprep.mubr.f32.mxu0 %v390_v1 }
  0xd2   : > { %550 = vmatmul.mubr.f32.gmra.mrb[16].mxu0 %v389_v2 }
  0xd3   : > { %555 = vmatprep.mubr.f32.mxu0 %v392_v3 }
  0xd6   : > { %556 = vmatmul.mubr.f32.gmra.mrb[18].mxu0 %v391_v4 }
  0xd7   : > { %561 = vmatprep.mubr.f32.mxu0 %v394_v5 }
  0xda   : > { %562 = vmatmul.mubr.f32.gmra.mrb[20].mxu0 %v393_v6 }
  0xdb   : > { %567 = vmatprep.mubr.f32.mxu0 %v396_v7 }
  0xde   : > { %568 = vmatmul.mubr.f32.gmra.mrb[22].mxu0 %v395_v8 }
  0xdf   : > { %573 = vmatprep.mubr.f32.mxu0 %v398_v9 }
  0xe2   : > { %574 = vmatmul.mubr.f32.gmra.mrb[24].mxu0 %v397_v10 }
  0xe3   : > { %579 = vmatprep.mubr.f32.mxu0 %v400_v11 }
  0xe6   : > { %580 = vmatmul.mubr.f32.gmra.mrb[26].mxu0 %v399_v12 }
  0xe7   : > { %585 = vmatprep.mubr.f32.mxu0 %v402_v13 }
  0xea   : > { %586 = vmatmul.mubr.f32.gmra.mrb[28].mxu0 %v401_v14 }
  0xeb   : > { %591 = vmatprep.mubr.f32.mxu0 %v404_v15 }
  0xee   : > { %592 = vmatmul.mubr.f32.gmra.mrb[30].mxu0 %v403_v16 }
  0xef   : > { %1151 = vmatprep.mubr.f32.mxu0 %v7629_v21 }
  0xfc   : > { %v649_v22 = vpop.permute.xlu0 %648  ;;  %v659_v25 = vpop.permute.xlu1 %658 }
 0x100   : > { %v654_v35 = vpop.permute.xlu0 %653  ;;  %v664_v42 = vpop.permute.xlu1 %663 }
 0x104   : > { %v669_v53 = vpop.permute.xlu0 %668  ;;  %v674_v61 = vpop.permute.xlu1 %673 }
 0x108   : > { %v679_v6 = vpop.permute.xlu0 %678  ;;  %v684_v15 = vpop.permute.xlu1 %683 }
 0x185   : > { %v503_v17 = vpop.f32.mrb[0].mxu0 }
 0x186   : > { %v505_v18 = vpop.f32.mrb[1].mxu0  ;;  %v614_v23 = vmul.f32 2.0, %v503_v17 }
 0x187   : > { %v615_v24 = vmul.f32 2.0, %v505_v18 }
 0x188   : > { %v5353_v30 = vsub.f32 %v649_v22, %v614_v23 }
 0x189   : > { %v509_v19 = vpop.f32.mrb[2].mxu0  ;;  %v5357_v33 = vsub.f32 %v649_v22, %v615_v24 }
 0x18a   : > { %v511_v20 = vpop.f32.mrb[3].mxu0  ;;  %v616_v31 = vmul.f32 2.0, %v509_v19 }
 0x18b   : > { %v617_v34 = vmul.f32 2.0, %v511_v20 }
 0x18c   : > { %v5365_v44 = vsub.f32 %v654_v35, %v616_v31 }
 0x18d   : > { %v515_v26 = vpop.f32.mrb[4].mxu0  ;;  %v5369_v46 = vsub.f32 %v654_v35, %v617_v34 }
 0x18e   : > { %v618_v27 = vmul.f32 2.0, %v515_v26  ;;  %v517_v28 = vpop.f32.mrb[5].mxu0 }
 0x18f   : > { %v619_v29 = vmul.f32 2.0, %v517_v28 }
 0x190   : > { %v5355_v32 = vsub.f32 %v659_v25, %v618_v27 }
 0x191   : > { %v5359_v36 = vsub.f32 %v659_v25, %v619_v29  ;;  %v521_v37 = vpop.f32.mrb[6].mxu0  ;;  %v689_v25 = vpop.permute.xlu0 %688 }
 0x192   : > { %v775_v38 = vmin.f32 %v5353_v30, %v5355_v32  ;;  %v620_v39 = vmul.f32 2.0, %v521_v37  ;;  %v523_v40 = vpop.f32.mrb[7].mxu0 }
 0x193   : > { %v796_v41 = vmin.f32 %v5357_v33, %v5359_v36  ;;  %v621_v43 = vmul.f32 2.0, %v523_v40 }
 0x194   : > { %v5367_v45 = vsub.f32 %v664_v42, %v620_v39 }
 0x195   : > { %v5371_v47 = vsub.f32 %v664_v42, %v621_v43  ;;  %v527_v48 = vpop.f32.mrb[8].mxu0 }
 0x196   : > { %v776_v49 = vmin.f32 %v5365_v44, %v5367_v45  ;;  %v622_v50 = vmul.f32 2.0, %v527_v48  ;;  %v529_v51 = vpop.f32.mrb[9].mxu0 }
 0x197   : > { %v797_v52 = vmin.f32 %v5369_v46, %v5371_v47  ;;  %v623_v54 = vmul.f32 2.0, %v529_v51  ;;  %v699_v51 = vpop.permute.xlu0 %698 }
 0x198   : > { %v5377_v55 = vsub.f32 %v669_v53, %v622_v50 }
 0x199   : > { %v5379_v56 = vsub.f32 %v669_v53, %v623_v54  ;;  %v533_v57 = vpop.f32.mrb[10].mxu0 }
 0x19a   : > { %v777_v58 = vmin.f32 %v775_v38, %v5377_v55  ;;  %v624_v59 = vmul.f32 2.0, %v533_v57  ;;  %v535_v60 = vpop.f32.mrb[11].mxu0  ;;  %v694_v38 = vpop.permute.xlu1 %693 }
 0x19b   : > { %v798_v62 = vmin.f32 %v796_v41, %v5379_v56  ;;  %v625_v63 = vmul.f32 2.0, %v535_v60 }
 0x19c   : > { %v5383_v0 = vsub.f32 %v674_v61, %v624_v59 }
 0x19d   : > { %v5385_v1 = vsub.f32 %v674_v61, %v625_v63  ;;  %v539_v2 = vpop.f32.mrb[12].mxu0 }
 0x19e   : > { %v778_v3 = vmin.f32 %v776_v49, %v5383_v0  ;;  %v626_v4 = vmul.f32 2.0, %v539_v2  ;;  %v541_v5 = vpop.f32.mrb[13].mxu0 }
 0x19f   : > { %v799_v7 = vmin.f32 %v797_v52, %v5385_v1  ;;  %v627_v8 = vmul.f32 2.0, %v541_v5 }
 0x1a0   : > { %v5389_v9 = vsub.f32 %v679_v6, %v626_v4 }
 0x1a1   : > { %v5391_v10 = vsub.f32 %v679_v6, %v627_v8  ;;  %v545_v11 = vpop.f32.mrb[14].mxu0 }
 0x1a2   : > { %v779_v12 = vmin.f32 %v777_v58, %v5389_v9  ;;  %v628_v13 = vmul.f32 2.0, %v545_v11  ;;  %v547_v14 = vpop.f32.mrb[15].mxu0  ;;  %v709_v11 = vpop.permute.xlu0 %708 }
 0x1a3   : > { %v800_v16 = vmin.f32 %v798_v62, %v5391_v10  ;;  %v629_v17 = vmul.f32 2.0, %v547_v14  ;;  %v704_v62 = vpop.permute.xlu1 %703 }
 0x1a4   : > { %v5395_v18 = vsub.f32 %v684_v15, %v628_v13 }
 0x1a5   : > { %v5397_v19 = vsub.f32 %v684_v15, %v629_v17  ;;  %v551_v20 = vpop.f32.mrb[16].mxu0 }
 0x1a6   : > { %v780_v22 = vmin.f32 %v778_v3, %v5395_v18  ;;  %v630_v23 = vmul.f32 2.0, %v551_v20  ;;  %v553_v24 = vpop.f32.mrb[17].mxu0 }
 0x1a7   : > { %v801_v26 = vmin.f32 %v799_v7, %v5397_v19  ;;  %v631_v27 = vmul.f32 2.0, %v553_v24 }
 0x1a8   : > { %v5401_v28 = vsub.f32 %v689_v25, %v630_v23  ;;  %v714_v23 = vpop.permute.xlu1 %713 }
 0x1a9   : > { %v5403_v29 = vsub.f32 %v689_v25, %v631_v27  ;;  %v557_v31 = vpop.f32.mrb[18].mxu0 }
 0x1aa   : > { %v781_v34 = vmin.f32 %v779_v12, %v5401_v28  ;;  %v632_v35 = vmul.f32 2.0, %v557_v31  ;;  %v559_v37 = vpop.f32.mrb[19].mxu0 }
 0x1ab   : > { %v802_v39 = vmin.f32 %v800_v16, %v5403_v29  ;;  %v633_v40 = vmul.f32 2.0, %v559_v37 }
 0x1ac   : > { %v5407_v41 = vsub.f32 %v694_v38, %v632_v35 }
 0x1ad   : > { %v5409_v42 = vsub.f32 %v694_v38, %v633_v40  ;;  %v563_v43 = vpop.f32.mrb[20].mxu0  ;;  %v719_v38 = vpop.permute.xlu0 %718 }
 0x1ae   : > { %v782_v48 = vmin.f32 %v780_v22, %v5407_v41  ;;  %v634_v49 = vmul.f32 2.0, %v563_v43  ;;  %v565_v50 = vpop.f32.mrb[21].mxu0 }
 0x1af   : > { %v803_v52 = vmin.f32 %v801_v26, %v5409_v42  ;;  %v635_v53 = vmul.f32 2.0, %v565_v50 }
 0x1b0   : > { %v5413_v54 = vsub.f32 %v699_v51, %v634_v49 }
 0x1b1   : > { %v5415_v57 = vsub.f32 %v699_v51, %v635_v53  ;;  %v569_v58 = vpop.f32.mrb[22].mxu0  ;;  %v724_v53 = vpop.permute.xlu1 %723 }
 0x1b2   : > { %v783_v59 = vmin.f32 %v781_v34, %v5413_v54  ;;  %v636_v60 = vmul.f32 2.0, %v569_v58  ;;  %v571_v61 = vpop.f32.mrb[23].mxu0 }
 0x1b3   : > { %v804_v63 = vmin.f32 %v802_v39, %v5415_v57  ;;  %v637_v2 = vmul.f32 2.0, %v571_v61 }
 0x1b4   : > { %v5419_v3 = vsub.f32 %v704_v62, %v636_v60 }
 0x1b5   : > { %v5421_v4 = vsub.f32 %v704_v62, %v637_v2  ;;  %v575_v5 = vpop.f32.mrb[24].mxu0 }
 0x1b6   : > { %v784_v6 = vmin.f32 %v782_v48, %v5419_v3  ;;  %v638_v7 = vmul.f32 2.0, %v575_v5  ;;  %v577_v8 = vpop.f32.mrb[25].mxu0  ;;  %v758_v5 = vlaneseq }
 0x1b7   : > { %v805_v12 = vmin.f32 %v803_v52, %v5421_v4  ;;  %v639_v13 = vmul.f32 2.0, %v577_v8 }
 0x1b8   : > { %v5425_v14 = vsub.f32 %v709_v11, %v638_v7 }
 0x1b9   : > { %v5427_v15 = vsub.f32 %v709_v11, %v639_v13  ;;  %v581_v16 = vpop.f32.mrb[26].mxu0 }
 0x1ba   : > { %v785_v17 = vmin.f32 %v783_v59, %v5425_v14  ;;  %v640_v20 = vmul.f32 2.0, %v581_v16  ;;  %v583_v22 = vpop.f32.mrb[27].mxu0 }
 0x1bb   : > { %v806_v24 = vmin.f32 %v804_v63, %v5427_v15  ;;  %v641_v25 = vmul.f32 2.0, %v583_v22 }
 0x1bc   : > { %v5431_v26 = vsub.f32 %v714_v23, %v640_v20 }
 0x1bd   : > { %v5433_v27 = vsub.f32 %v714_v23, %v641_v25  ;;  %v587_v31 = vpop.f32.mrb[28].mxu0 }
 0x1be   : > { %v786_v34 = vmin.f32 %v784_v6, %v5431_v26  ;;  %v642_v35 = vmul.f32 2.0, %v587_v31  ;;  %v589_v37 = vpop.f32.mrb[29].mxu0 }
 0x1bf   : > { %v807_v39 = vmin.f32 %v805_v12, %v5433_v27  ;;  %v643_v40 = vmul.f32 2.0, %v589_v37  ;;  %v5449_v12 = vshrl.u32 %v758_v5, 7  ;;  %v405_v37 = vld [vmem:[#allocation7] sm:$0xff] }
 0x1c0   : > { %v5437_v43 = vsub.f32 %v719_v38, %v642_v35 }
 0x1c1   : > { %v5439_v48 = vsub.f32 %v719_v38, %v643_v40  ;;  %v593_v49 = vpop.f32.mrb[30].mxu0  ;;  %v5452_v22 = vadd.s32 8, %v5449_v12  ;;  %v5455_v23 = vadd.s32 16, %v5449_v12  ;;  %v5458_v25 = vadd.s32 24, %v5449_v12 }
 0x1c2   : > { %v787_v50 = vmin.f32 %v785_v17, %v5437_v43  ;;  %v644_v51 = vmul.f32 2.0, %v593_v49  ;;  %v595_v52 = vpop.f32.mrb[31].mxu0  ;;  %v5461_v31 = vadd.s32 32, %v5449_v12  ;;  %v5467_v38 = vadd.s32 48, %v5449_v12 }
 0x1c3   : > { %v808_v58 = vmin.f32 %v806_v24, %v5439_v48  ;;  %v645_v59 = vmul.f32 2.0, %v595_v52  ;;  %v5473_v40 = vadd.s32 64, %v5449_v12  ;;  %v5476_v49 = vadd.s32 72, %v5449_v12 }
 0x1c4   : > { %v5443_v60 = vsub.f32 %v724_v53, %v644_v51  ;;  %v5482_v51 = vadd.s32 88, %v5449_v12  ;;  %v5485_v52 = vadd.s32 96, %v5449_v12  ;;  %v5530_v5 = vadd.s32 120, %v5449_v12 }
 0x1c5   : > { %v5445_v61 = vsub.f32 %v724_v53, %v645_v59  ;;  %v5493_v59 = vadd.s32 112, %v5449_v12 }
 0x1c6   : > { %v788_v62 = vmin.f32 %v786_v34, %v5443_v60  ;;  %v5464_v34 = vadd.s32 40, %v5449_v12 }
 0x1c7   : > { %v809_v63 = vmin.f32 %v807_v39, %v5445_v61  ;;  %v5470_v39 = vadd.s32 56, %v5449_v12 }
 0x1c8   : > { %v789_v2 = vmin.f32 %v787_v50, %v788_v62  ;;  %v5479_v50 = vadd.s32 80, %v5449_v12 }
 0x1c9   : > { %v810_v6 = vmin.f32 %v808_v58, %v809_v63  ;;  %v5490_v58 = vadd.s32 104, %v5449_v12  ;;  %v5495_v63 = vand.u32 4294901760, %v405_v37 }
 0x1ca   : > { %v790_v7 = vrot.slane %v789_v2, 4 }
 0x1cb   : > { %v811_v8 = vrot.slane %v810_v6, 4  ;;  %7800 = vst [vmem:[#allocation12_spill] sm:$0xff] %v5495_v63 }
 0x1cc   : > { %v791_v11 = vmin.f32 %v789_v2, %v790_v7  ;;  %v406_v2 = vld [vmem:[#allocation7 + $0x8] sm:$0xff]  ;;  %v5535_v7 = vsub.f32 %v405_v37, %v5495_v63 }
 0x1cd   : > { %v812_v13 = vmin.f32 %v810_v6, %v811_v8  ;;  %v5537_v8 = vand.u32 4294901760, %v406_v2 }
 0x1ce   : > { %v792_v16 = vrot.slane %v791_v11, 2  ;;  %7801 = vst [vmem:[#allocation13_spill] sm:$0xff] %v5535_v7 }
 0x1cf   : > { %v813_v17 = vrot.slane %v812_v13, 2  ;;  %7802 = vst [vmem:[#allocation14_spill] sm:$0xff] %v5537_v8 }
 0x1d0   : > { %v793_v20 = vmin.f32 %v791_v11, %v792_v16 }
 0x1d1   : > { %v814_v24 = vmin.f32 %v812_v13, %v813_v17 }
 0x1d2   : > { %v794_v35 = vrot.slane %v793_v20, 1 }
 0x1d3   : > { %v815_v62 = vrot.slane %v814_v24, 1 }
 0x1d4   : > { %v5487_v53 = vmin.f32 %v793_v20, %v794_v35 }
 0x1d5   : > { %v5532_v6 = vmin.f32 %v814_v24, %v815_v62  ;;  %v7620_v62 = vand.u32 4294901760, %v5535_v7 }
 0x1d6   : > { %vm817_vm0 = vcmp.eq.f32.partialorder %v5353_v30, %v5487_v53  ;;  %vm819_vm1 = vcmp.eq.f32.partialorder %v5365_v44, %v5487_v53  ;;  %vm821_vm2 = vcmp.eq.f32.partialorder %v5355_v32, %v5487_v53  ;;  %vm823_vm3 = vcmp.eq.f32.partialorder %v5367_v45, %v5487_v53 }
 0x1d7   : > { %vm825_vm4 = vcmp.eq.f32.partialorder %v5377_v55, %v5487_v53  ;;  %vm827_vm5 = vcmp.eq.f32.partialorder %v5383_v0, %v5487_v53  ;;  %vm829_vm6 = vcmp.eq.f32.partialorder %v5389_v9, %v5487_v53  ;;  %vm831_vm7 = vcmp.eq.f32.partialorder %v5395_v18, %v5487_v53 }
 0x1d8   : > { %vm833_vm8 = vcmp.eq.f32.partialorder %v5401_v28, %v5487_v53  ;;  %vm835_vm9 = vcmp.eq.f32.partialorder %v5407_v41, %v5487_v53  ;;  %vm837_vm10 = vcmp.eq.f32.partialorder %v5413_v54, %v5487_v53  ;;  %vm839_vm11 = vcmp.eq.f32.partialorder %v5419_v3, %v5487_v53 }
 0x1d9   : > { %vm841_vm12 = vcmp.eq.f32.partialorder %v5425_v14, %v5487_v53  ;;  %vm843_vm13 = vcmp.eq.f32.partialorder %v5431_v26, %v5487_v53  ;;  %vm845_vm14 = vcmp.eq.f32.partialorder %v5437_v43, %v5487_v53  ;;  %vm847_vm15 = vcmp.eq.f32.partialorder %v5443_v60, %v5487_v53 }
 0x1da   : > { %v849_v11 = vsel %vm817_vm0, %v5449_v12, 128  ;;  %v851_v13 = vsel %vm819_vm1, %v5452_v22, 128  ;;  %v853_v16 = vsel %vm821_vm2, %v5455_v23, 128  ;;  %v855_v17 = vsel %vm823_vm3, %v5458_v25, 128 }
 0x1db   : > { %v857_v30 = vsel %vm825_vm4, %v5461_v31, 128  ;;  %v859_v44 = vsel %vm827_vm5, %v5464_v34, 128  ;;  %v861_v32 = vsel %vm829_vm6, %v5467_v38, 128  ;;  %v863_v45 = vsel %vm831_vm7, %v5470_v39, 128 }
 0x1dc   : > { %v865_v55 = vsel %vm833_vm8, %v5473_v40, 128  ;;  %v867_v0 = vsel %vm835_vm9, %v5476_v49, 128  ;;  %v869_v9 = vsel %vm837_vm10, %v5479_v50, 128  ;;  %v871_v18 = vsel %vm839_vm11, %v5482_v51, 128 }
 0x1dd   : > { %vm881_vm0 = vcmp.lt.s32.totalorder %v849_v11, %v853_v16  ;;  %vm883_vm1 = vcmp.lt.s32.totalorder %v851_v13, %v855_v17  ;;  %vm818_vm2 = vcmp.eq.f32.partialorder %v5357_v33, %v5532_v6  ;;  %vm820_vm3 = vcmp.eq.f32.partialorder %v5369_v46, %v5532_v6 }
 0x1de   : > { %v882_v28 = vsel %vm881_vm0, %v849_v11, %v853_v16  ;;  %v884_v41 = vsel %vm883_vm1, %v851_v13, %v855_v17  ;;  %vm834_vm5 = vcmp.eq.f32.partialorder %v5403_v29, %v5532_v6  ;;  %vm842_vm11 = vcmp.eq.f32.partialorder %v5427_v15, %v5532_v6 }
 0x1df   : > { %vm885_vm6 = vcmp.lt.s32.totalorder %v882_v28, %v857_v30  ;;  %vm887_vm7 = vcmp.lt.s32.totalorder %v884_v41, %v859_v44  ;;  %vm844_vm8 = vcmp.eq.f32.partialorder %v5433_v27, %v5532_v6  ;;  %v5621_v11 = vsub.f32 %v406_v2, %v5537_v8 }
 0x1e0   : > { %v886_v54 = vsel %vm885_vm6, %v882_v28, %v857_v30  ;;  %v888_v3 = vsel %vm887_vm7, %v884_v41, %v859_v44  ;;  %vm840_vm7 = vcmp.eq.f32.partialorder %v5421_v4, %v5532_v6  ;;  %v873_v13 = vsel %vm841_vm12, %v5485_v52, 128  ;;  %v408_v28 = vld [vmem:[#allocation7 + $0x18] sm:$0xff]  ;;  %v426_v4 = vld [vmem:[#allocation7 + $0xa8] sm:$0xff] }
 0x1e1   : > { %vm889_vm0 = vcmp.lt.s32.totalorder %v886_v54, %v861_v32  ;;  %vm891_vm1 = vcmp.lt.s32.totalorder %v888_v3, %v863_v45  ;;  %7803 = vst [vmem:[#allocation15_spill] sm:$0xff] %v5621_v11  ;;  %v875_v16 = vsel %vm843_vm13, %v5490_v58, 128  ;;  %v877_v44 = vsel %vm845_vm14, %v5493_v59, 128 }
 0x1e2   : > { %v890_v20 = vsel %vm889_vm0, %v886_v54, %v861_v32  ;;  %v892_v24 = vsel %vm891_vm1, %v888_v3, %v863_v45  ;;  %vm846_vm0 = vcmp.eq.f32.partialorder %v5439_v48, %v5532_v6  ;;  %vm848_vm1 = vcmp.eq.f32.partialorder %v5445_v61, %v5532_v6  ;;  %v5647_v45 = vld [vmem:[#allocation7 + $0xa0] sm:$0xff] }
 0x1e3   : > { %vm893_vm10 = vcmp.lt.s32.totalorder %v890_v20, %v865_v55  ;;  %vm895_vm9 = vcmp.lt.s32.totalorder %v892_v24, %v867_v0  ;;  %v879_v2 = vsel %vm847_vm15, %v5530_v5, 128  ;;  %v850_v26 = vsel %vm818_vm2, %v5449_v12, 128 }
 0x1e4   : > { %v894_v35 = vsel %vm893_vm10, %v890_v20, %v865_v55  ;;  %v896_v37 = vsel %vm895_vm9, %v892_v24, %v867_v0  ;;  %v852_v43 = vsel %vm820_vm3, %v5452_v22, 128  ;;  %v407_v55 = vld [vmem:[#allocation7 + $0x10] sm:$0xff]  ;;  %vm7804_vm14 = vcmp.eq.f32.partialorder %v5359_v36, %v5532_v6 }
 0x1e5   : > { %vm897_vm6 = vcmp.lt.s32.totalorder %v894_v35, %v869_v9  ;;  %vm899_vm4 = vcmp.lt.s32.totalorder %v896_v37, %v871_v18  ;;  %v854_v60 = vsel %vm7804_vm14, %v5455_v23, 128  ;;  %vm7805_vm15 = vcmp.eq.f32.partialorder %v5371_v47, %v5532_v6 }
 0x1e6   : > { %v898_v17 = vsel %vm897_vm6, %v894_v35, %v869_v9  ;;  %v900_v30 = vsel %vm899_vm4, %v896_v37, %v871_v18  ;;  %v856_v33 = vsel %vm7805_vm15, %v5458_v25, 128  ;;  %v5660_v46 = vsub.f32 %v5535_v7, %v7620_v62 }
 0x1e7   : > { %vm901_vm9 = vcmp.lt.s32.totalorder %v898_v17, %v873_v13  ;;  %vm903_vm10 = vcmp.lt.s32.totalorder %v900_v30, %v875_v16  ;;  %v7619_v9 = vand.u32 4294901760, %v5621_v11  ;;  %v5664_v18 = vand.u32 4294901760, %v5647_v45 }
 0x1e8   : > { %v902_v14 = vsel %vm901_vm9, %v898_v17, %v873_v13  ;;  %v904_v32 = vsel %vm903_vm10, %v900_v30, %v875_v16  ;;  %v5666_v36 = vand.u32 4294901760, %v407_v55  ;;  %vm7808_vm3 = vcmp.eq.f32.partialorder %v5379_v56, %v5532_v6  ;;  %v409_v16 = vld [vmem:[#allocation7 + $0x20] sm:$0xff] }
 0x1e9   : > { %vm905_vm12 = vcmp.lt.s32.totalorder %v902_v14, %v877_v44  ;;  %vm907_vm13 = vcmp.lt.s32.totalorder %v904_v32, %v879_v2  ;;  %7806 = vst [vmem:[#allocation16_spill] sm:$0xff] %v5664_v18  ;;  %v858_v47 = vsel %vm7808_vm3, %v5461_v31, 128  ;;  %vm920_vm4 = vcmp.lt.s32.totalorder %v850_v26, %v854_v60 }
 0x1ea   : > { %v906_v53 = vsel %vm905_vm12, %v902_v14, %v877_v44  ;;  %v908_v0 = vsel %vm907_vm13, %v904_v32, %v879_v2  ;;  %7807 = vst [vmem:[#allocation17_spill] sm:$0xff] %v5666_v36  ;;  %vm922_vm6 = vcmp.lt.s32.totalorder %v852_v43, %v856_v33  ;;  %vm7809_vm9 = vcmp.eq.f32.partialorder %v5385_v1, %v5532_v6 }
 0x1eb   : > { %vm909_vm2 = vcmp.lt.s32.totalorder %v906_v53, %v908_v0  ;;  %v860_v3 = vsel %vm7809_vm9, %v5464_v34, 128  ;;  %v921_v20 = vsel %vm920_vm4, %v850_v26, %v854_v60  ;;  %v923_v24 = vsel %vm922_vm6, %v852_v43, %v856_v33 }
 0x1ec   : > { %v910_v41 = vsel %vm909_vm2, %v906_v53, %v908_v0  ;;  %vm7810_vm10 = vcmp.eq.f32.partialorder %v5391_v10, %v5532_v6  ;;  %vm924_vm12 = vcmp.lt.s32.totalorder %v921_v20, %v858_v47  ;;  %vm926_vm13 = vcmp.lt.s32.totalorder %v923_v24, %v860_v3 }
 0x1ed   : > { %v911_v54 = vrot.slane %v910_v41, 4  ;;  %v862_v35 = vsel %vm7810_vm10, %v5467_v38, 128  ;;  %v5680_v37 = vand.u32 4294901760, %v408_v28  ;;  %vm7812_vm15 = vcmp.eq.f32.partialorder %v5397_v19, %v5532_v6 }
 0x1ee   : > { %v864_v56 = vsel %vm7812_vm15, %v5470_v39, 128  ;;  %v925_v13 = vsel %vm924_vm12, %v921_v20, %v858_v47  ;;  %v927_v1 = vsel %vm926_vm13, %v923_v24, %v860_v3  ;;  %v866_v10 = vsel %vm834_vm5, %v5473_v40, 128  ;;  %v427_v3 = vld [vmem:[#allocation7 + $0xb0] sm:$0xff] }
 0x1ef   : > { %7811 = vst [vmem:[#allocation18_spill] sm:$0xff] %v5680_v37  ;;  %vm912_vm14 = vcmp.lt.s32.totalorder %v910_v41, %v911_v54  ;;  %vm928_vm2 = vcmp.lt.s32.totalorder %v925_v13, %v862_v35  ;;  %vm930_vm3 = vcmp.lt.s32.totalorder %v927_v1, %v864_v56  ;;  %vm7813_vm4 = vcmp.eq.f32.partialorder %v5409_v42, %v5532_v6 }
 0x1f0   : > { %v913_v17 = vsel %vm912_vm14, %v910_v41, %v911_v54  ;;  %v868_v44 = vsel %vm7813_vm4, %v5476_v49, 128  ;;  %v929_v2 = vsel %vm928_vm2, %v925_v13, %v862_v35  ;;  %v931_v19 = vsel %vm930_vm3, %v927_v1, %v864_v56  ;;  %v410_v1 = vld [vmem:[#allocation7 + $0x28] sm:$0xff] }
 0x1f1   : > { %v914_v30 = vrot.slane %v913_v17, 2  ;;  %vm7814_vm6 = vcmp.eq.f32.partialorder %v5415_v57, %v5532_v6  ;;  %vm932_vm9 = vcmp.lt.s32.totalorder %v929_v2, %v866_v10  ;;  %vm934_vm10 = vcmp.lt.s32.totalorder %v931_v19, %v868_v44 }
 0x1f2   : > { %v870_v14 = vsel %vm7814_vm6, %v5479_v50, 128  ;;  %v5698_v32 = vand.u32 4294901760, %v409_v16  ;;  %v872_v29 = vsel %vm840_vm7, %v5482_v51, 128  ;;  %v933_v26 = vsel %vm932_vm9, %v929_v2, %v866_v10  ;;  %v428_v2 = vld [vmem:[#allocation7 + $0xb8] sm:$0xff] }
 0x1f3   : > { %vm915_vm5 = vcmp.lt.s32.totalorder %v913_v17, %v914_v30  ;;  %v935_v42 = vsel %vm934_vm10, %v931_v19, %v868_v44  ;;  %v874_v60 = vsel %vm842_vm11, %v5485_v52, 128  ;;  %vm936_vm12 = vcmp.lt.s32.totalorder %v933_v26, %v870_v14 }
 0x1f4   : > { %7815 = vst [vmem:[#allocation19_spill] sm:$0xff] %v5698_v32  ;;  %v916_v43 = vsel %vm915_vm5, %v913_v17, %v914_v30  ;;  %vm938_vm13 = vcmp.lt.s32.totalorder %v935_v42, %v872_v29  ;;  %v876_v33 = vsel %vm844_vm8, %v5490_v58, 128  ;;  %v937_v53 = vsel %vm936_vm12, %v933_v26, %v870_v14 }
 0x1f5   : > { %v917_v57 = vrot.slane %v916_v43, 1  ;;  %v939_v0 = vsel %vm938_vm13, %v935_v42, %v872_v29  ;;  %v878_v41 = vsel %vm846_vm0, %v5493_v59, 128  ;;  %vm940_vm7 = vcmp.lt.s32.totalorder %v937_v53, %v874_v60  ;;  %v429_v42 = vld [vmem:[#allocation7 + $0xc0] sm:$0xff] }
 0x1f6   : > { %vm942_vm14 = vcmp.lt.s32.totalorder %v939_v0, %v876_v33  ;;  %v5717_v15 = vsub.f32 %v407_v55, %v5666_v36  ;;  %v880_v27 = vsel %vm848_vm1, %v5530_v5, 128  ;;  %v941_v47 = vsel %vm940_vm7, %v937_v53, %v874_v60 }
 0x1f7   : > { %vm918_vm11 = vcmp.lt.s32.totalorder %v916_v43, %v917_v57  ;;  %v943_v54 = vsel %vm942_vm14, %v939_v0, %v876_v33  ;;  %vm944_vm8 = vcmp.lt.s32.totalorder %v941_v47, %v878_v41  ;;  %v5723_v20 = vand.u32 4294901760, %v426_v4 }
 0x1f8   : > { %7816 = vst [vmem:[#allocation20_spill] sm:$0xff] %v5717_v15  ;;  %vm946_vm15 = vcmp.lt.s32.totalorder %v943_v54, %v880_v27  ;;  %v5726_v48 = vsub.f32 %v408_v28, %v5680_v37  ;;  %v945_v24 = vsel %vm944_vm8, %v941_v47, %v878_v41  ;;  %v5731_v55 = vsub.f32 %v5621_v11, %v7619_v9 }
 0x1f9   : > { %7817 = vst [vmem:[#allocation21_spill] sm:$0xff] %v5723_v20  ;;  %v947_v35 = vsel %vm946_vm15, %v943_v54, %v880_v27  ;;  %v5734_v61 = vsub.f32 %v409_v16, %v5698_v32  ;;  %v5736_v6 = vsel %vm918_vm11, %v916_v43, %v917_v57  ;;  %v7618_v56 = vand.u32 4294901760, %v5717_v15 }
 0x1fa   : > { %7818 = vst [vmem:[#allocation22_spill] sm:$0xff] %v5726_v48  ;;  %vm948_vm0 = vcmp.lt.s32.totalorder %v945_v24, %v947_v35  ;;  %v5739_v13 = vand.u32 4294901760, %v427_v3  ;;  %v5744_v30 = vsub.f32 %v5647_v45, %v5664_v18  ;;  %v5747_v44 = vsub.f32 %v426_v4, %v5723_v20 }
 0x1fb   : > { %7819 = vst [vmem:[#allocation23_spill] sm:$0xff] %v5734_v61  ;;  %v949_v28 = vsel %vm948_vm0, %v945_v24, %v947_v35  ;;  %v7617_v16 = vand.u32 4294901760, %v5726_v48  ;;  %vm959_vm1 = vcmp.eq.s32.totalorder %v5449_v12, %v5736_v6  ;;  %vm961_vm2 = vcmp.eq.s32.totalorder %v5452_v22, %v5736_v6 }
 0x1fc   : > { %7820 = vst [vmem:[#allocation24_spill] sm:$0xff] %v5739_v13  ;;  %v950_v10 = vrot.slane %v949_v28, 4  ;;  %v7616_v19 = vand.u32 4294901760, %v5734_v61  ;;  %v5755_v14 = vand.u32 4294901760, %v410_v1  ;;  %v5761_v29 = vsub.f32 %v5717_v15, %v7618_v56 }
 0x1fd   : > { %v5764_v26 = vsub.f32 %v427_v3, %v5739_v13  ;;  %vm963_vm4 = vcmp.eq.s32.totalorder %v5455_v23, %v5736_v6  ;;  %vm965_vm6 = vcmp.eq.s32.totalorder %v5458_v25, %v5736_v6  ;;  %v5770_v60 = vand.u32 4294901760, %v428_v2 }
 0x1fe   : > { %7821 = vst [vmem:[#allocation25_spill] sm:$0xff] %v5755_v14  ;;  %vm951_vm3 = vcmp.lt.s32.totalorder %v949_v28, %v950_v10  ;;  %v3927_v33 = vsel %vm959_vm1, 1.0, %v7629_v21  ;;  %v3929_v53 = vsel %vm961_vm2, 1.0, %v7629_v21  ;;  %v5783_v0 = vsub.f32 %v5726_v48, %v7617_v16 }
 0x1ff   : > { %7822 = vst [vmem:[#allocation26_spill] sm:$0xff] %v5764_v26  ;;  %v952_v43 = vsel %vm951_vm3, %v949_v28, %v950_v10  ;;  %7823 = vst [vmem:[#allocation27_spill] sm:$0xff] %v5770_v60  ;;  %vm967_vm9 = vcmp.eq.s32.totalorder %v5461_v31, %v5736_v6  ;;  %v5790_v4 = vsub.f32 %v5734_v61, %v7616_v19  ;;  %v5795_v27 = vand.u32 4294901760, %v429_v42 }
 0x200   : > { %v953_v57 = vrot.slane %v952_v43, 2  ;;  %7824 = vst [vmem:[#allocation28_spill] sm:$0xff] %v5783_v0  ;;  %v5793_v41 = vsub.f32 %v410_v1, %v5755_v14  ;;  %v3931_v47 = vsel %vm963_vm4, 1.0, %v7629_v21  ;;  %v3933_v54 = vsel %vm965_vm6, 1.0, %v7629_v21  ;;  %vm5877_vm3 = vmpackc.low %vm961_vm2, %vm959_vm1 }
 0x201   : > { %7825 = vst [vmem:[#allocation29_spill] sm:$0xff] %v5790_v4  ;;  %7827 = vst [vmem:[#allocation31_spill] sm:$0xff] %v5795_v27  ;;  %v5806_v35 = vsub.f32 %v3927_v33, %v3927_v33  ;;  %v5808_v1 = vsub.f32 %v3929_v53, %v3929_v53  ;;  %vm969_vm5 = vcmp.eq.s32.totalorder %v5464_v34, %v5736_v6  ;;  %v3935_v10 = vsel %vm967_vm9, 1.0, %v7629_v21 }
 0x202   : > { %7826 = vst [vmem:[#allocation30_spill] sm:$0xff] %v5793_v41  ;;  %vm954_vm10 = vcmp.lt.s32.totalorder %v952_v43, %v953_v57  ;;  %v5818_v16 = vsub.f32 %v428_v2, %v5770_v60  ;;  %v5820_v56 = vsub.f32 %v3931_v47, %v3931_v47  ;;  %v5825_v33 = vsub.f32 %v429_v42, %v5795_v27 }
 0x203   : > { %v955_v24 = vsel %vm954_vm10, %v952_v43, %v953_v57  ;;  %7828 = vst [vmem:[#allocation32_spill] sm:$0xff] %v5806_v35  ;;  %7829 = vst [vmem:[#allocation33_spill] sm:$0xff] %v5808_v1  ;;  %v5827_v53 = vsub.f32 %v3933_v54, %v3933_v54  ;;  %v3937_v9 = vsel %vm969_vm5, 1.0, %v7629_v21  ;;  %vm971_vm13 = vcmp.eq.s32.totalorder %v5467_v38, %v5736_v6 }
 0x204   : > { %v956_v28 = vrot.slane %v955_v24, 1  ;;  %7830 = vst [vmem:[#allocation34_spill] sm:$0xff] %v5818_v16  ;;  %7831 = vst [vmem:[#allocation35_spill] sm:$0xff] %v5820_v56  ;;  %v5839_v47 = vpack.c.bf16 %v5808_v1, %v5806_v35  ;;  %v5841_v62 = vsub.f32 %v3935_v10, %v3935_v10  ;;  %vm973_vm7 = vcmp.eq.s32.totalorder %v5470_v39, %v5736_v6 }
 0x205   : > { %7832 = vst [vmem:[#allocation36_spill] sm:$0xff] %v5825_v33  ;;  %7833 = vst [vmem:[#allocation37_spill] sm:$0xff] %v5827_v53  ;;  %v7621_v43 = vmov 1.0|1.0   ;;  %v7840_v45 = vmov 0  ;;  %v3941_v27 = vsel %vm973_vm7, 1.0, %v7629_v21 }
 0x206   : > { %vm957_vm12 = vcmp.lt.s32.totalorder %v955_v24, %v956_v28  ;;  %7834 = vst [vmem:[#allocation38_spill] sm:$0xff] %v5839_v47  ;;  %7835 = vst [vmem:[#allocation39_spill] sm:$0xff] %v5841_v62  ;;  %v7841_v45 = vsel %vm5877_vm3, 4294967295, %v7840_v45  ;;  %v7854_v20 = vmov 0.0   ;;  %v7855_v18 = vmov 1.0|1.0  }
 0x207   : > { %v5835_v2 = vsel %vm957_vm12, %v955_v24, %v956_v28  ;;  %7842 = vst [vmem:[#allocation42_spill] sm:$0xff] %v7841_v45  ;;  %v6000_v8 = vsub.f32 %v3941_v27, %v3941_v27 }
 0x208   : > { %vm960_vm14 = vcmp.eq.s32.totalorder %v5449_v12, %v5835_v2  ;;  %vm962_vm11 = vcmp.eq.s32.totalorder %v5452_v22, %v5835_v2  ;;  %vm964_vm8 = vcmp.eq.s32.totalorder %v5455_v23, %v5835_v2  ;;  %vm966_vm15 = vcmp.eq.s32.totalorder %v5458_v25, %v5835_v2 }
 0x209   : > { %v3928_v42 = vsel %vm960_vm14, 1.0, %v7629_v21  ;;  %v3930_v54 = vsel %vm962_vm11, 1.0, %v7629_v21  ;;  %vm5855_vm0 = vmpackc.low %vm962_vm11, %vm960_vm14  ;;  %v3932_v28 = vsel %vm964_vm8, 1.0, %v7629_v21  ;;  %v3934_v10 = vsel %vm966_vm15, 1.0, %v7629_v21 }
 0x20a   : > { %4127 = vmatprep.subr.msk.bf16.mxu0 %vm5855_vm0, %v7621_v43  ;;  %v5867_v19 = vsub.f32 %v3928_v42, %v3928_v42  ;;  %v5869_v3 = vsub.f32 %v3930_v54, %v3930_v54  ;;  %v5881_v17 = vsub.f32 %v3932_v28, %v3932_v28  ;;  %v5883_v57 = vsub.f32 %v3934_v10, %v3934_v10  ;;  %vm5891_vm10 = vmpackc.low %vm966_vm15, %vm964_vm8  ;;  %v5920_v28 = vld [vmem:[#allocation7 + $0x30] sm:$0xff] }
 0x20b   : > { %4129 = vmatpush1.bf16.msk.msra.mxu0 %vm5877_vm3, %v7621_v43  ;;  %v7843_v12 = vmov 0  ;;  %vm968_vm1 = vcmp.eq.s32.totalorder %v5461_v31, %v5835_v2  ;;  %vm970_vm2 = vcmp.eq.s32.totalorder %v5464_v34, %v5835_v2  ;;  %vm972_vm12 = vcmp.eq.s32.totalorder %v5467_v38, %v5835_v2  ;;  %vm5941_vm15 = vmpackc.low %vm965_vm6, %vm963_vm4 }
 0x20c   : > { %7838 = vst [vmem:[#allocation40_spill] sm:$0xff] %v5867_v19  ;;  %7839 = vst [vmem:[#allocation41_spill] sm:$0xff] %v5869_v3  ;;  %v7844_v12 = vsel %vm5891_vm10, 4294967295, %v7843_v12  ;;  %vm7647_vm14 = vcmp.eq.s32.totalorder %v5473_v40, %v5736_v6  ;;  %4131 = vmatprep.subr.msk.bf16.mxu0 %vm5891_vm10, %v7621_v43  ;;  %v5908_v22 = vpack.c.bf16 %v5869_v3, %v5867_v19  ;;  %v3936_v42 = vsel %vm968_vm1, 1.0, %v7629_v21 }
 0x20d   : > { %7845 = vst [vmem:[#allocation43_spill] sm:$0xff] %v7844_v12  ;;  %v3938_v54 = vsel %vm970_vm2, 1.0, %v7629_v21  ;;  %vm974_vm11 = vcmp.eq.s32.totalorder %v5470_v39, %v5835_v2  ;;  %v5922_v10 = vsub.f32 %v3937_v9, %v3937_v9  ;;  %v3939_v43 = vsel %vm971_vm13, 1.0, %v7629_v21  ;;  %vm5967_vm4 = vmpackc.low %vm970_vm2, %vm968_vm1 }
 0x20e   : > { %7846 = vst [vmem:[#allocation44_spill] sm:$0xff] %v5908_v22  ;;  %vm7650_vm8 = vcmp.eq.s32.totalorder %v5476_v49, %v5736_v6  ;;  %4318 = vmatprep.subr.bf16.mxu1 %v5908_v22  ;;  %v7848_v9 = vmov 0  ;;  %v5945_v60 = vsub.f32 %v3936_v42, %v3936_v42  ;;  %v5947_v13 = vsub.f32 %v3938_v54, %v3938_v54 }
 0x20f   : > { %7847 = vst [vmem:[#allocation45_spill] sm:$0xff] %v5922_v10  ;;  %v7849_v9 = vsel %vm5941_vm15, 4294967295, %v7848_v9  ;;  %v5951_v21 = vpack.c.bf16 %v5883_v57, %v5881_v17  ;;  %v3943_v23 = vsel %vm7647_vm14, 1.0, %v7854_v20  ;;  %4133 = vmatpush1.bf16.msk.msra.mxu0 %vm5941_vm15, %v7855_v18  ;;  %4326 = vmatpush1.bf16.msra.mxu1 %v5839_v47  ;;  %v7856_v25 = vmov 0  ;;  %vm6016_vm14 = vmpackc.low %vm969_vm5, %vm967_vm9 }
 0x210   : > { %7850 = vst [vmem:[#allocation46_spill] sm:$0xff] %v7849_v9  ;;  %7851 = vst [vmem:[#allocation47_spill] sm:$0xff] %v5945_v60  ;;  %v7857_v25 = vsel %vm5967_vm4, 4294967295, %v7856_v25  ;;  %v5973_v42 = vpack.c.bf16 %v5827_v53, %v5820_v56  ;;  %v3940_v54 = vsel %vm972_vm12, 1.0, %v7854_v20  ;;  %v3942_v14 = vsel %vm974_vm11, 1.0, %v7854_v20  ;;  %4135 = vmatprep.subr.msk.bf16.mxu0 %vm5967_vm4, %v7855_v18 }
 0x211   : > { %7852 = vst [vmem:[#allocation48_spill] sm:$0xff] %v5947_v13  ;;  %7853 = vst [vmem:[#allocation49_spill] sm:$0xff] %v5951_v21  ;;  %v5984_v32 = vand.u32 4294901760, %v5920_v28  ;;  %4319 = vmatprep.subr.bf16.mxu1 %v5951_v21  ;;  %v5990_v37 = vsub.f32 %v3939_v43, %v3939_v43  ;;  %vm7653_vm6 = vcmp.eq.s32.totalorder %v5473_v40, %v5835_v2  ;;  %v3945_v36 = vsel %vm7650_vm8, 1.0, %v7854_v20 }
 0x212   : > { %7858 = vst [vmem:[#allocation50_spill] sm:$0xff] %v7857_v25  ;;  %7859 = vst [vmem:[#allocation51_spill] sm:$0xff] %v5973_v42  ;;  %vm7652_vm1 = vcmp.eq.s32.totalorder %v5476_v49, %v5835_v2  ;;  %v6004_v47 = vpack.c.bf16 %v5922_v10, %v5841_v62  ;;  %v6006_v21 = vsub.f32 %v3943_v23, %v3943_v23  ;;  %v7862_v43 = vmov 0 }
 0x213   : > { %7860 = vst [vmem:[#allocation52_spill] sm:$0xff] %v5984_v32  ;;  %vm7662_vm2 = vcmp.eq.s32.totalorder %v5479_v50, %v5736_v6  ;;  %v7863_v43 = vsel %vm6016_vm14, 4294967295, %v7862_v43  ;;  %v6020_v27 = vsub.f32 %v3940_v54, %v3940_v54  ;;  %v6022_v63 = vsub.f32 %v3942_v14, %v3942_v14  ;;  %4137 = vmatpush1.bf16.msk.msra.mxu0 %vm6016_vm14, %v7855_v18  ;;  %vm6040_vm9 = vmpackc.low %vm974_vm11, %vm972_vm12 }
 0x214   : > { %7861 = vst [vmem:[#allocation53_spill] sm:$0xff] %v6004_v47  ;;  %7864 = vst [vmem:[#allocation54_spill] sm:$0xff] %v7863_v43  ;;  %v6026_v23 = vpack.c.bf16 %v5947_v13, %v5945_v60  ;;  %vm7661_vm8 = vcmp.eq.s32.totalorder %v5482_v51, %v5736_v6  ;;  %4327 = vmatpush1.bf16.msra.mxu1 %v5973_v42  ;;  %v7866_v31 = vmov 0  ;;  %v3944_v34 = vsel %vm7653_vm6, 1.0, %v7854_v20  ;;  %4139 = vmatprep.subr.msk.bf16.mxu0 %vm6040_vm9, %v7855_v18 }
 0x215   : > { %v7867_v31 = vsel %vm6040_vm9, 4294967295, %v7866_v31  ;;  %v3946_v14 = vsel %vm7652_vm1, 1.0, %v7854_v20  ;;  %v6052_v54 = vsub.f32 %v3945_v36, %v3945_v36  ;;  %vm980_vm5 = vcmp.eq.s32.totalorder %v5479_v50, %v5835_v2  ;;  %vm6085_vm1 = vmpackc.low %vm973_vm7, %vm971_vm13 }
 0x216   : > { %7865 = vst [vmem:[#allocation55_spill] sm:$0xff] %v6026_v23  ;;  %7868 = vst [vmem:[#allocation56_spill] sm:$0xff] %v7867_v31  ;;  %4320 = vmatprep.subr.bf16.mxu1 %v6026_v23  ;;  %vm7685_vm11 = vcmp.eq.s32.totalorder %v5485_v52, %v5835_v2  ;;  %v3947_v36 = vsel %vm7662_vm2, 1.0, %v7854_v20  ;;  %v3949_v42 = vsel %vm7661_vm8, 1.0, %v7854_v20  ;;  %vm7680_vm6 = vcmp.eq.s32.totalorder %v5485_v52, %v5736_v6 }
 0x217   : > { %vm7679_vm12 = vcmp.eq.s32.totalorder %v5490_v58, %v5736_v6  ;;  %v7869_v23 = vmov 0  ;;  %v6089_v61 = vsub.f32 %v3944_v34, %v3944_v34  ;;  %v6091_v48 = vsub.f32 %v3946_v14, %v3946_v14  ;;  %4141 = vmatpush1.bf16.msk.msra.mxu0 %vm6085_vm1, %v7855_v18 }
 0x218   : > { %v7870_v23 = vsel %vm6085_vm1, 4294967295, %v7869_v23  ;;  %v6095_v15 = vpack.c.bf16 %v6022_v63, %v6020_v27  ;;  %v3948_v38 = vsel %vm980_vm5, 1.0, %v7854_v20  ;;  %4328 = vmatpush1.bf16.msra.mxu1 %v6004_v47  ;;  %vm7873_vm13 = vcmp.eq.s32.totalorder %v5473_v40, %v5835_v2 }
 0x219   : > { %7871 = vst [vmem:[#allocation57_spill] sm:$0xff] %v7870_v23  ;;  %vm7874_vm7 = vcmp.eq.s32.totalorder %v5476_v49, %v5835_v2  ;;  %v7875_v39 = vmov 0  ;;  %v6117_v34 = vpack.c.bf16 %v6000_v8, %v5990_v37  ;;  %vm7879_vm2 = vcmp.eq.s32.totalorder %v5482_v51, %v5835_v2 }
 0x21a   : > { %7872 = vst [vmem:[#allocation58_spill] sm:$0xff] %v6095_v15  ;;  %vm6111_vm8 = vmpackc.low %vm7874_vm7, %vm7873_vm13  ;;  %v3950_v14 = vsel %vm7879_vm2, 1.0, %v7854_v20  ;;  %v3952_v47 = vsel %vm7685_vm11, 1.0, %v7854_v20  ;;  %vm7880_vm13 = vcmp.eq.s32.totalorder %v5490_v58, %v5835_v2  ;;  %4321 = vmatprep.subr.bf16.mxu1 %v6095_v15  ;;  %v6135_v7 = vsub.f32 %v3947_v36, %v3947_v36 }
 0x21b   : > { %v7876_v39 = vsel %vm6111_vm8, 4294967295, %v7875_v39  ;;  %7878 = vst [vmem:[#allocation60_spill] sm:$0xff] %v6117_v34  ;;  %v3954_v11 = vsel %vm7880_vm13, 1.0, %v7854_v20  ;;  %4143 = vmatprep.subr.msk.bf16.mxu0 %vm6111_vm8, %v7855_v18  ;;  %v6137_v22 = vsub.f32 %v3949_v42, %v3949_v42  ;;  %v6141_v33 = vpack.c.bf16 %v6052_v54, %v6006_v21 }
 0x21c   : > { %7877 = vst [vmem:[#allocation59_spill] sm:$0xff] %v7876_v39  ;;  %v3951_v23 = vsel %vm7680_vm6, 1.0, %v7854_v20  ;;  %v6147_v16 = vsub.f32 %v3948_v38, %v3948_v38  ;;  %v3953_v15 = vsel %vm7679_vm12, 1.0, %v7854_v20  ;;  %vm7882_vm2 = vcmp.eq.s32.totalorder %v5473_v40, %v5736_v6  ;;  %4329 = vmatpush1.bf16.msra.mxu1 %v6117_v34 }
 0x21d   : > { %7881 = vst [vmem:[#allocation61_spill] sm:$0xff] %v6141_v33  ;;  %vm7883_vm7 = vcmp.eq.s32.totalorder %v5476_v49, %v5736_v6  ;;  %v7884_v39 = vmov 0  ;;  %v6165_v38 = vsub.f32 %v3950_v14, %v3950_v14  ;;  %v6169_v4 = vpack.c.bf16 %v6091_v48, %v6089_v61 }
 0x21e   : > { %vm6161_vm13 = vmpackc.low %vm7883_vm7, %vm7882_vm2  ;;  %v6171_v31 = vsub.f32 %v3952_v47, %v3952_v47  ;;  %v6173_v36 = vsub.f32 %v3954_v11, %v3954_v11  ;;  %vm7888_vm2 = vcmp.eq.s32.totalorder %v5482_v51, %v5835_v2  ;;  %v7889_v40 = vmov 0 }
 0x21f   : > { %v7885_v39 = vsel %vm6161_vm13, 4294967295, %v7884_v39  ;;  %7887 = vst [vmem:[#allocation63_spill] sm:$0xff] %v6169_v4  ;;  %4145 = vmatpush1.bf16.msk.msra.mxu0 %vm6161_vm13, %v7855_v18  ;;  %vm6186_vm7 = vmpackc.low %vm7888_vm2, %vm980_vm5  ;;  %v6190_v49 = vsub.f32 %v3951_v23, %v3951_v23  ;;  %vm7686_vm12 = vcmp.eq.s32.totalorder %v5493_v59, %v5835_v2  ;;  %vm7687_vm6 = vcmp.eq.s32.totalorder %v5530_v5, %v5835_v2 }
 0x220   : > { %7886 = vst [vmem:[#allocation62_spill] sm:$0xff] %v7885_v39  ;;  %v7890_v40 = vsel %vm6186_vm7, 4294967295, %v7889_v40  ;;  %4147 = vmatprep.subr.msk.bf16.mxu0 %vm6186_vm7, %v7855_v18  ;;  %4322 = vmatprep.subr.bf16.mxu1 %v6169_v4  ;;  %v6206_v23 = vsub.f32 %v3953_v15, %v3953_v15  ;;  %v6210_v14 = vpack.c.bf16 %v6137_v22, %v6135_v7  ;;  %v7893_v42 = vand.u32 4294901760, %v5867_v19 }
 0x221   : > { %7891 = vst [vmem:[#allocation64_spill] sm:$0xff] %v7890_v40  ;;  %v7894_v34 = vand.u32 4294901760, %v5869_v3  ;;  %vm7895_vm2 = vcmp.eq.s32.totalorder %v5479_v50, %v5736_v6  ;;  %vm7896_vm5 = vcmp.eq.s32.totalorder %v5482_v51, %v5736_v6  ;;  %v7897_v15 = vmov 0  ;;  %4330 = vmatpush1.bf16.msra.mxu1 %v6141_v33 }
 0x222   : > { %7892 = vst [vmem:[#allocation65_spill] sm:$0xff] %v6210_v14  ;;  %v1507_v4 = vsub.f32 %v5867_v19, %v7893_v42  ;;  %vm6224_vm11 = vmpackc.low %vm7896_vm5, %vm7895_vm2  ;;  %v6230_v47 = vpack.c.bf16 %v6165_v38, %v6147_v16  ;;  %v3956_v42 = vsel %vm7686_vm12, 1.0, %v7854_v20  ;;  %v3958_v50 = vsel %vm7687_vm6, 1.0, %v7854_v20 }
 0x223   : > { %v1519_v40 = vsub.f32 %v5869_v3, %v7894_v34  ;;  %v7898_v15 = vsel %vm6224_vm11, 4294967295, %v7897_v15  ;;  %v6242_v51 = vpack.c.bf16 %v6173_v36, %v6171_v31  ;;  %4149 = vmatpush1.bf16.msk.msra.mxu0 %vm6224_vm11, %v7855_v18  ;;  %vm7902_vm5 = vcmp.eq.s32.totalorder %v5485_v52, %v5835_v2 }
 0x224   : > { %7899 = vst [vmem:[#allocation66_spill] sm:$0xff] %v7898_v15  ;;  %7900 = vst [vmem:[#allocation67_spill] sm:$0xff] %v6230_v47  ;;  %vm7903_vm2 = vcmp.eq.s32.totalorder %v5490_v58, %v5835_v2  ;;  %v7904_v34 = vmov 0  ;;  %vm7907_vm6 = vcmp.eq.s32.totalorder %v5493_v59, %v5736_v6  ;;  %vm7908_vm11 = vcmp.eq.s32.totalorder %v5530_v5, %v5736_v6  ;;  %4323 = vmatprep.subr.bf16.mxu1 %v6230_v47 }
 0x225   : > { %7901 = vst [vmem:[#allocation68_spill] sm:$0xff] %v6242_v51  ;;  %vm6254_vm12 = vmpackc.low %vm7903_vm2, %vm7902_vm5  ;;  %v3955_v11 = vsel %vm7907_vm6, 1.0, %v7854_v20  ;;  %v3957_v33 = vsel %vm7908_vm11, 1.0, %v7854_v20  ;;  %v7909_v3 = vand.u32 4294901760, %v5806_v35  ;;  %v7910_v15 = vand.u32 4294901760, %v5808_v1  ;;  %4331 = vmatpush1.bf16.msra.mxu1 %v6210_v14 }
 0x226   : > { %v7905_v34 = vsel %vm6254_vm12, 4294967295, %v7904_v34  ;;  %4151 = vmatprep.subr.msk.bf16.mxu0 %vm6254_vm12, %v7855_v18  ;;  %v7911_v43 = vand.u32 4294901760, %v5881_v17  ;;  %v7912_v0 = vand.u32 4294901760, %v5883_v57  ;;  %v6284_v9 = vsub.f32 %v3956_v42, %v3956_v42  ;;  %4324 = vmatprep.subr.bf16.mxu1 %v6242_v51 }
 0x227   : > { %7906 = vst [vmem:[#allocation69_spill] sm:$0xff] %v7905_v34  ;;  %v1513_v19 = vsub.f32 %v5806_v35, %v7909_v3  ;;  %v1525_v39 = vsub.f32 %v5808_v1, %v7910_v15  ;;  %v7712_v35 = vand.u32 4294901760, %v5827_v53  ;;  %v6286_v15 = vsub.f32 %v3958_v50, %v3958_v50 }
 0x228   : > { %v1531_v26 = vsub.f32 %v5881_v17, %v7911_v43  ;;  %v1543_v25 = vsub.f32 %v5883_v57, %v7912_v0  ;;  %v1508_v1 = vand.u32 4294901760, %v1507_v4  ;;  %v1520_v34 = vand.u32 4294901760, %v1519_v40 }
 0x229   : > { %vm7913_vm6 = vcmp.eq.s32.totalorder %v5485_v52, %v5736_v6  ;;  %vm7914_vm11 = vcmp.eq.s32.totalorder %v5490_v58, %v5736_v6  ;;  %v7915_v43 = vmov 0  ;;  %v6298_v0 = vsub.f32 %v3955_v11, %v3955_v11 }
 0x22a   : > { %vm6294_vm5 = vmpackc.low %vm7914_vm11, %vm7913_vm6  ;;  %v6300_v3 = vsub.f32 %v3957_v33, %v3957_v33  ;;  %vm7918_vm2 = vcmp.eq.s32.totalorder %v5493_v59, %v5835_v2  ;;  %vm7919_vm6 = vcmp.eq.s32.totalorder %v5530_v5, %v5835_v2  ;;  %v7920_v52 = vmov 0 }
 0x22b   : > { %v7916_v43 = vsel %vm6294_vm5, 4294967295, %v7915_v43  ;;  %4153 = vmatpush1.bf16.msk.msra.mxu0 %vm6294_vm5, %v7855_v18  ;;  %vm6314_vm11 = vmpackc.low %vm7919_vm6, %vm7918_vm2  ;;  %v1514_v58 = vand.u32 4294901760, %v1513_v19  ;;  %v1526_v4 = vand.u32 4294901760, %v1525_v39  ;;  %v1532_v11 = vand.u32 4294901760, %v1531_v26  ;;  %v6330_v39 = vld [vmem:[#allocation7 + $0xc8] sm:$0xff] }
 0x22c   : > { %7917 = vst [vmem:[#allocation70_spill] sm:$0xff] %v7916_v43  ;;  %v7921_v52 = vsel %vm6314_vm11, 4294967295, %v7920_v52  ;;  %4155 = vmatprep.subr.msk.bf16.mxu0 %vm6314_vm11, %v7855_v18  ;;  %v1544_v50 = vand.u32 4294901760, %v1543_v25  ;;  %v7923_v2 = vand.u32 4294901760, %v5820_v56  ;;  %v1549_v19 = vsub.f32 %v5827_v53, %v7712_v35 }
 0x22d   : > { %7922 = vst [vmem:[#allocation71_spill] sm:$0xff] %v7921_v52  ;;  %v6334_v40 = vpack.c.bf16 %v6206_v23, %v6190_v49  ;;  %v4158_v33 = vpack.c.bf16 %v1520_v34, %v1508_v1  ;;  %v6338_v51 = vpack.c.bf16 %v6286_v15, %v6284_v9  ;;  %v7926_v26 = vand.u32 4294901760, %v5793_v41 }
 0x22e   : > { %v1537_v42 = vsub.f32 %v5820_v56, %v7923_v2  ;;  %vm7927_vm2 = vcmp.eq.s32.totalorder %v5493_v59, %v5736_v6  ;;  %vm7928_vm6 = vcmp.eq.s32.totalorder %v5530_v5, %v5736_v6  ;;  %v7929_v2 = vmov 0 }
 0x22f   : > { %7924 = vst [vmem:[#allocation72_spill] sm:$0xff] %v6334_v40  ;;  %7925 = vst [vmem:[#allocation73_spill] sm:$0xff] %v6338_v51  ;;  %v6343_v25 = vsub.f32 %v5793_v41, %v7926_v26  ;;  %v7932_v1 = vand.u32 4294901760, %v5945_v60  ;;  %v7933_v35 = vand.u32 4294901760, %v5947_v13  ;;  %4332 = vmatpush1.bf16.msra.mxu1 %v6334_v40  ;;  %v6369_v59 = vpack.c.bf16 %v6300_v3, %v6298_v0 }
 0x230   : > { %vm6351_vm11 = vmpackc.low %vm7928_vm6, %vm7927_vm2  ;;  %v7935_v5 = vand.u32 4294901760, %v5841_v62  ;;  %v6378_v47 = vand.u32 4294901760, %v6330_v39  ;;  %4325 = vmatprep.subr.bf16.mxu1 %v6338_v51  ;;  %v4160_v26 = vpack.c.bf16 %v1526_v4, %v1514_v58  ;;  %v4162_v40 = vpack.c.bf16 %v1544_v50, %v1532_v11 }
 0x231   : > { %v7930_v2 = vsel %vm6351_vm11, 4294967295, %v7929_v2  ;;  %v1555_v34 = vsub.f32 %v5945_v60, %v7932_v1  ;;  %v1567_v14 = vsub.f32 %v5947_v13, %v7933_v35  ;;  %4157 = vmatpush1.bf16.msk.msra.mxu0 %vm6351_vm11, %v7855_v18  ;;  %7934 = vst [vmem:[#allocation75_spill] sm:$0xff] %v6369_v59  ;;  %v7936_v35 = vand.u32 4294901760, %v5922_v10 }
 0x232   : > { %7931 = vst [vmem:[#allocation74_spill] sm:$0xff] %v7930_v2  ;;  %v1561_v6 = vsub.f32 %v5841_v62, %v7935_v5  ;;  %7937 = vst [vmem:[#allocation76_spill] sm:$0xff] %v6378_v47  ;;  %4159 = vmatprep.subr.bf16.mxu0 %v4158_v33  ;;  %v1538_v41 = vand.u32 4294901760, %v1537_v42  ;;  %v1550_v13 = vand.u32 4294901760, %v1549_v19  ;;  %v7724_v60 = vand.u32 4294901760, %v5990_v37 }
 0x233   : > { %v1573_v1 = vsub.f32 %v5922_v10, %v7936_v35  ;;  %v7729_v53 = vand.u32 4294901760, %v6000_v8  ;;  %v7725_v5 = vand.u32 4294901760, %v6089_v61  ;;  %v7726_v62 = vand.u32 4294901760, %v6091_v48  ;;  %4333 = vmatpush1.bf16.msra.mxu1 %v6369_v59 }
 0x234   : > { %v7938_v35 = vand.u32 4294901760, %v5660_v46  ;;  %v1556_v10 = vand.u32 4294901760, %v1555_v34  ;;  %v1568_v56 = vand.u32 4294901760, %v1567_v14  ;;  %v7939_v33 = vand.u32 4294901760, %v6020_v27  ;;  %4223 = vmatprep.subr.msk.bf16.mxu1 %vm5855_vm0, %v7855_v18 }
 0x235   : > { %v7940_v42 = vand.u32 4294901760, %v6022_v63  ;;  %v1562_v4 = vand.u32 4294901760, %v1561_v6  ;;  %v1574_v11 = vand.u32 4294901760, %v1573_v1  ;;  %v7728_v19 = vand.u32 4294901760, %v6006_v21  ;;  %v412_v6 = vld [vmem:[#allocation7 + $0x38] sm:$0xff] }
 0x236   : > { %1157 = vmatmul.mubr.f32.vlgmr.msra.gmra.mrb[32].mxu0 %v7938_v35  ;;  %v1579_v58 = vsub.f32 %v6020_v27, %v7939_v33  ;;  %v7727_v46 = vand.u32 4294901760, %v6052_v54  ;;  %v4164_v14 = vpack.c.bf16 %v1550_v13, %v1538_v41  ;;  %v7730_v34 = vand.u32 4294901760, %v6147_v16  ;;  %2244 = vmatmul.mubr.f32.vlgmr.msra.gmra.mrb[0].mxu1 %v5744_v30 }
 0x237   : > { %v1591_v50 = vsub.f32 %v6022_v63, %v7940_v42  ;;  %4161 = vmatpush1.bf16.msra.mxu0 %v4160_v26  ;;  %v6403_v26 = vsub.f32 %v5920_v28, %v5984_v32  ;;  %1162 = vmatprep.mubr.f32.mxu0 %v7854_v20  ;;  %v1597_v1 = vsub.f32 %v6000_v8, %v7729_v53  ;;  %v7941_v28 = vand.u32 4294901760, %v5731_v55 }
 0x238   : > { %4163 = vmatprep.subr.bf16.mxu0 %v4162_v40  ;;  %v1585_v40 = vsub.f32 %v5990_v37, %v7724_v60  ;;  %v1603_v13 = vsub.f32 %v6089_v61, %v7725_v5  ;;  %v1615_v41 = vsub.f32 %v6091_v48, %v7726_v62  ;;  %v4166_v33 = vpack.c.bf16 %v1568_v56, %v1556_v10 }
 0x239   : > { %v1580_v42 = vand.u32 4294901760, %v1579_v58  ;;  %v1592_v60 = vand.u32 4294901760, %v1591_v50  ;;  %4225 = vmatpush1.bf16.msk.msra.mxu1 %vm5877_vm3, %v7855_v18  ;;  %v4168_v5 = vpack.c.bf16 %v1574_v11, %v1562_v4  ;;  %v1609_v62 = vsub.f32 %v6006_v21, %v7728_v19  ;;  %v413_v11 = vld [vmem:[#allocation7 + $0x40] sm:$0xff]  ;;  %2249 = vmatprep.mubr.f32.mxu1 %v7854_v20 }
 0x23a   : > { %1168 = vmatmul.mubr.f32.gmra.mrb[34].mxu0 %v7941_v28  ;;  %v1621_v55 = vsub.f32 %v6052_v54, %v7727_v46  ;;  %v6431_v28 = vand.u32 4294901760, %v412_v6  ;;  %4227 = vmatprep.subr.msk.bf16.mxu1 %vm5891_vm10, %v7855_v18  ;;  %v1627_v56 = vsub.f32 %v6147_v16, %v7730_v34  ;;  %v7943_v10 = vand.u32 4294901760, %v6165_v38 }
 0x23b   : > { %4165 = vmatpush1.bf16.msra.mxu0 %v4164_v14  ;;  %1173 = vmatprep.mubr.f32.mxu0 %v7854_v20  ;;  %v1586_v14 = vand.u32 4294901760, %v1585_v40  ;;  %v1604_v46 = vand.u32 4294901760, %v1603_v13  ;;  %v1616_v19 = vand.u32 4294901760, %v1615_v41  ;;  %v7944_v53 = vand.u32 4294901760, %v5761_v29 }
 0x23c   : > { %7942 = vst [vmem:[#allocation77_spill] sm:$0xff] %v6431_v28  ;;  %4167 = vmatprep.subr.bf16.mxu0 %v4166_v33  ;;  %v1639_v58 = vsub.f32 %v6165_v38, %v7943_v10  ;;  %v1598_v33 = vand.u32 4294901760, %v1597_v1  ;;  %2252 = vmatmul.mubr.f32.gmra.mrb[2].mxu1 %v5747_v44  ;;  %v4170_v34 = vpack.c.bf16 %v1592_v60, %v1580_v42  ;;  %v1610_v40 = vand.u32 4294901760, %v1609_v62  ;;  %v7952_v60 = vld [vmem:[#allocation26_spill] sm:$0xff] }
 0x23d   : > { %4229 = vmatpush1.bf16.msk.msra.mxu1 %vm5941_vm15, %v7855_v18  ;;  %v1622_v1 = vand.u32 4294901760, %v1621_v55  ;;  %v6456_v13 = vsub.f32 %v412_v6, %v6431_v28  ;;  %v6458_v29 = vand.u32 4294901760, %v413_v11  ;;  %v7949_v4 = vand.u32 4294901760, %v6137_v22  ;;  %v414_v55 = vld [vmem:[#allocation7 + $0x48] sm:$0xff]  ;;  %2257 = vmatprep.mubr.f32.mxu1 %v7854_v20 }
 0x23e   : > { %1179 = vmatmul.mubr.f32.gmra.mrb[36].mxu0 %v7944_v53  ;;  %4231 = vmatprep.subr.msk.bf16.mxu1 %vm5967_vm4, %v7855_v18  ;;  %v1628_v53 = vand.u32 4294901760, %v1627_v56  ;;  %v1640_v41 = vand.u32 4294901760, %v1639_v58  ;;  %v4174_v6 = vpack.c.bf16 %v1616_v19, %v1604_v46  ;;  %v7950_v58 = vld [vmem:[#allocation28_spill] sm:$0xff]  ;;  %v7954_v50 = vand.u32 4294901760, %v6173_v36  ;;  %v431_v46 = vld [vmem:[#allocation7 + $0xd0] sm:$0xff] }
 0x23f   : > { %4169 = vmatpush1.bf16.msra.mxu0 %v4168_v5  ;;  %7946 = vst [vmem:[#allocation78_spill] sm:$0xff] %v6458_v29  ;;  %v7948_v5 = vand.u32 4294901760, %v6135_v7  ;;  %v1645_v62 = vsub.f32 %v6137_v22, %v7949_v4  ;;  %1184 = vmatprep.mubr.f32.mxu0 %v7854_v20  ;;  %v7951_v10 = vand.u32 4294901760, %v7950_v58  ;;  %v6494_v56 = vand.u32 4294901760, %v414_v55 }
 0x240   : > { %4171 = vmatprep.subr.bf16.mxu0 %v4170_v34  ;;  %v4172_v34 = vpack.c.bf16 %v1598_v33, %v1586_v14  ;;  %2260 = vmatmul.mubr.f32.gmra.mrb[4].mxu1 %v7952_v60  ;;  %v1663_v12 = vsub.f32 %v6173_v36, %v7954_v50  ;;  %v7956_v33 = vand.u32 4294901760, %v6403_v26  ;;  %v4178_v19 = vpack.c.bf16 %v1640_v41, %v1628_v53  ;;  %v7963_v41 = vld [vmem:[#allocation34_spill] sm:$0xff] }
 0x241   : > { %v1633_v42 = vsub.f32 %v6135_v7, %v7948_v5  ;;  %v7953_v5 = vand.u32 4294901760, %v6171_v31  ;;  %4233 = vmatpush1.bf16.msk.msra.mxu1 %vm6016_vm14, %v7855_v18  ;;  %7957 = vst [vmem:[#allocation28_spill] sm:$0xff] %v6494_v56  ;;  %v1646_v35 = vand.u32 4294901760, %v1645_v62  ;;  %2265 = vmatprep.mubr.f32.mxu1 %v7854_v20  ;;  %v7960_v58 = vand.u32 4294901760, %v6206_v23 }
 0x242   : > { %1190 = vmatmul.mubr.f32.gmra.mrb[38].mxu0 %v7951_v10  ;;  %v1221_v10 = vsub.f32 %v6403_v26, %v7956_v33  ;;  %4235 = vmatprep.subr.msk.bf16.mxu1 %vm6040_vm9, %v7855_v18  ;;  %v7959_v33 = vand.u32 4294901760, %v6190_v49  ;;  %v1664_v62 = vand.u32 4294901760, %v1663_v12  ;;  %v7964_v45 = vand.u32 4294901760, %v6284_v9  ;;  %v415_v12 = vld [vmem:[#allocation7 + $0x50] sm:$0xff] }
 0x243   : > { %v1651_v4 = vsub.f32 %v6171_v31, %v7953_v5  ;;  %4173 = vmatpush1.bf16.msra.mxu0 %v4172_v34  ;;  %v6492_v5 = vsub.f32 %v413_v11, %v6458_v29  ;;  %v4176_v34 = vpack.c.bf16 %v1622_v1, %v1610_v40  ;;  %v1634_v14 = vand.u32 4294901760, %v1633_v42  ;;  %1195 = vmatprep.mubr.f32.mxu0 %v7854_v20  ;;  %v7961_v1 = vld [vmem:[#allocation29_spill] sm:$0xff] }
 0x244   : > { %4175 = vmatprep.subr.bf16.mxu0 %v4174_v6  ;;  %v1657_v11 = vsub.f32 %v6190_v49, %v7959_v33  ;;  %v1669_v6 = vsub.f32 %v6206_v23, %v7960_v58  ;;  %v7962_v53 = vand.u32 4294901760, %v7961_v1  ;;  %2268 = vmatmul.mubr.f32.gmra.mrb[6].mxu1 %v7963_v41  ;;  %v1675_v29 = vsub.f32 %v6284_v9, %v7964_v45 }
 0x245   : > { %v1652_v42 = vand.u32 4294901760, %v1651_v4  ;;  %v7965_v33 = vand.u32 4294901760, %v6286_v15  ;;  %4237 = vmatpush1.bf16.msk.msra.mxu1 %vm6085_vm1, %v7855_v18  ;;  %v1222_v40 = vand.u32 4294901760, %v1221_v10  ;;  %v6523_v1 = vsub.f32 %v6330_v39, %v6378_v47  ;;  %2273 = vmatprep.mubr.f32.mxu1 %v7854_v20 }
 0x246   : > { %1201 = vmatmul.mubr.f32.gmra.mrb[40].mxu0 %v7962_v53  ;;  %v6525_v4 = vand.u32 4294901760, %v431_v46  ;;  %4239 = vmatprep.subr.msk.bf16.mxu1 %vm6111_vm8, %v7855_v18  ;;  %v4180_v53 = vpack.c.bf16 %v1646_v35, %v1634_v14  ;;  %v6535_v10 = vsub.f32 %v414_v55, %v6494_v56  ;;  %v1658_v39 = vand.u32 4294901760, %v1657_v11  ;;  %v7973_v55 = vld [vmem:[#allocation36_spill] sm:$0xff] }
 0x247   : > { %v1687_v59 = vsub.f32 %v6286_v15, %v7965_v33  ;;  %4177 = vmatpush1.bf16.msra.mxu0 %v4176_v34  ;;  %v7969_v34 = vand.u32 4294901760, %v6456_v13  ;;  %1206 = vmatprep.mubr.f32.mxu0 %v7854_v20  ;;  %v7970_v47 = vand.u32 4294901760, %v6298_v0  ;;  %v7971_v35 = vand.u32 4294901760, %v6300_v3  ;;  %v417_v11 = vld [vmem:[#allocation7 + $0x60] sm:$0xff] }
 0x248   : > { %7967 = vst [vmem:[#allocation26_spill] sm:$0xff] %v6525_v4  ;;  %4179 = vmatprep.subr.bf16.mxu0 %v4178_v19  ;;  %v1670_v19 = vand.u32 4294901760, %v1669_v6  ;;  %v7972_v50 = vand.u32 4294901760, %v6343_v25  ;;  %2276 = vmatmul.mubr.f32.gmra.mrb[8].mxu1 %v7973_v55  ;;  %v4182_v58 = vpack.c.bf16 %v1664_v62, %v1652_v42  ;;  %v1676_v56 = vand.u32 4294901760, %v1675_v29 }
 0x249   : > { %v1232_v33 = vsub.f32 %v6456_v13, %v7969_v34  ;;  %v1681_v45 = vsub.f32 %v6298_v0, %v7970_v47  ;;  %v1693_v14 = vsub.f32 %v6300_v3, %v7971_v35  ;;  %v432_v34 = vld [vmem:[#allocation7 + $0xd8] sm:$0xff]  ;;  %v1688_v28 = vand.u32 4294901760, %v1687_v59  ;;  %4241 = vmatpush1.bf16.msk.msra.mxu1 %vm6161_vm13, %v7855_v18  ;;  %2281 = vmatprep.mubr.f32.mxu1 %v7854_v20  ;;  %v433_v35 = vld [vmem:[#allocation7 + $0xe0] sm:$0xff] }
 0x24a   : > { %1212 = vmatmul.mubr.f32.gmra.mrb[42].mxu0 %v7972_v50  ;;  %v6548_v51 = vand.u32 4294901760, %v415_v12  ;;  %v416_v47 = vld [vmem:[#allocation7 + $0x58] sm:$0xff]  ;;  %4243 = vmatprep.subr.msk.bf16.mxu1 %vm6186_vm7, %v7855_v18  ;;  %v6557_v50 = vsub.f32 %v431_v46, %v6525_v4  ;;  %v6559_v42 = vand.u32 4294901760, %v432_v34  ;;  %v4184_v59 = vpack.c.bf16 %v1670_v19, %v1658_v39 }
 0x24b   : > { %4181 = vmatpush1.bf16.msra.mxu0 %v4180_v53  ;;  %v1233_v25 = vand.u32 4294901760, %v1232_v33  ;;  %1217 = vmatprep.mubr.f32.mxu0 %v7854_v20  ;;  %v1682_v29 = vand.u32 4294901760, %v1681_v45  ;;  %v1694_v62 = vand.u32 4294901760, %v1693_v14  ;;  %v7745_v53 = vand.u32 4294901760, %v6535_v10  ;;  %v7980_v45 = vld [vmem:[#allocation66_spill] sm:$0xff] }
 0x24c   : > { %7974 = vst [vmem:[#allocation29_spill] sm:$0xff] %v6548_v51  ;;  %4183 = vmatprep.subr.bf16.mxu0 %v4182_v58  ;;  %7977 = vst [vmem:[#allocation34_spill] sm:$0xff] %v6559_v42  ;;  %2284 = vmatmul.mubr.f32.gmra.mrb[10].mxu1 %v6523_v1  ;;  %v4186_v58 = vpack.c.bf16 %v1688_v28, %v1676_v56  ;;  %v7978_v33 = vand.u32 4294901760, %v6492_v5  ;;  %v6569_v4 = vsub.f32 %v415_v12, %v6548_v51 }
 0x24d   : > { %v6571_v6 = vand.u32 4294901760, %v416_v47  ;;  %vm7981_vm2 = vnez %v7980_v45  ;;  %2289 = vmatprep.mubr.f32.mxu1 %v7854_v20  ;;  %v4188_v28 = vpack.c.bf16 %v1694_v62, %v1682_v29  ;;  %v1254_v56 = vsub.f32 %v6535_v10, %v7745_v53  ;;  %v418_v62 = vld [vmem:[#allocation7 + $0x68] sm:$0xff] }
 0x24e   : > { %1223 = vmatmul.mubr.f32.gmra.mrb[44].mxu0 %v1222_v40  ;;  %v1243_v46 = vsub.f32 %v6492_v5, %v7978_v33  ;;  %4245 = vmatpush1.bf16.msk.msra.mxu1 %vm7981_vm2, %v7855_v18  ;;  %v6584_v12 = vand.u32 4294901760, %v433_v35  ;;  %v6586_v39 = vand.u32 4294901760, %v417_v11  ;;  %v6590_v14 = vsub.f32 %v432_v34, %v6559_v42  ;;  %v7985_v33 = vld [vmem:[#allocation44_spill] sm:$0xff]  ;;  %v7990_v53 = vld [vmem:[#allocation41_spill] sm:$0xff] }
 0x24f   : > { %7979 = vst [vmem:[#allocation36_spill] sm:$0xff] %v6571_v6  ;;  %4185 = vmatpush1.bf16.msra.mxu0 %v4184_v59  ;;  %4247 = vmatprep.subr.msk.bf16.mxu1 %vm6254_vm12, %v7855_v18  ;;  %v6594_v29 = vsub.f32 %v416_v47, %v6571_v6  ;;  %vm7986_vm6 = vnez %v7921_v52  ;;  %v1255_v34 = vand.u32 4294901760, %v1254_v56  ;;  %v7991_v59 = vand.u32 4294901760, %v7990_v53 }
 0x250   : > { %4187 = vmatprep.subr.bf16.mxu0 %v4186_v58  ;;  %1228 = vmatprep.mubr.f32.mxu0 %v7854_v20  ;;  %7983 = vst [vmem:[#allocation79_spill] sm:$0xff] %v6584_v12  ;;  %7984 = vst [vmem:[#allocation80_spill] sm:$0xff] %v6586_v39  ;;  %v1244_v19 = vand.u32 4294901760, %v1243_v46  ;;  %v434_v58 = vld [vmem:[#allocation7 + $0xe8] sm:$0xff]  ;;  %v6606_v47 = vsub.f32 %v433_v35, %v6584_v12  ;;  %v6611_v46 = vsub.f32 %v417_v11, %v6586_v39  ;;  %v435_v12 = vld [vmem:[#allocation7 + $0xf0] sm:$0xff] }
 0x251   : > { %2292 = vmatmul.mubr.f32.gmra.mrb[12].mxu1 %v6557_v50  ;;  %v7992_v52 = vand.u32 4294901760, %v6569_v4  ;;  %v7755_v35 = vand.u32 4294901760, %v6594_v29  ;;  %v6622_v43 = vand.u32 4294901760, %v418_v62  ;;  %v419_v11 = vld [vmem:[#allocation7 + $0x70] sm:$0xff]  ;;  %v8009_v32 = vand.u32 4294901760, %v5883_v57 }
 0x252   : > { %1234 = vmatmul.mubr.f32.gmra.mrb[46].mxu0 %v1233_v25  ;;  %4249 = vmatpush1.bf16.msk.msra.mxu1 %vm6294_vm5, %v7855_v18  ;;  %v6608_v25 = vand.u32 4294901760, %v434_v58  ;;  %v6642_v2 = vand.u32 4294901760, %v419_v11  ;;  %v8059_v24 = vand.u32 4294901760, %v6535_v10 }
 0x253   : > { %4189 = vmatpush1.bf16.msra.mxu0 %v4188_v28  ;;  %4251 = vmatprep.subr.msk.bf16.mxu1 %vm7986_vm6, %v7855_v18  ;;  %v7988_v28 = vld [vmem:[#allocation40_spill] sm:$0xff]  ;;  %v1265_v56 = vsub.f32 %v6569_v4, %v7992_v52  ;;  %v7758_v52 = vand.u32 4294901760, %v6611_v46 }
 0x254   : > { %4191 = vmatprep.subr.bf16.mxu0 %v7985_v33  ;;  %1239 = vmatprep.mubr.f32.mxu0 %v7854_v20  ;;  %7987 = vst [vmem:[#allocation44_spill] sm:$0xff] %v6608_v25  ;;  %v7989_v33 = vand.u32 4294901760, %v7988_v28  ;;  %7993 = vst [vmem:[#allocation40_spill] sm:$0xff] %v6622_v43  ;;  %v6630_v53 = vsub.f32 %v434_v58, %v6608_v25  ;;  %v1276_v28 = vsub.f32 %v6594_v29, %v7755_v35  ;;  %v420_v58 = vld [vmem:[#allocation7 + $0x78] sm:$0xff] }
 0x255   : > { %2297 = vmatprep.mubr.f32.mxu1 %v7854_v20  ;;  %7995 = vst [vmem:[#allocation81_spill] sm:$0xff] %v6642_v2  ;;  %v6657_v40 = vsub.f32 %v419_v11, %v6642_v2  ;;  %v6659_v45 = vand.u32 4294901760, %v420_v58 }
 0x256   : > { %1245 = vmatmul.mubr.f32.gmra.mrb[48].mxu0 %v1244_v19  ;;  %2300 = vmatmul.mubr.f32.gmra.mrb[14].mxu1 %v6590_v14  ;;  %v4254_v42 = vpack.c.bf16 %v7991_v59, %v7989_v33  ;;  %v6632_v19 = vand.u32 4294901760, %v435_v12  ;;  %v1266_v59 = vand.u32 4294901760, %v1265_v56  ;;  %v436_v33 = vld [vmem:[#allocation7 + $0xf8] sm:$0xff]  ;;  %v1287_v56 = vsub.f32 %v6611_v46, %v7758_v52 }
 0x257   : > { %4253 = vmatpush1.bf16.msk.msra.mxu1 %vm6351_vm11, %v7855_v18  ;;  %1250 = vmatprep.mubr.f32.mxu0 %v7854_v20  ;;  %v6652_v25 = vand.u32 4294901760, %v436_v33  ;;  %7998 = vst [vmem:[#allocation84_spill] sm:$0xff] %v6657_v40  ;;  %7999 = vst [vmem:[#allocation85_spill] sm:$0xff] %v6659_v45  ;;  %v7776_v11 = vand.u32 4294901760, %v6657_v40 }
 0x258   : > { %4255 = vmatprep.subr.bf16.mxu1 %v4254_v42  ;;  %2305 = vmatprep.mubr.f32.mxu1 %v7854_v20  ;;  %7994 = vst [vmem:[#allocation41_spill] sm:$0xff] %v6632_v19  ;;  %v6640_v42 = vsub.f32 %v418_v62, %v6622_v43  ;;  %v1277_v62 = vand.u32 4294901760, %v1276_v28  ;;  %v6672_v28 = vsub.f32 %v420_v58, %v6659_v45  ;;  %v422_v43 = vld [vmem:[#allocation7 + $0x88] sm:$0xff]  ;;  %v8004_v45 = vld [vmem:[#allocation32_spill] sm:$0xff] }
 0x259   : > { %7997 = vst [vmem:[#allocation83_spill] sm:$0xff] %v6652_v25  ;;  %v6664_v52 = vsub.f32 %v436_v33, %v6652_v25  ;;  %v6678_v33 = vand.u32 4294901760, %v422_v43  ;;  %v423_v25 = vld [vmem:[#allocation7 + $0x90] sm:$0xff]  ;;  %v8005_v39 = vand.u32 4294901760, %v8004_v45 }
 0x25a   : > { %1256 = vmatmul.mubr.f32.gmra.mrb[50].mxu0 %v1255_v34  ;;  %2308 = vmatmul.mubr.f32.gmra.mrb[16].mxu1 %v6606_v47  ;;  %v6647_v34 = vsub.f32 %v435_v12, %v6632_v19  ;;  %v7763_v35 = vand.u32 4294901760, %v6640_v42  ;;  %v421_v12 = vld [vmem:[#allocation7 + $0x80] sm:$0xff]  ;;  %v1288_v19 = vand.u32 4294901760, %v1287_v56  ;;  %8001 = vst [vmem:[#allocation87_spill] sm:$0xff] %v6672_v28 }
 0x25b   : > { %1261 = vmatprep.mubr.f32.mxu0 %v7854_v20  ;;  %2313 = vmatprep.mubr.f32.mxu1 %v7854_v20  ;;  %8000 = vst [vmem:[#allocation86_spill] sm:$0xff] %v6664_v52  ;;  %v6674_v2 = vand.u32 4294901760, %v421_v12  ;;  %8003 = vst [vmem:[#allocation89_spill] sm:$0xff] %v6678_v33  ;;  %v6699_v58 = vsub.f32 %v422_v43, %v6678_v33  ;;  %v8015_v43 = vld [vmem:[#allocation37_spill] sm:$0xff] }
 0x25c   : > { %7996 = vst [vmem:[#allocation82_spill] sm:$0xff] %v6647_v34 }
 0x25d   : > { %8002 = vst [vmem:[#allocation88_spill] sm:$0xff] %v6674_v2 }
 0x25e   : > { %1267 = vmatmul.mubr.f32.gmra.mrb[52].mxu0 %v1266_v59  ;;  %2316 = vmatmul.mubr.f32.gmra.mrb[18].mxu1 %v6630_v53  ;;  %v1298_v59 = vsub.f32 %v6640_v42, %v7763_v35  ;;  %v6686_v35 = vsub.f32 %v421_v12, %v6674_v2  ;;  %v8010_v12 = vld [vmem:[#allocation13_spill] sm:$0xff] }
 0x25f   : > { %1272 = vmatprep.mubr.f32.mxu0 %v7854_v20  ;;  %2321 = vmatprep.mubr.f32.mxu1 %v7854_v20  ;;  %v8011_v2 = vand.u32 4294901760, %v8010_v12 }
 0x260   : > { %v1299_v56 = vand.u32 4294901760, %v1298_v59  ;;  %v8008_v59 = vand.u32 4294901760, %v5881_v17  ;;  %v8013_v17 = vld [vmem:[#allocation35_spill] sm:$0xff] }
 0x261   : > { %v8014_v57 = vand.u32 4294901760, %v8013_v17 }
 0x262   : > { %1278 = vmatmul.mubr.f32.gmra.mrb[54].mxu0 %v1277_v62  ;;  %2324 = vmatmul.mubr.f32.gmra.mrb[20].mxu1 %v6647_v34  ;;  %v1309_v62 = vsub.f32 %v6657_v40, %v7776_v11  ;;  %v4258_v11 = vpack.c.bf16 %v8009_v32, %v8008_v59  ;;  %v8012_v34 = vand.u32 4294901760, %v6672_v28  ;;  %v424_v32 = vld [vmem:[#allocation7 + $0x98] sm:$0xff]  ;;  %v8019_v59 = vld [vmem:[#allocation48_spill] sm:$0xff] }
 0x263   : > { %1283 = vmatprep.mubr.f32.mxu0 %v7854_v20  ;;  %2329 = vmatprep.mubr.f32.mxu1 %v7854_v20 }
 0x264   : > { %v1320_v45 = vsub.f32 %v6672_v28, %v8012_v34  ;;  %v8020_v34 = vand.u32 4294901760, %v8019_v59 }
 0x266   : > { %1289 = vmatmul.mubr.f32.gmra.mrb[56].mxu0 %v1288_v19  ;;  %2332 = vmatmul.mubr.f32.gmra.mrb[22].mxu1 %v6664_v52  ;;  %v8006_v19 = vld [vmem:[#allocation33_spill] sm:$0xff]  ;;  %v1310_v52 = vand.u32 4294901760, %v1309_v62  ;;  %v1321_v28 = vand.u32 4294901760, %v1320_v45 }
 0x267   : > { %1294 = vmatprep.mubr.f32.mxu0 %v7854_v20  ;;  %2434 = vmatprep.mubr.f32.mxu1 %v7854_v20  ;;  %v8007_v6 = vand.u32 4294901760, %v8006_v19  ;;  %v1341_v19 = vand.u32 4294901760, %v6699_v58 }
 0x269   : > { %v4256_v51 = vpack.c.bf16 %v8007_v6, %v8005_v39  ;;  %v6707_v6 = vand.u32 4294901760, %v423_v25 }
 0x26a   : > { %1300 = vmatmul.mubr.f32.gmra.mrb[58].mxu0 %v1299_v56  ;;  %2438 = vmatmul.mubr.f32.vlgmr.msra.gmra.mrb[24].mxu1 %v8011_v2  ;;  %v8016_v2 = vand.u32 4294901760, %v8015_v43  ;;  %v8017_v56 = vld [vmem:[#allocation47_spill] sm:$0xff] }
 0x26b   : > { %4257 = vmatpush1.bf16.msra.mxu1 %v4256_v51  ;;  %1305 = vmatprep.mubr.f32.mxu0 %v7854_v20  ;;  %v8018_v62 = vand.u32 4294901760, %v8017_v56  ;;  %v8021_v51 = vld [vmem:[#allocation15_spill] sm:$0xff]  ;;  %v6726_v17 = vsub.f32 %v423_v25, %v6707_v6  ;;  %v8028_v56 = vand.u32 4294901760, %v6020_v27  ;;  %v8030_v25 = vld [vmem:[#allocation20_spill] sm:$0xff]  ;;  %v8033_v27 = vand.u32 4294901760, %v6000_v8 }
 0x26c   : > { %4259 = vmatprep.subr.bf16.mxu1 %v4258_v11  ;;  %2443 = vmatprep.mubr.f32.mxu1 %v7854_v20  ;;  %v4260_v39 = vpack.c.bf16 %v8016_v2, %v8014_v57  ;;  %v8022_v33 = vand.u32 4294901760, %v8021_v51  ;;  %v8023_v11 = vand.u32 4294901760, %v6686_v35  ;;  %v6728_v57 = vand.u32 4294901760, %v424_v32  ;;  %v8026_v2 = vld [vmem:[#allocation45_spill] sm:$0xff] }
 0x26d   : > { %v4262_v12 = vpack.c.bf16 %v8020_v34, %v8018_v62  ;;  %v8029_v62 = vand.u32 4294901760, %v6022_v63  ;;  %v8031_v34 = vand.u32 4294901760, %v8030_v25  ;;  %v8032_v63 = vand.u32 4294901760, %v5990_v37 }
 0x26e   : > { %1311 = vmatmul.mubr.f32.gmra.mrb[60].mxu0 %v1310_v52  ;;  %2447 = vmatmul.mubr.f32.gmra.mrb[26].mxu1 %v8022_v33  ;;  %v1331_v40 = vsub.f32 %v6686_v35, %v8023_v11  ;;  %v8024_v52 = vld [vmem:[#allocation39_spill] sm:$0xff]  ;;  %v8027_v33 = vand.u32 4294901760, %v8026_v2  ;;  %v1352_v11 = vand.u32 4294901760, %v6726_v17  ;;  %v8036_v2 = vand.u32 4294901760, %v6089_v61 }
 0x26f   : > { %4261 = vmatpush1.bf16.msra.mxu1 %v4260_v39  ;;  %1316 = vmatprep.mubr.f32.mxu0 %v7854_v20  ;;  %v8025_v43 = vand.u32 4294901760, %v8024_v52  ;;  %v4266_v59 = vpack.c.bf16 %v8029_v62, %v8028_v56  ;;  %v6747_v52 = vsub.f32 %v424_v32, %v6728_v57  ;;  %v8037_v32 = vand.u32 4294901760, %v6091_v48  ;;  %v8040_v48 = vld [vmem:[#allocation23_spill] sm:$0xff] }
 0x270   : > { %4263 = vmatprep.subr.bf16.mxu1 %v4262_v12  ;;  %2452 = vmatprep.mubr.f32.mxu1 %v7854_v20  ;;  %v1332_v39 = vand.u32 4294901760, %v1331_v40  ;;  %v1342_v12 = vsub.f32 %v6699_v58, %v1341_v19  ;;  %v4268_v40 = vpack.c.bf16 %v8033_v27, %v8032_v63  ;;  %v1353_v56 = vsub.f32 %v6726_v17, %v1352_v11 }
 0x271   : > { %v4264_v45 = vpack.c.bf16 %v8027_v33, %v8025_v43  ;;  %v4270_v33 = vpack.c.bf16 %v8037_v32, %v8036_v2  ;;  %v1363_v62 = vand.u32 4294901760, %v6747_v52  ;;  %v8038_v8 = vand.u32 4294901760, %v6006_v21 }
 0x272   : > { %1322 = vmatmul.mubr.f32.gmra.mrb[62].mxu0 %v1321_v28  ;;  %2456 = vmatmul.mubr.f32.gmra.mrb[28].mxu1 %v8031_v34  ;;  %v8034_v28 = vld [vmem:[#allocation22_spill] sm:$0xff]  ;;  %v8039_v37 = vand.u32 4294901760, %v6052_v54  ;;  %v8042_v34 = vand.u32 4294901760, %v6147_v16  ;;  %v1354_v63 = vand.u32 4294901760, %v1353_v56  ;;  %v8044_v21 = vand.u32 4294901760, %v6135_v7 }
 0x273   : > { %4265 = vmatpush1.bf16.msra.mxu1 %v4264_v45  ;;  %1327 = vmatprep.mubr.f32.mxu0 %v7854_v20  ;;  %v8035_v43 = vand.u32 4294901760, %v8034_v28  ;;  %v1343_v45 = vand.u32 4294901760, %v1342_v12  ;;  %v1364_v27 = vsub.f32 %v6747_v52, %v1363_v62  ;;  %v8045_v16 = vand.u32 4294901760, %v6137_v22 }
 0x274   : > { %4267 = vmatprep.subr.bf16.mxu1 %v4266_v59  ;;  %2461 = vmatprep.mubr.f32.mxu1 %v7854_v20  ;;  %v4272_v61 = vpack.c.bf16 %v8039_v37, %v8038_v8  ;;  %v8041_v59 = vand.u32 4294901760, %v8040_v48  ;;  %v8048_v2 = vand.u32 4294901760, %v6171_v31  ;;  %v8049_v32 = vand.u32 4294901760, %v6173_v36 }
 0x275   : > { %v4276_v54 = vpack.c.bf16 %v8045_v16, %v8044_v21  ;;  %v1385_v8 = vand.u32 4294901760, %v5747_v44  ;;  %v8050_v7 = vand.u32 4294901760, %v6190_v49  ;;  %v8051_v22 = vand.u32 4294901760, %v6206_v23 }
 0x276   : > { %1333 = vmatmul.mubr.f32.gmra.mrb[64].mxu0 %v1332_v39  ;;  %2465 = vmatmul.mubr.f32.gmra.mrb[30].mxu1 %v8035_v43  ;;  %v8043_v39 = vand.u32 4294901760, %v6165_v38  ;;  %v8046_v38 = vld [vmem:[#allocation30_spill] sm:$0xff]  ;;  %v8052_v36 = vand.u32 4294901760, %v6403_v26  ;;  %v8053_v37 = vand.u32 4294901760, %v6284_v9  ;;  %v8055_v49 = vand.u32 4294901760, %v6298_v0 }
 0x277   : > { %4269 = vmatpush1.bf16.msra.mxu1 %v4268_v40  ;;  %1338 = vmatprep.mubr.f32.mxu0 %v7854_v20  ;;  %v1374_v40 = vand.u32 4294901760, %v5744_v30  ;;  %v8047_v43 = vand.u32 4294901760, %v8046_v38  ;;  %v4280_v31 = vpack.c.bf16 %v8051_v22, %v8050_v7  ;;  %v8056_v9 = vand.u32 4294901760, %v6300_v3 }
 0x278   : > { %4271 = vmatprep.subr.bf16.mxu1 %v4270_v33  ;;  %2470 = vmatprep.mubr.f32.mxu1 %v7854_v20  ;;  %v4274_v12 = vpack.c.bf16 %v8043_v39, %v8042_v34  ;;  %v4278_v33 = vpack.c.bf16 %v8049_v32, %v8048_v2  ;;  %v1386_v39 = vsub.f32 %v5747_v44, %v1385_v8  ;;  %v1407_v21 = vand.u32 4294901760, %v7963_v41  ;;  %v8083_v44 = vld [vmem:[#allocation19_spill] sm:$0xff] }
 0x279   : > { %v1375_v56 = vsub.f32 %v5744_v30, %v1374_v40  ;;  %v4284_v23 = vpack.c.bf16 %v8056_v9, %v8055_v49  ;;  %v8058_v3 = vand.u32 4294901760, %v6492_v5  ;;  %v1429_v32 = vand.u32 4294901760, %v6523_v1  ;;  %v8080_v30 = vld [vmem:[#allocation18_spill] sm:$0xff] }
 0x27a   : > { %1344 = vmatmul.mubr.f32.gmra.mrb[66].mxu0 %v1343_v45  ;;  %2474 = vmatmul.mubr.f32.gmra.mrb[32].mxu1 %v8041_v59  ;;  %v1365_v45 = vand.u32 4294901760, %v1364_v27  ;;  %v1408_v16 = vsub.f32 %v7963_v41, %v1407_v21  ;;  %v1440_v7 = vand.u32 4294901760, %v6557_v50  ;;  %v8061_v22 = vand.u32 4294901760, %v6594_v29  ;;  %v8089_v41 = vld [vmem:[#allocation52_spill] sm:$0xff] }
 0x27b   : > { %4273 = vmatpush1.bf16.msra.mxu1 %v4272_v61  ;;  %1349 = vmatprep.mubr.f32.mxu0 %v7854_v20  ;;  %v8054_v61 = vand.u32 4294901760, %v6286_v15  ;;  %v1376_v34 = vand.u32 4294901760, %v1375_v56  ;;  %v8057_v15 = vand.u32 4294901760, %v6456_v13  ;;  %v1430_v56 = vsub.f32 %v6523_v1, %v1429_v32  ;;  %v8094_v1 = vld [vmem:[#allocation78_spill] sm:$0xff] }
 0x27c   : > { %4275 = vmatprep.subr.bf16.mxu1 %v4274_v12  ;;  %2479 = vmatprep.mubr.f32.mxu1 %v7854_v20  ;;  %v1396_v12 = vand.u32 4294901760, %v7952_v60  ;;  %v8063_v49 = vand.u32 4294901760, %v6640_v42 }
 0x27d   : > { %v4282_v59 = vpack.c.bf16 %v8054_v61, %v8053_v37  ;;  %v1451_v37 = vand.u32 4294901760, %v6590_v14  ;;  %v8062_v61 = vand.u32 4294901760, %v6611_v46 }
 0x27e   : > { %1355 = vmatmul.mubr.f32.gmra.mrb[68].mxu0 %v1354_v63  ;;  %2483 = vmatmul.mubr.f32.gmra.mrb[34].mxu1 %v8047_v43  ;;  %v1387_v63 = vand.u32 4294901760, %v1386_v39  ;;  %v1397_v27 = vsub.f32 %v7952_v60, %v1396_v12  ;;  %v1409_v43 = vand.u32 4294901760, %v1408_v16  ;;  %v1462_v39 = vand.u32 4294901760, %v6606_v47  ;;  %v8066_v16 = vld [vmem:[#allocation82_spill] sm:$0xff]  ;;  %v8086_v60 = vld [vmem:[#allocation25_spill] sm:$0xff] }
 0x27f   : > { %4277 = vmatpush1.bf16.msra.mxu1 %v4276_v54  ;;  %1360 = vmatprep.mubr.f32.mxu0 %v7854_v20  ;;  %v1418_v54 = vand.u32 4294901760, %v7973_v55 }
 0x280   : > { %4279 = vmatprep.subr.bf16.mxu1 %v4278_v33  ;;  %2488 = vmatprep.mubr.f32.mxu1 %v7854_v20  ;;  %v1398_v0 = vand.u32 4294901760, %v1397_v27  ;;  %v8060_v33 = vand.u32 4294901760, %v6569_v4 }
 0x281   : > { %v1419_v2 = vsub.f32 %v7973_v55, %v1418_v54  ;;  %v8092_v55 = vld [vmem:[#allocation77_spill] sm:$0xff] }
 0x282   : > { %1366 = vmatmul.mubr.f32.gmra.mrb[70].mxu0 %v1365_v45  ;;  %2492 = vmatmul.mubr.f32.gmra.mrb[36].mxu1 %v8052_v36  ;;  %v1441_v36 = vsub.f32 %v6557_v50, %v1440_v7  ;;  %v8096_v50 = vld [vmem:[#allocation29_spill] sm:$0xff] }
 0x283   : > { %4281 = vmatpush1.bf16.msra.mxu1 %v4280_v31  ;;  %1371 = vmatprep.mubr.f32.mxu0 %v7854_v20  ;;  %v1420_v45 = vand.u32 4294901760, %v1419_v2  ;;  %v1431_v31 = vand.u32 4294901760, %v1430_v56  ;;  %v8069_v56 = vld [vmem:[#allocation86_spill] sm:$0xff] }
 0x284   : > { %4283 = vmatprep.subr.bf16.mxu1 %v4282_v59  ;;  %2497 = vmatprep.mubr.f32.mxu1 %v7854_v20  ;;  %v1442_v59 = vand.u32 4294901760, %v1441_v36 }
 0x286   : > { %1377 = vmatmul.mubr.f32.gmra.mrb[72].mxu0 %v1376_v34  ;;  %2501 = vmatmul.mubr.f32.gmra.mrb[38].mxu1 %v8057_v15  ;;  %v1452_v34 = vsub.f32 %v6590_v14, %v1451_v37  ;;  %v1473_v15 = vand.u32 4294901760, %v6630_v53  ;;  %v8097_v14 = vld [vmem:[#allocation36_spill] sm:$0xff] }
 0x287   : > { %4285 = vmatpush1.bf16.msra.mxu1 %v4284_v23  ;;  %1382 = vmatprep.mubr.f32.mxu0 %v7854_v20  ;;  %v1463_v23 = vsub.f32 %v6606_v47, %v1462_v39  ;;  %v8098_v47 = vld [vmem:[#allocation80_spill] sm:$0xff] }
 0x288   : > { %4287 = vmatprep.subr.msk.bf16.mxu1 %vm5855_vm0, %v7855_v18  ;;  %2506 = vmatprep.mubr.f32.mxu1 %v7854_v20  ;;  %v1453_v9 = vand.u32 4294901760, %v1452_v34  ;;  %v8071_v34 = vld [vmem:[#allocation12_spill] sm:$0xff] }
 0x28a   : > { %1388 = vmatmul.mubr.f32.gmra.mrb[74].mxu0 %v1387_v63  ;;  %2510 = vmatmul.mubr.f32.gmra.mrb[40].mxu1 %v8058_v3  ;;  %v8064_v63 = vld [vmem:[#allocation84_spill] sm:$0xff]  ;;  %v1464_v3 = vand.u32 4294901760, %v1463_v23  ;;  %v8076_v23 = vld [vmem:[#allocation55_spill] sm:$0xff] }
 0x28b   : > { %1393 = vmatprep.mubr.f32.mxu0 %v7854_v20  ;;  %2515 = vmatprep.mubr.f32.mxu1 %v7854_v20  ;;  %v8065_v27 = vand.u32 4294901760, %v8064_v63 }
 0x28e   : > { %1399 = vmatmul.mubr.f32.gmra.mrb[76].mxu0 %v1398_v0  ;;  %2519 = vmatmul.mubr.f32.gmra.mrb[42].mxu1 %v8059_v24  ;;  %v1474_v0 = vsub.f32 %v6630_v53, %v1473_v15  ;;  %v1484_v24 = vand.u32 4294901760, %v8066_v16  ;;  %v8099_v53 = vld [vmem:[#allocation40_spill] sm:$0xff] }
 0x28f   : > { %1404 = vmatprep.mubr.f32.mxu0 %v7854_v20  ;;  %2524 = vmatprep.mubr.f32.mxu1 %v7854_v20 }
 0x292   : > { %1410 = vmatmul.mubr.f32.gmra.mrb[78].mxu0 %v1409_v43  ;;  %2528 = vmatmul.mubr.f32.gmra.mrb[44].mxu1 %v8060_v33  ;;  %v8067_v43 = vld [vmem:[#allocation87_spill] sm:$0xff]  ;;  %v1475_v33 = vand.u32 4294901760, %v1474_v0 }
 0x293   : > { %1415 = vmatprep.mubr.f32.mxu0 %v7854_v20  ;;  %2533 = vmatprep.mubr.f32.mxu1 %v7854_v20  ;;  %v8068_v2 = vand.u32 4294901760, %v8067_v43  ;;  %v8082_v0 = vld [vmem:[#allocation63_spill] sm:$0xff] }
 0x296   : > { %1421 = vmatmul.mubr.f32.gmra.mrb[80].mxu0 %v1420_v45  ;;  %2537 = vmatmul.mubr.f32.gmra.mrb[46].mxu1 %v8061_v22  ;;  %v1485_v45 = vsub.f32 %v8066_v16, %v1484_v24  ;;  %v1495_v22 = vand.u32 4294901760, %v8069_v56  ;;  %v8131_v16 = vld [vmem:[#allocation13_spill] sm:$0xff] }
 0x297   : > { %1426 = vmatprep.mubr.f32.mxu0 %v7854_v20  ;;  %2542 = vmatprep.mubr.f32.mxu1 %v7854_v20 }
 0x298   : > { %v1486_v36 = vand.u32 4294901760, %v1485_v45  ;;  %v8091_v45 = vld [vmem:[#allocation73_spill] sm:$0xff] }
 0x29a   : > { %1432 = vmatmul.mubr.f32.gmra.mrb[82].mxu0 %v1431_v31  ;;  %2546 = vmatmul.mubr.f32.gmra.mrb[48].mxu1 %v8062_v61  ;;  %v8070_v31 = vand.u32 4294901760, %v6686_v35  ;;  %v1496_v61 = vsub.f32 %v8069_v56, %v1495_v22 }
 0x29b   : > { %1437 = vmatprep.mubr.f32.mxu0 %v7854_v20  ;;  %2551 = vmatprep.mubr.f32.mxu1 %v7854_v20 }
 0x29e   : > { %1443 = vmatmul.mubr.f32.gmra.mrb[84].mxu0 %v1442_v59  ;;  %2555 = vmatmul.mubr.f32.gmra.mrb[50].mxu1 %v8063_v49  ;;  %v1497_v59 = vand.u32 4294901760, %v1496_v61  ;;  %v8072_v49 = vld [vmem:[#allocation38_spill] sm:$0xff] }
 0x29f   : > { %1448 = vmatprep.mubr.f32.mxu0 %v7854_v20  ;;  %2560 = vmatprep.mubr.f32.mxu1 %v7854_v20 }
 0x2a2   : > { %1454 = vmatmul.mubr.f32.gmra.mrb[86].mxu0 %v1453_v9  ;;  %2564 = vmatmul.mubr.f32.gmra.mrb[52].mxu1 %v8065_v27  ;;  %v8074_v9 = vld [vmem:[#allocation14_spill] sm:$0xff]  ;;  %v8078_v27 = vld [vmem:[#allocation53_spill] sm:$0xff] }
 0x2a3   : > { %1459 = vmatprep.mubr.f32.mxu0 %v7854_v20  ;;  %2569 = vmatprep.mubr.f32.mxu1 %v7854_v20 }
 0x2a6   : > { %1465 = vmatmul.mubr.f32.gmra.mrb[88].mxu0 %v1464_v3  ;;  %2573 = vmatmul.mubr.f32.gmra.mrb[54].mxu1 %v8068_v2  ;;  %v8079_v3 = vld [vmem:[#allocation58_spill] sm:$0xff]  ;;  %v8085_v2 = vld [vmem:[#allocation67_spill] sm:$0xff] }
 0x2a7   : > { %1470 = vmatprep.mubr.f32.mxu0 %v7854_v20  ;;  %2578 = vmatprep.mubr.f32.mxu1 %v7854_v20 }
 0x2aa   : > { %1476 = vmatmul.mubr.f32.gmra.mrb[90].mxu0 %v1475_v33  ;;  %2582 = vmatmul.mubr.f32.gmra.mrb[56].mxu1 %v8070_v31  ;;  %v8088_v33 = vld [vmem:[#allocation68_spill] sm:$0xff] }
 0x2ab   : > { %1481 = vmatprep.mubr.f32.mxu0 %v7854_v20  ;;  %2587 = vmatprep.mubr.f32.mxu1 %v7854_v20  ;;  %v8108_v31 = vld [vmem:[#allocation88_spill] sm:$0xff] }
 0x2ae   : > { %1487 = vmatmul.mubr.f32.gmra.mrb[92].mxu0 %v1486_v36  ;;  %2591 = vmatmul.mubr.f32.gmra.mrb[58].mxu1 %v1341_v19  ;;  %v8073_v19 = vld [vmem:[#allocation49_spill] sm:$0xff] }
 0x2af   : > { %1492 = vmatprep.mubr.f32.mxu0 %v7854_v20  ;;  %2596 = vmatprep.mubr.f32.mxu1 %v7854_v20 }
 0x2b2   : > { %1498 = vmatmul.mubr.f32.gmra.mrb[94].mxu0 %v1497_v59  ;;  %2600 = vmatmul.mubr.f32.gmra.mrb[60].mxu1 %v1352_v11  ;;  %v8075_v11 = vld [vmem:[#allocation51_spill] sm:$0xff]  ;;  %v8111_v59 = vld [vmem:[#allocation89_spill] sm:$0xff] }
 0x2b3   : > { %1728 = vmatprep.mubr.f32.mxu0 %v7854_v20  ;;  %2605 = vmatprep.mubr.f32.mxu1 %v7854_v20 }
 0x2b6   : > { %1730 = vmatmul.mubr.f32.vlgmr.msra.gmra.mrb[32].mxu0 %v8071_v34  ;;  %2609 = vmatmul.mubr.f32.gmra.mrb[62].mxu1 %v1363_v62  ;;  %v8077_v62 = vld [vmem:[#allocation17_spill] sm:$0xff] }
 0x2b7   : > { %4193 = vmatpush1.bf16.msra.mxu0 %v8072_v49  ;;  %1735 = vmatprep.mubr.f32.mxu0 %v7854_v20 }
 0x2b8   : > { %4195 = vmatprep.subr.bf16.mxu0 %v8073_v19  ;;  %2614 = vmatprep.mubr.f32.mxu1 %v7854_v20 }
 0x2ba   : > { %1737 = vmatmul.mubr.f32.gmra.mrb[34].mxu0 %v8074_v9  ;;  %2618 = vmatmul.mubr.f32.gmra.mrb[0].mxu1 %v1374_v40  ;;  %v8081_v40 = vld [vmem:[#allocation60_spill] sm:$0xff] }
 0x2bb   : > { %4197 = vmatpush1.bf16.msra.mxu0 %v8075_v11  ;;  %1742 = vmatprep.mubr.f32.mxu0 %v7854_v20 }
 0x2bc   : > { %4199 = vmatprep.subr.bf16.mxu0 %v8076_v23  ;;  %2623 = vmatprep.mubr.f32.mxu1 %v7854_v20 }
 0x2be   : > { %1744 = vmatmul.mubr.f32.gmra.mrb[36].mxu0 %v8077_v62  ;;  %2627 = vmatmul.mubr.f32.gmra.mrb[2].mxu1 %v1385_v8  ;;  %v8084_v8 = vld [vmem:[#allocation61_spill] sm:$0xff] }
 0x2bf   : > { %4201 = vmatpush1.bf16.msra.mxu0 %v8078_v27  ;;  %1749 = vmatprep.mubr.f32.mxu0 %v7854_v20 }
 0x2c0   : > { %4203 = vmatprep.subr.bf16.mxu0 %v8079_v3  ;;  %2632 = vmatprep.mubr.f32.mxu1 %v7854_v20 }
 0x2c2   : > { %1751 = vmatmul.mubr.f32.gmra.mrb[38].mxu0 %v8080_v30  ;;  %2636 = vmatmul.mubr.f32.gmra.mrb[4].mxu1 %v1396_v12  ;;  %v8087_v12 = vld [vmem:[#allocation65_spill] sm:$0xff] }
 0x2c3   : > { %4205 = vmatpush1.bf16.msra.mxu0 %v8081_v40  ;;  %1756 = vmatprep.mubr.f32.mxu0 %v7854_v20  ;;  %v8118_v40 = vld [vmem:[#allocation16_spill] sm:$0xff] }
 0x2c4   : > { %4207 = vmatprep.subr.bf16.mxu0 %v8082_v0  ;;  %2641 = vmatprep.mubr.f32.mxu1 %v7854_v20 }
 0x2c6   : > { %1758 = vmatmul.mubr.f32.gmra.mrb[40].mxu0 %v8083_v44  ;;  %2645 = vmatmul.mubr.f32.gmra.mrb[6].mxu1 %v1407_v21  ;;  %v8090_v21 = vld [vmem:[#allocation72_spill] sm:$0xff] }
 0x2c7   : > { %4209 = vmatpush1.bf16.msra.mxu0 %v8084_v8  ;;  %1763 = vmatprep.mubr.f32.mxu0 %v7854_v20  ;;  %v8120_v8 = vld [vmem:[#allocation21_spill] sm:$0xff] }
 0x2c8   : > { %4211 = vmatprep.subr.bf16.mxu0 %v8085_v2  ;;  %2650 = vmatprep.mubr.f32.mxu1 %v7854_v20  ;;  %v8121_v2 = vld [vmem:[#allocation24_spill] sm:$0xff] }
 0x2ca   : > { %1765 = vmatmul.mubr.f32.gmra.mrb[42].mxu0 %v8086_v60  ;;  %2654 = vmatmul.mubr.f32.gmra.mrb[8].mxu1 %v1418_v54  ;;  %v8093_v54 = vld [vmem:[#allocation75_spill] sm:$0xff] }
 0x2cb   : > { %4213 = vmatpush1.bf16.msra.mxu0 %v8087_v12  ;;  %1770 = vmatprep.mubr.f32.mxu0 %v7854_v20  ;;  %v8123_v12 = vld [vmem:[#allocation31_spill] sm:$0xff] }
 0x2cc   : > { %4215 = vmatprep.subr.bf16.mxu0 %v8088_v33  ;;  %2659 = vmatprep.mubr.f32.mxu1 %v7854_v20  ;;  %v8124_v33 = vld [vmem:[#allocation76_spill] sm:$0xff] }
 0x2ce   : > { %1772 = vmatmul.mubr.f32.gmra.mrb[44].mxu0 %v8089_v41  ;;  %2663 = vmatmul.mubr.f32.gmra.mrb[10].mxu1 %v1429_v32  ;;  %v8095_v32 = vld [vmem:[#allocation28_spill] sm:$0xff] }
 0x2cf   : > { %4217 = vmatpush1.bf16.msra.mxu0 %v8090_v21  ;;  %1777 = vmatprep.mubr.f32.mxu0 %v7854_v20  ;;  %v8125_v21 = vld [vmem:[#allocation26_spill] sm:$0xff] }
 0x2d0   : > { %4219 = vmatprep.subr.bf16.mxu0 %v8091_v45  ;;  %2668 = vmatprep.mubr.f32.mxu1 %v7854_v20  ;;  %v8126_v45 = vld [vmem:[#allocation34_spill] sm:$0xff] }
 0x2d2   : > { %1779 = vmatmul.mubr.f32.gmra.mrb[46].mxu0 %v8092_v55  ;;  %2672 = vmatmul.mubr.f32.gmra.mrb[12].mxu1 %v1440_v7  ;;  %v8128_v7 = vld [vmem:[#allocation44_spill] sm:$0xff] }
 0x2d3   : > { %4221 = vmatpush1.bf16.msra.mxu0 %v8093_v54  ;;  %1784 = vmatprep.mubr.f32.mxu0 %v7854_v20  ;;  %v8127_v54 = vld [vmem:[#allocation79_spill] sm:$0xff] }
 0x2d4   : > { %2677 = vmatprep.mubr.f32.mxu1 %v7854_v20 }
 0x2d6   : > { %1786 = vmatmul.mubr.f32.gmra.mrb[48].mxu0 %v8094_v1  ;;  %2681 = vmatmul.mubr.f32.gmra.mrb[14].mxu1 %v1451_v37  ;;  %v8129_v37 = vld [vmem:[#allocation41_spill] sm:$0xff] }
 0x2d7   : > { %1791 = vmatprep.mubr.f32.mxu0 %v7854_v20  ;;  %2686 = vmatprep.mubr.f32.mxu1 %v7854_v20 }
 0x2da   : > { %1793 = vmatmul.mubr.f32.gmra.mrb[50].mxu0 %v8095_v32  ;;  %2690 = vmatmul.mubr.f32.gmra.mrb[16].mxu1 %v1462_v39  ;;  %v8102_v39 = vld [vmem:[#allocation81_spill] sm:$0xff] }
 0x2db   : > { %1798 = vmatprep.mubr.f32.mxu0 %v7854_v20  ;;  %2695 = vmatprep.mubr.f32.mxu1 %v7854_v20 }
 0x2de   : > { %1800 = vmatmul.mubr.f32.gmra.mrb[52].mxu0 %v8096_v50  ;;  %2699 = vmatmul.mubr.f32.gmra.mrb[18].mxu1 %v1473_v15  ;;  %v8130_v15 = vld [vmem:[#allocation83_spill] sm:$0xff] }
 0x2df   : > { %1805 = vmatprep.mubr.f32.mxu0 %v7854_v20  ;;  %2704 = vmatprep.mubr.f32.mxu1 %v7854_v20 }
 0x2e2   : > { %1807 = vmatmul.mubr.f32.gmra.mrb[54].mxu0 %v8097_v14  ;;  %2708 = vmatmul.mubr.f32.gmra.mrb[20].mxu1 %v1484_v24  ;;  %v8105_v24 = vld [vmem:[#allocation85_spill] sm:$0xff] }
 0x2e3   : > { %1812 = vmatprep.mubr.f32.mxu0 %v7854_v20  ;;  %2713 = vmatprep.mubr.f32.mxu1 %v7854_v20 }
 0x2e6   : > { %1814 = vmatmul.mubr.f32.gmra.mrb[56].mxu0 %v8098_v47  ;;  %2717 = vmatmul.mubr.f32.gmra.mrb[22].mxu1 %v1495_v22 }
 0x2e7   : > { %1819 = vmatprep.mubr.f32.mxu0 %v7854_v20  ;;  %2883 = vmatprep.mubr.f32.mxu1 %v7854_v20 }
 0x2ea   : > { %1821 = vmatmul.mubr.f32.gmra.mrb[58].mxu0 %v8099_v53  ;;  %2885 = vmatmul.mubr.f32.vlgmr.msra.gmra.mrb[24].mxu1 %v8071_v34 }
 0x2eb   : > { %4289 = vmatpush1.bf16.msk.msra.mxu1 %vm5877_vm3, %v7855_v18  ;;  %1826 = vmatprep.mubr.f32.mxu0 %v7854_v20 }
 0x2ec   : > { %4291 = vmatprep.subr.msk.bf16.mxu1 %vm5891_vm10, %v7855_v18  ;;  %2890 = vmatprep.mubr.f32.mxu1 %v7854_v20 }
 0x2ee   : > { %1828 = vmatmul.mubr.f32.gmra.mrb[60].mxu0 %v8102_v39  ;;  %2892 = vmatmul.mubr.f32.gmra.mrb[26].mxu1 %v8074_v9 }
 0x2ef   : > { %4293 = vmatpush1.bf16.msk.msra.mxu1 %vm5941_vm15, %v7855_v18  ;;  %1833 = vmatprep.mubr.f32.mxu0 %v7854_v20 }
 0x2f0   : > { %4295 = vmatprep.subr.msk.bf16.mxu1 %vm5967_vm4, %v7855_v18  ;;  %2897 = vmatprep.mubr.f32.mxu1 %v7854_v20 }
 0x2f2   : > { %1835 = vmatmul.mubr.f32.gmra.mrb[62].mxu0 %v8105_v24  ;;  %2899 = vmatmul.mubr.f32.gmra.mrb[28].mxu1 %v8077_v62 }
 0x2f3   : > { %4297 = vmatpush1.bf16.msk.msra.mxu1 %vm6016_vm14, %v7855_v18  ;;  %1840 = vmatprep.mubr.f32.mxu0 %v7854_v20 }
 0x2f4   : > { %4299 = vmatprep.subr.msk.bf16.mxu1 %vm6040_vm9, %v7855_v18  ;;  %2904 = vmatprep.mubr.f32.mxu1 %v7854_v20 }
 0x2f6   : > { %1842 = vmatmul.mubr.f32.gmra.mrb[64].mxu0 %v8108_v31  ;;  %2906 = vmatmul.mubr.f32.gmra.mrb[30].mxu1 %v8080_v30 }
 0x2f7   : > { %4301 = vmatpush1.bf16.msk.msra.mxu1 %vm6085_vm1, %v7855_v18  ;;  %1847 = vmatprep.mubr.f32.mxu0 %v7854_v20 }
 0x2f8   : > { %4303 = vmatprep.subr.msk.bf16.mxu1 %vm6111_vm8, %v7855_v18  ;;  %2911 = vmatprep.mubr.f32.mxu1 %v7854_v20 }
 0x2fa   : > { %1849 = vmatmul.mubr.f32.gmra.mrb[66].mxu0 %v8111_v59  ;;  %2913 = vmatmul.mubr.f32.gmra.mrb[32].mxu1 %v8083_v44 }
 0x2fb   : > { %4305 = vmatpush1.bf16.msk.msra.mxu1 %vm6161_vm13, %v7855_v18  ;;  %1854 = vmatprep.mubr.f32.mxu0 %v7854_v20 }
 0x2fc   : > { %4307 = vmatprep.subr.msk.bf16.mxu1 %vm6186_vm7, %v7855_v18  ;;  %2918 = vmatprep.mubr.f32.mxu1 %v7854_v20 }
 0x2fe   : > { %1856 = vmatmul.mubr.f32.gmra.mrb[68].mxu0 %v6707_v6  ;;  %2920 = vmatmul.mubr.f32.gmra.mrb[34].mxu1 %v8086_v60 }
 0x2ff   : > { %4309 = vmatpush1.bf16.msk.msra.mxu1 %vm7981_vm2, %v7855_v18  ;;  %1861 = vmatprep.mubr.f32.mxu0 %v7854_v20 }
 0x300   : > { %4311 = vmatprep.subr.msk.bf16.mxu1 %vm6254_vm12, %v7855_v18  ;;  %2925 = vmatprep.mubr.f32.mxu1 %v7854_v20 }
 0x302   : > { %1863 = vmatmul.mubr.f32.gmra.mrb[70].mxu0 %v6728_v57  ;;  %2927 = vmatmul.mubr.f32.gmra.mrb[36].mxu1 %v8089_v41 }
 0x303   : > { %4313 = vmatpush1.bf16.msk.msra.mxu1 %vm6294_vm5, %v7855_v18  ;;  %1868 = vmatprep.mubr.f32.mxu0 %v7854_v20 }
 0x304   : > { %4315 = vmatprep.subr.msk.bf16.mxu1 %vm7986_vm6, %v7855_v18  ;;  %2932 = vmatprep.mubr.f32.mxu1 %v7854_v20 }
 0x306   : > { %1870 = vmatmul.mubr.f32.gmra.mrb[72].mxu0 %v8118_v40  ;;  %2934 = vmatmul.mubr.f32.gmra.mrb[38].mxu1 %v8092_v55 }
 0x307   : > { %4317 = vmatpush1.bf16.msk.msra.mxu1 %vm6351_vm11, %v7855_v18  ;;  %1875 = vmatprep.mubr.f32.mxu0 %v7854_v20  ;;  %v8122_v18 = vld [vmem:[#allocation27_spill] sm:$0xff] }
 0x308   : > { %2939 = vmatprep.mubr.f32.mxu1 %v7854_v20 }
 0x30a   : > { %1877 = vmatmul.mubr.f32.gmra.mrb[74].mxu0 %v8120_v8  ;;  %2941 = vmatmul.mubr.f32.gmra.mrb[40].mxu1 %v8094_v1 }
 0x30b   : > { %1882 = vmatprep.mubr.f32.mxu0 %v7854_v20  ;;  %2946 = vmatprep.mubr.f32.mxu1 %v7854_v20 }
 0x30e   : > { %1884 = vmatmul.mubr.f32.gmra.mrb[76].mxu0 %v8121_v2  ;;  %2948 = vmatmul.mubr.f32.gmra.mrb[42].mxu1 %v8095_v32 }
 0x30f   : > { %1889 = vmatprep.mubr.f32.mxu0 %v7854_v20  ;;  %2953 = vmatprep.mubr.f32.mxu1 %v7854_v20 }
 0x312   : > { %1891 = vmatmul.mubr.f32.gmra.mrb[78].mxu0 %v8122_v18  ;;  %2955 = vmatmul.mubr.f32.gmra.mrb[44].mxu1 %v8096_v50 }
 0x313   : > { %1896 = vmatprep.mubr.f32.mxu0 %v7854_v20  ;;  %2960 = vmatprep.mubr.f32.mxu1 %v7854_v20 }
 0x316   : > { %1898 = vmatmul.mubr.f32.gmra.mrb[80].mxu0 %v8123_v12  ;;  %2962 = vmatmul.mubr.f32.gmra.mrb[46].mxu1 %v8097_v14 }
 0x317   : > { %1903 = vmatprep.mubr.f32.mxu0 %v7854_v20  ;;  %2967 = vmatprep.mubr.f32.mxu1 %v7854_v20 }
 0x31a   : > { %1905 = vmatmul.mubr.f32.gmra.mrb[82].mxu0 %v8124_v33  ;;  %2969 = vmatmul.mubr.f32.gmra.mrb[48].mxu1 %v8098_v47 }
 0x31b   : > { %1910 = vmatprep.mubr.f32.mxu0 %v7854_v20  ;;  %2974 = vmatprep.mubr.f32.mxu1 %v7854_v20 }
 0x31e   : > { %1912 = vmatmul.mubr.f32.gmra.mrb[84].mxu0 %v8125_v21  ;;  %2976 = vmatmul.mubr.f32.gmra.mrb[50].mxu1 %v8099_v53 }
 0x31f   : > { %1917 = vmatprep.mubr.f32.mxu0 %v7854_v20  ;;  %2981 = vmatprep.mubr.f32.mxu1 %v7854_v20 }
 0x322   : > { %1919 = vmatmul.mubr.f32.gmra.mrb[86].mxu0 %v8126_v45  ;;  %2983 = vmatmul.mubr.f32.gmra.mrb[52].mxu1 %v8102_v39 }
 0x323   : > { %1924 = vmatprep.mubr.f32.mxu0 %v7854_v20  ;;  %2988 = vmatprep.mubr.f32.mxu1 %v7854_v20 }
 0x326   : > { %1926 = vmatmul.mubr.f32.gmra.mrb[88].mxu0 %v8127_v54  ;;  %2990 = vmatmul.mubr.f32.gmra.mrb[54].mxu1 %v8105_v24 }
 0x327   : > { %1931 = vmatprep.mubr.f32.mxu0 %v7854_v20  ;;  %2995 = vmatprep.mubr.f32.mxu1 %v7854_v20 }
 0x32a   : > { %1933 = vmatmul.mubr.f32.gmra.mrb[90].mxu0 %v8128_v7  ;;  %2997 = vmatmul.mubr.f32.gmra.mrb[56].mxu1 %v8108_v31 }
 0x32b   : > { %1938 = vmatprep.mubr.f32.mxu0 %v7854_v20  ;;  %3002 = vmatprep.mubr.f32.mxu1 %v7854_v20 }
 0x32e   : > { %1940 = vmatmul.mubr.f32.gmra.mrb[92].mxu0 %v8129_v37  ;;  %3004 = vmatmul.mubr.f32.gmra.mrb[58].mxu1 %v8111_v59 }
 0x32f   : > { %1945 = vmatprep.mubr.f32.mxu0 %v7854_v20  ;;  %3009 = vmatprep.mubr.f32.mxu1 %v7854_v20 }
 0x332   : > { %1947 = vmatmul.mubr.f32.gmra.mrb[94].mxu0 %v8130_v15  ;;  %3011 = vmatmul.mubr.f32.gmra.mrb[60].mxu1 %v6707_v6 }
 0x333   : > { %2081 = vmatprep.mubr.f32.mxu0 %v7854_v20  ;;  %3016 = vmatprep.mubr.f32.mxu1 %v7854_v20 }
 0x336   : > { %2084 = vmatmul.mubr.f32.vlgmr.msra.gmra.mrb[32].mxu0 %v8131_v16  ;;  %3018 = vmatmul.mubr.f32.gmra.mrb[62].mxu1 %v6728_v57 }
 0x337   : > { %2089 = vmatprep.mubr.f32.mxu0 %v7854_v20  ;;  %3023 = vmatprep.mubr.f32.mxu1 %v7854_v20 }
 0x33a   : > { %2092 = vmatmul.mubr.f32.gmra.mrb[34].mxu0 %v8021_v51  ;;  %3025 = vmatmul.mubr.f32.gmra.mrb[0].mxu1 %v8118_v40 }
 0x33b   : > { %2097 = vmatprep.mubr.f32.mxu0 %v7854_v20  ;;  %3030 = vmatprep.mubr.f32.mxu1 %v7854_v20 }
 0x33e   : > { %2100 = vmatmul.mubr.f32.gmra.mrb[36].mxu0 %v8030_v25  ;;  %3032 = vmatmul.mubr.f32.gmra.mrb[2].mxu1 %v8120_v8 }
 0x33f   : > { %2105 = vmatprep.mubr.f32.mxu0 %v7854_v20  ;;  %3037 = vmatprep.mubr.f32.mxu1 %v7854_v20 }
 0x342   : > { %2108 = vmatmul.mubr.f32.gmra.mrb[38].mxu0 %v8034_v28  ;;  %3039 = vmatmul.mubr.f32.gmra.mrb[4].mxu1 %v8121_v2 }
 0x343   : > { %2113 = vmatprep.mubr.f32.mxu0 %v7854_v20  ;;  %3044 = vmatprep.mubr.f32.mxu1 %v7854_v20 }
 0x346   : > { %2116 = vmatmul.mubr.f32.gmra.mrb[40].mxu0 %v8040_v48  ;;  %3046 = vmatmul.mubr.f32.gmra.mrb[6].mxu1 %v8122_v18 }
 0x347   : > { %2121 = vmatprep.mubr.f32.mxu0 %v7854_v20  ;;  %3051 = vmatprep.mubr.f32.mxu1 %v7854_v20 }
 0x34a   : > { %2124 = vmatmul.mubr.f32.gmra.mrb[42].mxu0 %v8046_v38  ;;  %3053 = vmatmul.mubr.f32.gmra.mrb[8].mxu1 %v8123_v12 }
 0x34b   : > { %2129 = vmatprep.mubr.f32.mxu0 %v7854_v20  ;;  %3058 = vmatprep.mubr.f32.mxu1 %v7854_v20 }
 0x34e   : > { %2132 = vmatmul.mubr.f32.gmra.mrb[44].mxu0 %v6403_v26  ;;  %3060 = vmatmul.mubr.f32.gmra.mrb[10].mxu1 %v8124_v33 }
 0x34f   : > { %2137 = vmatprep.mubr.f32.mxu0 %v7854_v20  ;;  %3065 = vmatprep.mubr.f32.mxu1 %v7854_v20 }
 0x352   : > { %2140 = vmatmul.mubr.f32.gmra.mrb[46].mxu0 %v6456_v13  ;;  %3067 = vmatmul.mubr.f32.gmra.mrb[12].mxu1 %v8125_v21 }
 0x353   : > { %2145 = vmatprep.mubr.f32.mxu0 %v7854_v20  ;;  %3072 = vmatprep.mubr.f32.mxu1 %v7854_v20 }
 0x356   : > { %2148 = vmatmul.mubr.f32.gmra.mrb[48].mxu0 %v6492_v5  ;;  %3074 = vmatmul.mubr.f32.gmra.mrb[14].mxu1 %v8126_v45 }
 0x357   : > { %2153 = vmatprep.mubr.f32.mxu0 %v7854_v20  ;;  %3079 = vmatprep.mubr.f32.mxu1 %v7854_v20 }
 0x35a   : > { %2156 = vmatmul.mubr.f32.gmra.mrb[50].mxu0 %v6535_v10  ;;  %3081 = vmatmul.mubr.f32.gmra.mrb[16].mxu1 %v8127_v54 }
 0x35b   : > { %2161 = vmatprep.mubr.f32.mxu0 %v7854_v20  ;;  %3086 = vmatprep.mubr.f32.mxu1 %v7854_v20 }
 0x35e   : > { %2164 = vmatmul.mubr.f32.gmra.mrb[52].mxu0 %v6569_v4  ;;  %3088 = vmatmul.mubr.f32.gmra.mrb[18].mxu1 %v8128_v7 }
 0x35f   : > { %2169 = vmatprep.mubr.f32.mxu0 %v7854_v20  ;;  %3093 = vmatprep.mubr.f32.mxu1 %v7854_v20 }
 0x362   : > { %2172 = vmatmul.mubr.f32.gmra.mrb[54].mxu0 %v6594_v29  ;;  %3095 = vmatmul.mubr.f32.gmra.mrb[20].mxu1 %v8129_v37 }
 0x363   : > { %2177 = vmatprep.mubr.f32.mxu0 %v7854_v20  ;;  %3100 = vmatprep.mubr.f32.mxu1 %v7854_v20 }
 0x366   : > { %2180 = vmatmul.mubr.f32.gmra.mrb[56].mxu0 %v6611_v46  ;;  %3102 = vmatmul.mubr.f32.gmra.mrb[22].mxu1 %v8130_v15 }
 0x367   : > { %2185 = vmatprep.mubr.f32.mxu0 %v7854_v20  ;;  %3204 = vmatprep.mubr.f32.mxu1 %v7854_v20 }
 0x36a   : > { %2188 = vmatmul.mubr.f32.gmra.mrb[58].mxu0 %v6640_v42  ;;  %3206 = vmatmul.mubr.f32.vlgmr.msra.gmra.mrb[24].mxu1 %v8071_v34 }
 0x36b   : > { %2193 = vmatprep.mubr.f32.mxu0 %v7854_v20  ;;  %3211 = vmatprep.mubr.f32.mxu1 %v7854_v20 }
 0x36e   : > { %2196 = vmatmul.mubr.f32.gmra.mrb[60].mxu0 %v8064_v63  ;;  %3213 = vmatmul.mubr.f32.gmra.mrb[26].mxu1 %v8074_v9 }
 0x36f   : > { %2201 = vmatprep.mubr.f32.mxu0 %v7854_v20  ;;  %3218 = vmatprep.mubr.f32.mxu1 %v7854_v20 }
 0x372   : > { %2204 = vmatmul.mubr.f32.gmra.mrb[62].mxu0 %v8067_v43  ;;  %3220 = vmatmul.mubr.f32.gmra.mrb[28].mxu1 %v8077_v62 }
 0x373   : > { %2209 = vmatprep.mubr.f32.mxu0 %v7854_v20  ;;  %3225 = vmatprep.mubr.f32.mxu1 %v7854_v20 }
 0x376   : > { %2212 = vmatmul.mubr.f32.gmra.mrb[64].mxu0 %v6686_v35  ;;  %3227 = vmatmul.mubr.f32.gmra.mrb[30].mxu1 %v8080_v30 }
 0x377   : > { %2217 = vmatprep.mubr.f32.mxu0 %v7854_v20  ;;  %3232 = vmatprep.mubr.f32.mxu1 %v7854_v20 }
 0x37a   : > { %2220 = vmatmul.mubr.f32.gmra.mrb[66].mxu0 %v6699_v58  ;;  %3234 = vmatmul.mubr.f32.gmra.mrb[32].mxu1 %v8083_v44 }
 0x37b   : > { %2225 = vmatprep.mubr.f32.mxu0 %v7854_v20  ;;  %3239 = vmatprep.mubr.f32.mxu1 %v7854_v20 }
 0x37e   : > { %2228 = vmatmul.mubr.f32.gmra.mrb[68].mxu0 %v6726_v17  ;;  %3241 = vmatmul.mubr.f32.gmra.mrb[34].mxu1 %v8086_v60 }
 0x37f   : > { %2233 = vmatprep.mubr.f32.mxu0 %v7854_v20  ;;  %3246 = vmatprep.mubr.f32.mxu1 %v7854_v20 }
 0x382   : > { %2236 = vmatmul.mubr.f32.gmra.mrb[70].mxu0 %v6747_v52  ;;  %3248 = vmatmul.mubr.f32.gmra.mrb[36].mxu1 %v8089_v41 }
 0x383   : > { %3253 = vmatprep.mubr.f32.mxu1 %v7854_v20 }
 0x386   : > { %3255 = vmatmul.mubr.f32.gmra.mrb[38].mxu1 %v8092_v55 }
 0x387   : > { %3260 = vmatprep.mubr.f32.mxu1 %v7854_v20 }
 0x38a   : > { %3262 = vmatmul.mubr.f32.gmra.mrb[40].mxu1 %v8094_v1 }
 0x38b   : > { %3267 = vmatprep.mubr.f32.mxu1 %v7854_v20 }
 0x38e   : > { %3269 = vmatmul.mubr.f32.gmra.mrb[42].mxu1 %v8095_v32 }
 0x38f   : > { %3274 = vmatprep.mubr.f32.mxu1 %v7854_v20 }
 0x392   : > { %3276 = vmatmul.mubr.f32.gmra.mrb[44].mxu1 %v8096_v50 }
 0x393   : > { %3281 = vmatprep.mubr.f32.mxu1 %v7854_v20 }
 0x396   : > { %3283 = vmatmul.mubr.f32.gmra.mrb[46].mxu1 %v8097_v14 }
 0x397   : > { %3288 = vmatprep.mubr.f32.mxu1 %v7854_v20 }
 0x39a   : > { %3290 = vmatmul.mubr.f32.gmra.mrb[48].mxu1 %v8098_v47 }
 0x39b   : > { %3295 = vmatprep.mubr.f32.mxu1 %v7854_v20 }
 0x39e   : > { %3297 = vmatmul.mubr.f32.gmra.mrb[50].mxu1 %v8099_v53 }
 0x39f   : > { %3302 = vmatprep.mubr.f32.mxu1 %v7854_v20 }
 0x3a2   : > { %3304 = vmatmul.mubr.f32.gmra.mrb[52].mxu1 %v8102_v39 }
 0x3a3   : > { %3309 = vmatprep.mubr.f32.mxu1 %v7854_v20 }
 0x3a6   : > { %3311 = vmatmul.mubr.f32.gmra.mrb[54].mxu1 %v8105_v24 }
 0x3a7   : > { %3316 = vmatprep.mubr.f32.mxu1 %v7854_v20 }
 0x3aa   : > { %3318 = vmatmul.mubr.f32.gmra.mrb[56].mxu1 %v8108_v31 }
 0x3ab   : > { %3323 = vmatprep.mubr.f32.mxu1 %v7854_v20 }
 0x3ae   : > { %3325 = vmatmul.mubr.f32.gmra.mrb[58].mxu1 %v8111_v59 }
 0x3af   : > { %3330 = vmatprep.mubr.f32.mxu1 %v7854_v20 }
 0x3b2   : > { %3332 = vmatmul.mubr.f32.gmra.mrb[60].mxu1 %v6707_v6 }
 0x3b3   : > { %3337 = vmatprep.mubr.f32.mxu1 %v7854_v20 }
 0x3b6   : > { %3339 = vmatmul.mubr.f32.gmra.mrb[62].mxu1 %v6728_v57 }
 0x3b7   : > { %3344 = vmatprep.mubr.f32.mxu1 %v7854_v20 }
 0x3ba   : > { %3346 = vmatmul.mubr.f32.gmra.mrb[0].mxu1 %v8118_v40 }
 0x3bb   : > { %3351 = vmatprep.mubr.f32.mxu1 %v7854_v20 }
 0x3be   : > { %3353 = vmatmul.mubr.f32.gmra.mrb[2].mxu1 %v8120_v8 }
 0x3bf   : > { %3358 = vmatprep.mubr.f32.mxu1 %v7854_v20 }
 0x3c2   : > { %3360 = vmatmul.mubr.f32.gmra.mrb[4].mxu1 %v8121_v2 }
 0x3c3   : > { %3365 = vmatprep.mubr.f32.mxu1 %v7854_v20 }
 0x3c6   : > { %3367 = vmatmul.mubr.f32.gmra.mrb[6].mxu1 %v8122_v18 }
 0x3c7   : > { %3372 = vmatprep.mubr.f32.mxu1 %v7854_v20 }
 0x3ca   : > { %3374 = vmatmul.mubr.f32.gmra.mrb[8].mxu1 %v8123_v12 }
 0x3cb   : > { %3379 = vmatprep.mubr.f32.mxu1 %v7854_v20 }
 0x3ce   : > { %3381 = vmatmul.mubr.f32.gmra.mrb[10].mxu1 %v8124_v33  ;;  %v4748_v33 = vld [vmem:[%s5229_s25] sm:$0xff] }
 0x3cf   : > { %3386 = vmatprep.mubr.f32.mxu1 %v7854_v20 }
 0x3d2   : > { %3388 = vmatmul.mubr.f32.gmra.mrb[12].mxu1 %v8125_v21 }
 0x3d3   : > { %3393 = vmatprep.mubr.f32.mxu1 %v7854_v20 }
 0x3d6   : > { %3395 = vmatmul.mubr.f32.gmra.mrb[14].mxu1 %v8126_v45  ;;  %v4749_v45 = vld [vmem:[%s5229_s25 + $0x8] sm:$0xff] }
 0x3d7   : > { %3400 = vmatprep.mubr.f32.mxu1 %v7854_v20 }
 0x3d9   : > { %v7231_v26 = vpop.f32.mrb[72].mxu0 }
 0x3da   : > { %v7233_v13 = vpop.f32.mrb[73].mxu0  ;;  %3402 = vmatmul.mubr.f32.gmra.mrb[16].mxu1 %v8127_v54 }
 0x3db   : > { %3407 = vmatprep.mubr.f32.mxu1 %v7854_v20 }
 0x3dd   : > { %v7237_v5 = vpop.f32.mrb[74].mxu0 }
 0x3de   : > { %v7239_v4 = vpop.f32.mrb[75].mxu0  ;;  %3409 = vmatmul.mubr.f32.gmra.mrb[18].mxu1 %v8128_v7 }
 0x3df   : > { %3414 = vmatprep.mubr.f32.mxu1 %v7854_v20 }
 0x3e1   : > { %v7243_v10 = vpop.f32.mrb[76].mxu0 }
 0x3e2   : > { %v7245_v29 = vpop.f32.mrb[77].mxu0  ;;  %3416 = vmatmul.mubr.f32.gmra.mrb[20].mxu1 %v8129_v37 }
 0x3e3   : > { %3421 = vmatprep.mubr.f32.mxu1 %v7854_v20 }
 0x3e5   : > { %v7249_v46 = vpop.f32.mrb[78].mxu0 }
 0x3e6   : > { %v7251_v35 = vpop.f32.mrb[79].mxu0  ;;  %3423 = vmatmul.mubr.f32.gmra.mrb[22].mxu1 %v8130_v15 }
 0x3e9   : > { %v7254_v42 = vpop.f32.mrb[80].mxu0 }
 0x3ea   : > { %v7256_v58 = vpop.f32.mrb[81].mxu0 }
 0x3ed   : > { %v7258_v6 = vpop.f32.mrb[82].mxu0 }
 0x3ee   : > { %v7260_v51 = vpop.f32.mrb[83].mxu0 }
 0x3f1   : > { %v7262_v17 = vpop.f32.mrb[84].mxu0 }
 0x3f2   : > { %v7264_v57 = vpop.f32.mrb[85].mxu0 }
 0x3f5   : > { %v7266_v25 = vpop.f32.mrb[86].mxu0 }
 0x3f6   : > { %v7268_v20 = vpop.f32.mrb[87].mxu0 }
 0x3f9   : > { %v7270_v52 = vpop.f32.mrb[88].mxu0 }
 0x3fa   : > { %v7272_v28 = vpop.f32.mrb[89].mxu0 }
 0x3fd   : > { %v7274_v48 = vpop.f32.mrb[90].mxu0 }
 0x3fe   : > { %v7276_v38 = vpop.f32.mrb[91].mxu0 }
 0x401   : > { %v7278_v63 = vpop.f32.mrb[92].mxu0 }
 0x402   : > { %8132 = vst [vmem:[#allocation32_spill] sm:$0xff] %v7278_v63  ;;  %v7280_v43 = vpop.f32.mrb[93].mxu0 }
 0x403   : > { %8133 = vst [vmem:[#allocation33_spill] sm:$0xff] %v7280_v43 }
 0x405   : > { %v7282_v34 = vpop.f32.mrb[94].mxu0 }
 0x406   : > { %8134 = vst [vmem:[#allocation35_spill] sm:$0xff] %v7282_v34  ;;  %v7284_v9 = vpop.f32.mrb[95].mxu0 }
 0x407   : > { %8135 = vst [vmem:[#allocation37_spill] sm:$0xff] %v7284_v9  ;;  %v4750_v9 = vld [vmem:[%s5229_s25 + $0x10] sm:$0xff] }
 0x409   : > { %v2085_v62 = vpop.f32.mrb[32].mxu0 }
 0x40a   : > { %v2087_v30 = vpop.f32.mrb[33].mxu0 }
 0x40d   : > { %v2093_v44 = vpop.f32.mrb[34].mxu0 }
 0x40e   : > { %v2095_v60 = vpop.f32.mrb[35].mxu0 }
 0x411   : > { %v2101_v41 = vpop.f32.mrb[36].mxu0 }
 0x412   : > { %v2103_v55 = vpop.f32.mrb[37].mxu0 }
 0x415   : > { %v7286_v1 = vpop.f32.mrb[38].mxu0 }
 0x416   : > { %v7288_v32 = vpop.f32.mrb[39].mxu0 }
 0x419   : > { %v7290_v50 = vpop.f32.mrb[40].mxu0 }
 0x41a   : > { %v7292_v14 = vpop.f32.mrb[41].mxu0 }
 0x41d   : > { %v7294_v47 = vpop.f32.mrb[42].mxu0 }
 0x41e   : > { %v7296_v53 = vpop.f32.mrb[43].mxu0 }
 0x421   : > { %v7298_v39 = vpop.f32.mrb[44].mxu0 }
 0x422   : > { %v7300_v24 = vpop.f32.mrb[45].mxu0 }
 0x425   : > { %v7302_v56 = vpop.f32.mrb[46].mxu0 }
 0x426   : > { %v7304_v22 = vpop.f32.mrb[47].mxu0 }
 0x429   : > { %v7306_v31 = vpop.f32.mrb[48].mxu0 }
 0x42a   : > { %v7308_v36 = vpop.f32.mrb[49].mxu0 }
 0x42d   : > { %v7310_v61 = vpop.f32.mrb[50].mxu0 }
 0x42e   : > { %v7312_v59 = vpop.f32.mrb[51].mxu0 }
 0x431   : > { %v7314_v49 = vpop.f32.mrb[52].mxu0 }
 0x432   : > { %v7316_v19 = vpop.f32.mrb[53].mxu0 }
 0x435   : > { %v7318_v11 = vpop.f32.mrb[54].mxu0 }
 0x436   : > { %v7320_v23 = vpop.f32.mrb[55].mxu0 }
 0x439   : > { %v7322_v27 = vpop.f32.mrb[56].mxu0 }
 0x43a   : > { %v7324_v3 = vpop.f32.mrb[57].mxu0 }
 0x43d   : > { %v7326_v40 = vpop.f32.mrb[58].mxu0  ;;  %v3207_v0 = vpop.f32.mrb[24].mxu1 }
 0x43e   : > { %v4334_v8 = vadd.f32 %v3207_v0, %v2085_v62  ;;  %v7328_v2 = vpop.f32.mrb[59].mxu0  ;;  %v3209_v18 = vpop.f32.mrb[25].mxu1 }
 0x43f   : > { %v4335_v12 = vadd.f32 %v3209_v18, %v2087_v30 }
 0x440   : > { %3429 = vst [vmem:[%s7332_s24] sm:$0xff] %v4334_v8  ;;  %v3493_v21 = vsub.f32 %v4334_v8, %v4748_v33  ;;  %v4751_v8 = vld [vmem:[%s5229_s25 + $0x18] sm:$0xff] }
 0x441   : > { %3430 = vst [vmem:[%s7332_s24 + $0x8] sm:$0xff] %v4335_v12  ;;  %v3494_v54 = vsub.f32 %v4335_v12, %v4749_v45  ;;  %v7338_v7 = vpop.f32.mrb[60].mxu0  ;;  %v3214_v37 = vpop.f32.mrb[26].mxu1 }
 0x442   : > { %v3557_v15 = vmul.f32 %v3493_v21, %v3493_v21  ;;  %v4336_v16 = vadd.f32 %v3214_v37, %v2093_v44  ;;  %v7340_v62 = vpop.f32.mrb[61].mxu0  ;;  %v3216_v30 = vpop.f32.mrb[27].mxu1 }
 0x443   : > { %v3558_v0 = vmul.f32 %v3494_v54, %v3494_v54  ;;  %v4337_v18 = vadd.f32 %v3216_v30, %v2095_v60 }
 0x444   : > { %3431 = vst [vmem:[%s7332_s24 + $0x10] sm:$0xff] %v4336_v16  ;;  %v3495_v34 = vsub.f32 %v4336_v16, %v4750_v9  ;;  %v4752_v9 = vld [vmem:[%s5229_s25 + $0x20] sm:$0xff] }
 0x445   : > { %3432 = vst [vmem:[%s7332_s24 + $0x18] sm:$0xff] %v4337_v18  ;;  %v3496_v12 = vsub.f32 %v4337_v18, %v4751_v8  ;;  %v7346_v33 = vpop.f32.mrb[62].mxu0  ;;  %v3221_v45 = vpop.f32.mrb[28].mxu1  ;;  %v3621_v21 = vadd.f32 %v3558_v0, %v3557_v15  ;;  %v4753_v18 = vld [vmem:[%s5229_s25 + $0x28] sm:$0xff] }
 0x446   : > { %v3559_v44 = vmul.f32 %v3495_v34, %v3495_v34  ;;  %v4338_v37 = vadd.f32 %v3221_v45, %v2101_v41  ;;  %v7348_v43 = vpop.f32.mrb[63].mxu0  ;;  %v3223_v54 = vpop.f32.mrb[29].mxu1 }
 0x447   : > { %v3560_v60 = vmul.f32 %v3496_v12, %v3496_v12  ;;  %v4339_v30 = vadd.f32 %v3223_v54, %v2103_v55  ;;  %3622 = vadd.xlane.f32.xlu0 %v3621_v21 }
 0x448   : > { %3433 = vst [vmem:[%s7332_s24 + $0x20] sm:$0xff] %v4338_v37  ;;  %v3497_v16 = vsub.f32 %v4338_v37, %v4752_v9  ;;  %v4754_v37 = vld [vmem:[%s5229_s25 + $0x30] sm:$0xff] }
 0x449   : > { %3434 = vst [vmem:[%s7332_s24 + $0x28] sm:$0xff] %v4339_v30  ;;  %v3498_v8 = vsub.f32 %v4339_v30, %v4753_v18  ;;  %v7354_v63 = vpop.f32.mrb[64].mxu0  ;;  %v3228_v34 = vpop.f32.mrb[30].mxu1  ;;  %v3624_v41 = vadd.f32 %v3560_v60, %v3559_v44  ;;  %v4755_v30 = vld [vmem:[%s5229_s25 + $0x38] sm:$0xff] }
 0x44a   : > { %v3561_v15 = vmul.f32 %v3497_v16, %v3497_v16  ;;  %v4340_v0 = vadd.f32 %v3228_v34, %v7286_v1  ;;  %v7357_v12 = vpop.f32.mrb[65].mxu0  ;;  %v3230_v55 = vpop.f32.mrb[31].mxu1 }
 0x44b   : > { %v3562_v45 = vmul.f32 %v3498_v8, %v3498_v8  ;;  %v4341_v21 = vadd.f32 %v3230_v55, %v7288_v32  ;;  %3625 = vadd.xlane.f32.xlu1 %v3624_v41 }
 0x44c   : > { %3435 = vst [vmem:[%s7332_s24 + $0x30] sm:$0xff] %v4340_v0  ;;  %v3499_v54 = vsub.f32 %v4340_v0, %v4754_v37  ;;  %v4756_v0 = vld [vmem:[%s5229_s25 + $0x40] sm:$0xff] }
 0x44d   : > { %3436 = vst [vmem:[%s7332_s24 + $0x38] sm:$0xff] %v4341_v21  ;;  %v3500_v44 = vsub.f32 %v4341_v21, %v4755_v30  ;;  %v7364_v60 = vpop.f32.mrb[66].mxu0  ;;  %v3235_v1 = vpop.f32.mrb[32].mxu1  ;;  %v3627_v9 = vadd.f32 %v3562_v45, %v3561_v15  ;;  %v4757_v21 = vld [vmem:[%s5229_s25 + $0x48] sm:$0xff] }
 0x44e   : > { %v3563_v16 = vmul.f32 %v3499_v54, %v3499_v54  ;;  %v4342_v18 = vadd.f32 %v3235_v1, %v7290_v50  ;;  %v7367_v8 = vpop.f32.mrb[67].mxu0  ;;  %v3237_v32 = vpop.f32.mrb[33].mxu1 }
 0x44f   : > { %v3564_v34 = vmul.f32 %v3500_v44, %v3500_v44  ;;  %v4343_v41 = vadd.f32 %v3237_v32, %v7292_v14  ;;  %3628 = vadd.xlane.f32.xlu0 %v3627_v9 }
 0x450   : > { %3437 = vst [vmem:[%s7332_s24 + $0x40] sm:$0xff] %v4342_v18  ;;  %v3501_v55 = vsub.f32 %v4342_v18, %v4756_v0  ;;  %v4758_v18 = vld [vmem:[%s5229_s25 + $0x50] sm:$0xff] }
 0x451   : > { %3438 = vst [vmem:[%s7332_s24 + $0x48] sm:$0xff] %v4343_v41  ;;  %v3502_v15 = vsub.f32 %v4343_v41, %v4757_v21  ;;  %v7374_v45 = vpop.f32.mrb[68].mxu0  ;;  %v3242_v50 = vpop.f32.mrb[34].mxu1  ;;  %v3630_v37 = vadd.f32 %v3564_v34, %v3563_v16  ;;  %v4759_v41 = vld [vmem:[%s5229_s25 + $0x58] sm:$0xff] }
 0x452   : > { %v3565_v54 = vmul.f32 %v3501_v55, %v3501_v55  ;;  %v4344_v30 = vadd.f32 %v3242_v50, %v7294_v47  ;;  %v7377_v44 = vpop.f32.mrb[69].mxu0  ;;  %v3244_v14 = vpop.f32.mrb[35].mxu1 }
 0x453   : > { %v3566_v1 = vmul.f32 %v3502_v15, %v3502_v15  ;;  %v4345_v9 = vadd.f32 %v3244_v14, %v7296_v53  ;;  %3631 = vadd.xlane.f32.xlu0 %v3630_v37 }
 0x454   : > { %3439 = vst [vmem:[%s7332_s24 + $0x50] sm:$0xff] %v4344_v30  ;;  %v3503_v32 = vsub.f32 %v4344_v30, %v4758_v18  ;;  %v4760_v30 = vld [vmem:[%s5229_s25 + $0x60] sm:$0xff] }
 0x455   : > { %3440 = vst [vmem:[%s7332_s24 + $0x58] sm:$0xff] %v4345_v9  ;;  %v3504_v16 = vsub.f32 %v4345_v9, %v4759_v41  ;;  %v7384_v34 = vpop.f32.mrb[70].mxu0  ;;  %v3249_v47 = vpop.f32.mrb[36].mxu1  ;;  %v3633_v0 = vadd.f32 %v3566_v1, %v3565_v54  ;;  %v4761_v9 = vld [vmem:[%s5229_s25 + $0x68] sm:$0xff] }
 0x456   : > { %v3567_v55 = vmul.f32 %v3503_v32, %v3503_v32  ;;  %v4346_v21 = vadd.f32 %v3249_v47, %v7298_v39  ;;  %v7387_v15 = vpop.f32.mrb[71].mxu0  ;;  %v3251_v53 = vpop.f32.mrb[37].mxu1  ;;  %v4762_v47 = vld [vmem:[%s5229_s25 + $0x70] sm:$0xff] }
 0x457   : > { %v3568_v50 = vmul.f32 %v3504_v16, %v3504_v16  ;;  %v4347_v37 = vadd.f32 %v3251_v53, %v7300_v24  ;;  %3634 = vadd.xlane.f32.xlu1 %v3633_v0 }
 0x458   : > { %3441 = vst [vmem:[%s7332_s24 + $0x60] sm:$0xff] %v4346_v21  ;;  %v3505_v14 = vsub.f32 %v4346_v21, %v4760_v30  ;;  %v4763_v21 = vld [vmem:[%s5229_s25 + $0x78] sm:$0xff] }
 0x459   : > { %3442 = vst [vmem:[%s7332_s24 + $0x68] sm:$0xff] %v4347_v37  ;;  %v3506_v54 = vsub.f32 %v4347_v37, %v4761_v9  ;;  %v3256_v1 = vpop.f32.mrb[38].mxu1  ;;  %v3636_v18 = vadd.f32 %v3568_v50, %v3567_v55  ;;  %v4764_v9 = vld [vmem:[%s5229_s25 + $0x80] sm:$0xff] }
 0x45a   : > { %v3569_v39 = vmul.f32 %v3505_v14, %v3505_v14  ;;  %v4348_v32 = vadd.f32 %v3256_v1, %v7302_v56  ;;  %v3258_v41 = vpop.f32.mrb[39].mxu1  ;;  %v4765_v1 = vld [vmem:[%s5229_s25 + $0x88] sm:$0xff] }
 0x45b   : > { %v3570_v16 = vmul.f32 %v3506_v54, %v3506_v54  ;;  %v4349_v24 = vadd.f32 %v3258_v41, %v7304_v22  ;;  %3637 = vadd.xlane.f32.xlu0 %v3636_v18 }
 0x45c   : > { %3443 = vst [vmem:[%s7332_s24 + $0x70] sm:$0xff] %v4348_v32  ;;  %v3507_v0 = vsub.f32 %v4348_v32, %v4762_v47  ;;  %v4766_v47 = vld [vmem:[%s5229_s25 + $0x90] sm:$0xff] }
 0x45d   : > { %3444 = vst [vmem:[%s7332_s24 + $0x78] sm:$0xff] %v4349_v24  ;;  %v3508_v53 = vsub.f32 %v4349_v24, %v4763_v21  ;;  %v3263_v37 = vpop.f32.mrb[40].mxu1  ;;  %v3639_v55 = vadd.f32 %v3570_v16, %v3569_v39  ;;  %v4767_v21 = vld [vmem:[%s5229_s25 + $0x98] sm:$0xff] }
 0x45e   : > { %v3571_v50 = vmul.f32 %v3507_v0, %v3507_v0  ;;  %v4350_v56 = vadd.f32 %v3263_v37, %v7306_v31  ;;  %v3265_v30 = vpop.f32.mrb[41].mxu1 }
 0x45f   : > { %v3572_v14 = vmul.f32 %v3508_v53, %v3508_v53  ;;  %v4351_v22 = vadd.f32 %v3265_v30, %v7308_v36  ;;  %3640 = vadd.xlane.f32.xlu1 %v3639_v55 }
 0x460   : > { %3445 = vst [vmem:[%s7332_s24 + $0x80] sm:$0xff] %v4350_v56  ;;  %v3509_v54 = vsub.f32 %v4350_v56, %v4764_v9  ;;  %v4769_v9 = vld [vmem:[%s5229_s25 + $0xa8] sm:$0xff] }
 0x461   : > { %3446 = vst [vmem:[%s7332_s24 + $0x88] sm:$0xff] %v4351_v22  ;;  %v3510_v18 = vsub.f32 %v4351_v22, %v4765_v1  ;;  %v3270_v32 = vpop.f32.mrb[42].mxu1  ;;  %v3642_v39 = vadd.f32 %v3572_v14, %v3571_v50  ;;  %v4768_v14 = vld [vmem:[%s5229_s25 + $0xa0] sm:$0xff] }
 0x462   : > { %v3573_v41 = vmul.f32 %v3509_v54, %v3509_v54  ;;  %v4352_v31 = vadd.f32 %v3270_v32, %v7310_v61  ;;  %v3272_v16 = vpop.f32.mrb[43].mxu1 }
 0x463   : > { %v3574_v24 = vmul.f32 %v3510_v18, %v3510_v18  ;;  %v4353_v36 = vadd.f32 %v3272_v16, %v7312_v59  ;;  %3643 = vadd.xlane.f32.xlu0 %v3642_v39 }
 0x464   : > { %3447 = vst [vmem:[%s7332_s24 + $0x90] sm:$0xff] %v4352_v31  ;;  %v3511_v0 = vsub.f32 %v4352_v31, %v4766_v47  ;;  %v4770_v31 = vld [vmem:[%s5229_s25 + $0xb0] sm:$0xff] }
 0x465   : > { %3448 = vst [vmem:[%s7332_s24 + $0x98] sm:$0xff] %v4353_v36  ;;  %v3512_v53 = vsub.f32 %v4353_v36, %v4767_v21  ;;  %v3277_v37 = vpop.f32.mrb[44].mxu1  ;;  %v3645_v55 = vadd.f32 %v3574_v24, %v3573_v41  ;;  %v4771_v24 = vld [vmem:[%s5229_s25 + $0xb8] sm:$0xff] }
 0x466   : > { %v3575_v50 = vmul.f32 %v3511_v0, %v3511_v0  ;;  %v4354_v61 = vadd.f32 %v3277_v37, %v7314_v49  ;;  %v3279_v56 = vpop.f32.mrb[45].mxu1 }
 0x467   : > { %v3576_v30 = vmul.f32 %v3512_v53, %v3512_v53  ;;  %v4355_v59 = vadd.f32 %v3279_v56, %v7316_v19  ;;  %3646 = vadd.xlane.f32.xlu1 %v3645_v55  ;;  %v4772_v55 = vld [vmem:[%s5229_s25 + $0xc0] sm:$0xff] }
 0x468   : > { %3449 = vst [vmem:[%s7332_s24 + $0xa0] sm:$0xff] %v4354_v61  ;;  %v3513_v22 = vsub.f32 %v4354_v61, %v4768_v14  ;;  %v4773_v61 = vld [vmem:[%s5229_s25 + $0xc8] sm:$0xff] }
 0x469   : > { %3450 = vst [vmem:[%s7332_s24 + $0xa8] sm:$0xff] %v4355_v59  ;;  %v3514_v54 = vsub.f32 %v4355_v59, %v4769_v9  ;;  %v3284_v1 = vpop.f32.mrb[46].mxu1  ;;  %v3648_v18 = vadd.f32 %v3576_v30, %v3575_v50 }
 0x46a   : > { %v3577_v32 = vmul.f32 %v3513_v22, %v3513_v22  ;;  %v4356_v49 = vadd.f32 %v3284_v1, %v7318_v11  ;;  %v3286_v39 = vpop.f32.mrb[47].mxu1 }
 0x46b   : > { %v3578_v41 = vmul.f32 %v3514_v54, %v3514_v54  ;;  %v4357_v19 = vadd.f32 %v3286_v39, %v7320_v23  ;;  %3649 = vadd.xlane.f32.xlu0 %v3648_v18  ;;  %v4774_v54 = vld [vmem:[%s5229_s25 + $0xd0] sm:$0xff]  ;;  %v4775_v18 = vld [vmem:[%s5229_s25 + $0xd8] sm:$0xff] }
 0x46c   : > { %3451 = vst [vmem:[%s7332_s24 + $0xb0] sm:$0xff] %v4356_v49  ;;  %v3515_v16 = vsub.f32 %v4356_v49, %v4770_v31 }
 0x46d   : > { %3452 = vst [vmem:[%s7332_s24 + $0xb8] sm:$0xff] %v4357_v19  ;;  %v3516_v36 = vsub.f32 %v4357_v19, %v4771_v24  ;;  %v3291_v47 = vpop.f32.mrb[48].mxu1  ;;  %v3651_v0 = vadd.f32 %v3578_v41, %v3577_v32 }
 0x46e   : > { %v3579_v21 = vmul.f32 %v3515_v16, %v3515_v16  ;;  %v4358_v11 = vadd.f32 %v3291_v47, %v7322_v27  ;;  %v3293_v53 = vpop.f32.mrb[49].mxu1  ;;  %v4776_v16 = vld [vmem:[%s5229_s25 + $0xe0] sm:$0xff] }
 0x46f   : > { %v3580_v37 = vmul.f32 %v3516_v36, %v3516_v36  ;;  %v4359_v23 = vadd.f32 %v3293_v53, %v7324_v3  ;;  %3652 = vadd.xlane.f32.xlu1 %v3651_v0  ;;  %v4777_v36 = vld [vmem:[%s5229_s25 + $0xe8] sm:$0xff] }
 0x470   : > { %3453 = vst [vmem:[%s7332_s24 + $0xc0] sm:$0xff] %v4358_v11  ;;  %v3517_v50 = vsub.f32 %v4358_v11, %v4772_v55 }
 0x471   : > { %3454 = vst [vmem:[%s7332_s24 + $0xc8] sm:$0xff] %v4359_v23  ;;  %v3518_v56 = vsub.f32 %v4359_v23, %v4773_v61  ;;  %v3298_v30 = vpop.f32.mrb[50].mxu1  ;;  %v3654_v59 = vadd.f32 %v3580_v37, %v3579_v21  ;;  %v4778_v23 = vld [vmem:[%s5229_s25 + $0xf0] sm:$0xff] }
 0x472   : > { %v3581_v14 = vmul.f32 %v3517_v50, %v3517_v50  ;;  %v4360_v27 = vadd.f32 %v3298_v30, %v7326_v40  ;;  %v3300_v22 = vpop.f32.mrb[51].mxu1  ;;  %v4779_v50 = vld [vmem:[%s5229_s25 + $0xf8] sm:$0xff] }
 0x473   : > { %v3582_v9 = vmul.f32 %v3518_v56, %v3518_v56  ;;  %v4361_v3 = vadd.f32 %v3300_v22, %v7328_v2  ;;  %3655 = vadd.xlane.f32.xlu0 %v3654_v59  ;;  %v4780_v22 = vld [vmem:[%s5229_s25 + $0x100] sm:$0xff] }
 0x474   : > { %3455 = vst [vmem:[%s7332_s24 + $0xd0] sm:$0xff] %v4360_v27  ;;  %v3519_v1 = vsub.f32 %v4360_v27, %v4774_v54 }
 0x475   : > { %3456 = vst [vmem:[%s7332_s24 + $0xd8] sm:$0xff] %v4361_v3  ;;  %v3520_v32 = vsub.f32 %v4361_v3, %v4775_v18  ;;  %v3305_v49 = vpop.f32.mrb[52].mxu1  ;;  %v3657_v39 = vadd.f32 %v3582_v9, %v3581_v14  ;;  %v4781_v3 = vld [vmem:[%s5229_s25 + $0x108] sm:$0xff] }
 0x476   : > { %v3583_v41 = vmul.f32 %v3519_v1, %v3519_v1  ;;  %v4362_v40 = vadd.f32 %v3305_v49, %v7338_v7  ;;  %v3307_v19 = vpop.f32.mrb[53].mxu1 }
 0x477   : > { %v3584_v31 = vmul.f32 %v3520_v32, %v3520_v32  ;;  %v4363_v2 = vadd.f32 %v3307_v19, %v7340_v62  ;;  %3658 = vadd.xlane.f32.xlu1 %v3657_v39  ;;  %v4783_v19 = vld [vmem:[%s5229_s25 + $0x118] sm:$0xff] }
 0x478   : > { %3457 = vst [vmem:[%s7332_s24 + $0xe0] sm:$0xff] %v4362_v40  ;;  %v3521_v24 = vsub.f32 %v4362_v40, %v4776_v16 }
 0x479   : > { %3458 = vst [vmem:[%s7332_s24 + $0xe8] sm:$0xff] %v4363_v2  ;;  %v3522_v47 = vsub.f32 %v4363_v2, %v4777_v36  ;;  %v3312_v0 = vpop.f32.mrb[54].mxu1  ;;  %v3660_v21 = vadd.f32 %v3584_v31, %v3583_v41  ;;  %v4782_v41 = vld [vmem:[%s5229_s25 + $0x110] sm:$0xff] }
 0x47a   : > { %v3585_v11 = vmul.f32 %v3521_v24, %v3521_v24  ;;  %v4364_v7 = vadd.f32 %v3312_v0, %v7346_v33  ;;  %v3314_v53 = vpop.f32.mrb[55].mxu1  ;;  %v4784_v0 = vld [vmem:[%s5229_s25 + $0x120] sm:$0xff] }
 0x47b   : > { %v3586_v37 = vmul.f32 %v3522_v47, %v3522_v47  ;;  %v4365_v62 = vadd.f32 %v3314_v53, %v7348_v43  ;;  %3661 = vadd.xlane.f32.xlu0 %v3660_v21 }
 0x47c   : > { %3459 = vst [vmem:[%s7332_s24 + $0xf0] sm:$0xff] %v4364_v7  ;;  %v3523_v55 = vsub.f32 %v4364_v7, %v4778_v23 }
 0x47d   : > { %3460 = vst [vmem:[%s7332_s24 + $0xf8] sm:$0xff] %v4365_v62  ;;  %v3524_v61 = vsub.f32 %v4365_v62, %v4779_v50  ;;  %v3319_v56 = vpop.f32.mrb[56].mxu1  ;;  %v3663_v30 = vadd.f32 %v3586_v37, %v3585_v11  ;;  %v4785_v11 = vld [vmem:[%s5229_s25 + $0x128] sm:$0xff]  ;;  %v4786_v50 = vld [vmem:[%s5229_s25 + $0x130] sm:$0xff] }
 0x47e   : > { %v3587_v59 = vmul.f32 %v3523_v55, %v3523_v55  ;;  %v4366_v33 = vadd.f32 %v3319_v56, %v7354_v63  ;;  %v3321_v14 = vpop.f32.mrb[57].mxu1  ;;  %v4787_v56 = vld [vmem:[%s5229_s25 + $0x138] sm:$0xff] }
 0x47f   : > { %v3588_v27 = vmul.f32 %v3524_v61, %v3524_v61  ;;  %v4367_v43 = vadd.f32 %v3321_v14, %v7357_v12  ;;  %3664 = vadd.xlane.f32.xlu1 %v3663_v30 }
 0x480   : > { %3461 = vst [vmem:[%s7332_s24 + $0x100] sm:$0xff] %v4366_v33  ;;  %v3525_v9 = vsub.f32 %v4366_v33, %v4780_v22  ;;  %v4788_v22 = vld [vmem:[%s5229_s25 + $0x140] sm:$0xff] }
 0x481   : > { %3462 = vst [vmem:[%s7332_s24 + $0x108] sm:$0xff] %v4367_v43  ;;  %v3526_v54 = vsub.f32 %v4367_v43, %v4781_v3  ;;  %v3326_v1 = vpop.f32.mrb[58].mxu1  ;;  %v3666_v18 = vadd.f32 %v3588_v27, %v3587_v59  ;;  %v4789_v3 = vld [vmem:[%s5229_s25 + $0x148] sm:$0xff] }
 0x482   : > { %v3589_v32 = vmul.f32 %v3525_v9, %v3525_v9  ;;  %v4368_v63 = vadd.f32 %v3326_v1, %v7364_v60  ;;  %v3328_v49 = vpop.f32.mrb[59].mxu1 }
 0x483   : > { %v3590_v39 = vmul.f32 %v3526_v54, %v3526_v54  ;;  %v4369_v12 = vadd.f32 %v3328_v49, %v7367_v8  ;;  %3667 = vadd.xlane.f32.xlu0 %v3666_v18 }
 0x484   : > { %3463 = vst [vmem:[%s7332_s24 + $0x110] sm:$0xff] %v4368_v63  ;;  %v3527_v40 = vsub.f32 %v4368_v63, %v4782_v41  ;;  %v4791_v41 = vld [vmem:[%s5229_s25 + $0x158] sm:$0xff] }
 0x485   : > { %3464 = vst [vmem:[%s7332_s24 + $0x118] sm:$0xff] %v4369_v12  ;;  %v3528_v31 = vsub.f32 %v4369_v12, %v4783_v19  ;;  %v3333_v2 = vpop.f32.mrb[60].mxu1  ;;  %v3669_v16 = vadd.f32 %v3590_v39, %v3589_v32  ;;  %v4790_v39 = vld [vmem:[%s5229_s25 + $0x150] sm:$0xff] }
 0x486   : > { %v3591_v24 = vmul.f32 %v3527_v40, %v3527_v40  ;;  %v4370_v60 = vadd.f32 %v3333_v2, %v7374_v45  ;;  %v3335_v36 = vpop.f32.mrb[61].mxu1 }
 0x487   : > { %v3592_v47 = vmul.f32 %v3528_v31, %v3528_v31  ;;  %v4371_v8 = vadd.f32 %v3335_v36, %v7377_v44  ;;  %3670 = vadd.xlane.f32.xlu1 %v3669_v16 }
 0x488   : > { %3465 = vst [vmem:[%s7332_s24 + $0x120] sm:$0xff] %v4370_v60  ;;  %v3529_v21 = vsub.f32 %v4370_v60, %v4784_v0  ;;  %v4792_v60 = vld [vmem:[%s5229_s25 + $0x160] sm:$0xff] }
 0x489   : > { %3466 = vst [vmem:[%s7332_s24 + $0x128] sm:$0xff] %v4371_v8  ;;  %v3530_v7 = vsub.f32 %v4371_v8, %v4785_v11  ;;  %v3340_v53 = vpop.f32.mrb[62].mxu1  ;;  %v3672_v37 = vadd.f32 %v3592_v47, %v3591_v24  ;;  %v4793_v47 = vld [vmem:[%s5229_s25 + $0x168] sm:$0xff] }
 0x48a   : > { %v3593_v62 = vmul.f32 %v3529_v21, %v3529_v21  ;;  %v4372_v45 = vadd.f32 %v3340_v53, %v7384_v34  ;;  %v3342_v23 = vpop.f32.mrb[63].mxu1 }
 0x48b   : > { %v3594_v55 = vmul.f32 %v3530_v7, %v3530_v7  ;;  %v4373_v44 = vadd.f32 %v3342_v23, %v7387_v15  ;;  %3673 = vadd.xlane.f32.xlu0 %v3672_v37  ;;  %v4794_v37 = vld [vmem:[%s5229_s25 + $0x170] sm:$0xff] }
 0x48c   : > { %3467 = vst [vmem:[%s7332_s24 + $0x130] sm:$0xff] %v4372_v45  ;;  %v3531_v61 = vsub.f32 %v4372_v45, %v4786_v50  ;;  %v4795_v45 = vld [vmem:[%s5229_s25 + $0x178] sm:$0xff] }
 0x48d   : > { %3468 = vst [vmem:[%s7332_s24 + $0x138] sm:$0xff] %v4373_v44  ;;  %v3532_v30 = vsub.f32 %v4373_v44, %v4787_v56  ;;  %v3347_v59 = vpop.f32.mrb[0].mxu1  ;;  %v3675_v33 = vadd.f32 %v3594_v55, %v3593_v62 }
 0x48e   : > { %v3595_v14 = vmul.f32 %v3531_v61, %v3531_v61  ;;  %v4374_v34 = vadd.f32 %v3347_v59, %v7231_v26  ;;  %v3349_v27 = vpop.f32.mrb[1].mxu1 }
 0x48f   : > { %v3596_v43 = vmul.f32 %v3532_v30, %v3532_v30  ;;  %v4375_v15 = vadd.f32 %v3349_v27, %v7233_v13  ;;  %3676 = vadd.xlane.f32.xlu1 %v3675_v33  ;;  %v4796_v30 = vld [vmem:[%s5229_s25 + $0x180] sm:$0xff]  ;;  %v4797_v33 = vld [vmem:[%s5229_s25 + $0x188] sm:$0xff] }
 0x490   : > { %3469 = vst [vmem:[%s7332_s24 + $0x140] sm:$0xff] %v4374_v34  ;;  %v3533_v9 = vsub.f32 %v4374_v34, %v4788_v22 }
 0x491   : > { %3470 = vst [vmem:[%s7332_s24 + $0x148] sm:$0xff] %v4375_v15  ;;  %v3534_v54 = vsub.f32 %v4375_v15, %v4789_v3  ;;  %v3354_v1 = vpop.f32.mrb[2].mxu1  ;;  %v3678_v18 = vadd.f32 %v3596_v43, %v3595_v14 }
 0x492   : > { %v3597_v32 = vmul.f32 %v3533_v9, %v3533_v9  ;;  %v4376_v26 = vadd.f32 %v3354_v1, %v7237_v5  ;;  %v3356_v63 = vpop.f32.mrb[3].mxu1  ;;  %v4798_v9 = vld [vmem:[%s5229_s25 + $0x190] sm:$0xff] }
 0x493   : > { %v3598_v49 = vmul.f32 %v3534_v54, %v3534_v54  ;;  %v4377_v13 = vadd.f32 %v3356_v63, %v7239_v4  ;;  %3679 = vadd.xlane.f32.xlu0 %v3678_v18  ;;  %v4799_v54 = vld [vmem:[%s5229_s25 + $0x198] sm:$0xff] }
 0x494   : > { %3471 = vst [vmem:[%s7332_s24 + $0x150] sm:$0xff] %v4376_v26  ;;  %v3535_v12 = vsub.f32 %v4376_v26, %v4790_v39 }
 0x495   : > { %3472 = vst [vmem:[%s7332_s24 + $0x158] sm:$0xff] %v4377_v13  ;;  %v3536_v40 = vsub.f32 %v4377_v13, %v4791_v41  ;;  %v3361_v19 = vpop.f32.mrb[4].mxu1  ;;  %v3681_v31 = vadd.f32 %v3598_v49, %v3597_v32  ;;  %v4800_v13 = vld [vmem:[%s5229_s25 + $0x1a0] sm:$0xff] }
 0x496   : > { %v3599_v2 = vmul.f32 %v3535_v12, %v3535_v12  ;;  %v4378_v5 = vadd.f32 %v3361_v19, %v7243_v10  ;;  %v3363_v16 = vpop.f32.mrb[5].mxu1  ;;  %v4801_v12 = vld [vmem:[%s5229_s25 + $0x1a8] sm:$0xff] }
 0x497   : > { %v3600_v24 = vmul.f32 %v3536_v40, %v3536_v40  ;;  %v4379_v4 = vadd.f32 %v3363_v16, %v7245_v29  ;;  %3682 = vadd.xlane.f32.xlu1 %v3681_v31  ;;  %v4802_v16 = vld [vmem:[%s5229_s25 + $0x1b0] sm:$0xff] }
 0x498   : > { %3473 = vst [vmem:[%s7332_s24 + $0x160] sm:$0xff] %v4378_v5  ;;  %v3537_v36 = vsub.f32 %v4378_v5, %v4792_v60 }
 0x499   : > { %3474 = vst [vmem:[%s7332_s24 + $0x168] sm:$0xff] %v4379_v4  ;;  %v3538_v8 = vsub.f32 %v4379_v4, %v4793_v47  ;;  %v3368_v0 = vpop.f32.mrb[6].mxu1  ;;  %v3684_v21 = vadd.f32 %v3600_v24, %v3599_v2  ;;  %v4803_v4 = vld [vmem:[%s5229_s25 + $0x1b8] sm:$0xff] }
 0x49a   : > { %v3601_v11 = vmul.f32 %v3537_v36, %v3537_v36  ;;  %v4380_v10 = vadd.f32 %v3368_v0, %v7249_v46  ;;  %v3370_v7 = vpop.f32.mrb[7].mxu1 }
 0x49b   : > { %v3602_v53 = vmul.f32 %v3538_v8, %v3538_v8  ;;  %v4381_v29 = vadd.f32 %v3370_v7, %v7251_v35  ;;  %3685 = vadd.xlane.f32.xlu0 %v3684_v21  ;;  %v4805_v7 = vld [vmem:[%s5229_s25 + $0x1c8] sm:$0xff] }
 0x49c   : > { %3475 = vst [vmem:[%s7332_s24 + $0x170] sm:$0xff] %v4380_v10  ;;  %v3539_v62 = vsub.f32 %v4380_v10, %v4794_v37 }
 0x49d   : > { %3476 = vst [vmem:[%s7332_s24 + $0x178] sm:$0xff] %v4381_v29  ;;  %v3540_v23 = vsub.f32 %v4381_v29, %v4795_v45  ;;  %v3375_v55 = vpop.f32.mrb[8].mxu1  ;;  %v3687_v44 = vadd.f32 %v3602_v53, %v3601_v11  ;;  %v4804_v11 = vld [vmem:[%s5229_s25 + $0x1c0] sm:$0xff] }
 0x49e   : > { %v3603_v50 = vmul.f32 %v3539_v62, %v3539_v62  ;;  %v4382_v46 = vadd.f32 %v3375_v55, %v7254_v42  ;;  %v3377_v61 = vpop.f32.mrb[9].mxu1  ;;  %v4806_v55 = vld [vmem:[%s5229_s25 + $0x1d0] sm:$0xff] }
 0x49f   : > { %v3604_v56 = vmul.f32 %v3540_v23, %v3540_v23  ;;  %v4383_v35 = vadd.f32 %v3377_v61, %v7256_v58  ;;  %3688 = vadd.xlane.f32.xlu1 %v3687_v44 }
 0x4a0   : > { %3477 = vst [vmem:[%s7332_s24 + $0x180] sm:$0xff] %v4382_v46  ;;  %v3541_v59 = vsub.f32 %v4382_v46, %v4796_v30  ;;  %v8136_v30 = vld [vmem:[#allocation32_spill] sm:$0xff] }
 0x4a1   : > { %3478 = vst [vmem:[%s7332_s24 + $0x188] sm:$0xff] %v4383_v35  ;;  %v3542_v14 = vsub.f32 %v4383_v35, %v4797_v33  ;;  %v3382_v34 = vpop.f32.mrb[10].mxu1  ;;  %v3690_v27 = vadd.f32 %v3604_v56, %v3603_v50  ;;  %v4807_v50 = vld [vmem:[%s5229_s25 + $0x1d8] sm:$0xff] }
 0x4a2   : > { %v3605_v43 = vmul.f32 %v3541_v59, %v3541_v59  ;;  %v4384_v42 = vadd.f32 %v3382_v34, %v7258_v6  ;;  %v3384_v15 = vpop.f32.mrb[11].mxu1  ;;  %v4808_v34 = vld [vmem:[%s5229_s25 + $0x1e0] sm:$0xff] }
 0x4a3   : > { %v3606_v22 = vmul.f32 %v3542_v14, %v3542_v14  ;;  %v4385_v58 = vadd.f32 %v3384_v15, %v7260_v51  ;;  %3691 = vadd.xlane.f32.xlu0 %v3690_v27  ;;  %v8137_v14 = vld [vmem:[#allocation33_spill] sm:$0xff] }
 0x4a4   : > { %3479 = vst [vmem:[%s7332_s24 + $0x190] sm:$0xff] %v4384_v42  ;;  %v3543_v3 = vsub.f32 %v4384_v42, %v4798_v9  ;;  %v8138_v9 = vld [vmem:[#allocation35_spill] sm:$0xff] }
 0x4a5   : > { %3480 = vst [vmem:[%s7332_s24 + $0x198] sm:$0xff] %v4385_v58  ;;  %v3544_v1 = vsub.f32 %v4385_v58, %v4799_v54  ;;  %v3389_v18 = vpop.f32.mrb[12].mxu1  ;;  %v3693_v32 = vadd.f32 %v3606_v22, %v3605_v43  ;;  %v4809_v43 = vld [vmem:[%s5229_s25 + $0x1e8] sm:$0xff] }
 0x4a6   : > { %v3607_v26 = vmul.f32 %v3543_v3, %v3543_v3  ;;  %v4386_v6 = vadd.f32 %v3389_v18, %v7262_v17  ;;  %v3391_v63 = vpop.f32.mrb[13].mxu1  ;;  %v8139_v18 = vld [vmem:[#allocation37_spill] sm:$0xff] }
 0x4a7   : > { %v3608_v49 = vmul.f32 %v3544_v1, %v3544_v1  ;;  %v4387_v51 = vadd.f32 %v3391_v63, %v7264_v57  ;;  %3694 = vadd.xlane.f32.xlu1 %v3693_v32  ;;  %v4811_v63 = vld [vmem:[%s5229_s25 + $0x1f8] sm:$0xff] }
 0x4a8   : > { %3481 = vst [vmem:[%s7332_s24 + $0x1a0] sm:$0xff] %v4386_v6  ;;  %v3545_v39 = vsub.f32 %v4386_v6, %v4800_v13 }
 0x4a9   : > { %3482 = vst [vmem:[%s7332_s24 + $0x1a8] sm:$0xff] %v4387_v51  ;;  %v3546_v41 = vsub.f32 %v4387_v51, %v4801_v12  ;;  %v3396_v40 = vpop.f32.mrb[14].mxu1  ;;  %v3696_v19 = vadd.f32 %v3608_v49, %v3607_v26  ;;  %v4810_v26 = vld [vmem:[%s5229_s25 + $0x1f0] sm:$0xff]  ;;  %s3757_s25 = scalar_lea.sflag [#allocation4], %s5223_s9 }
 0x4aa   : > { %v3609_v31 = vmul.f32 %v3545_v39, %v3545_v39  ;;  %v4388_v17 = vadd.f32 %v3396_v40, %v7266_v25  ;;  %v3398_v2 = vpop.f32.mrb[15].mxu1 }
 0x4ab   : > { %v3610_v5 = vmul.f32 %v3546_v41, %v3546_v41  ;;  %v4389_v57 = vadd.f32 %v3398_v2, %v7268_v20  ;;  %3697 = vadd.xlane.f32.xlu0 %v3696_v19 }
 0x4ac   : > { %3483 = vst [vmem:[%s7332_s24 + $0x1b0] sm:$0xff] %v4388_v17  ;;  %v3547_v24 = vsub.f32 %v4388_v17, %v4802_v16 }
 0x4ad   : > { %3484 = vst [vmem:[%s7332_s24 + $0x1b8] sm:$0xff] %v4389_v57  ;;  %v3548_v60 = vsub.f32 %v4389_v57, %v4803_v4  ;;  %v3403_v36 = vpop.f32.mrb[16].mxu1  ;;  %v3699_v47 = vadd.f32 %v3610_v5, %v3609_v31 }
 0x4ae   : > { %v3611_v8 = vmul.f32 %v3547_v24, %v3547_v24  ;;  %v4390_v25 = vadd.f32 %v3403_v36, %v7270_v52  ;;  %v3405_v0 = vpop.f32.mrb[17].mxu1 }
 0x4af   : > { %v3612_v21 = vmul.f32 %v3548_v60, %v3548_v60  ;;  %v4391_v20 = vadd.f32 %v3405_v0, %v7272_v28  ;;  %3700 = vadd.xlane.f32.xlu1 %v3699_v47 }
 0x4b0   : > { %3485 = vst [vmem:[%s7332_s24 + $0x1c0] sm:$0xff] %v4390_v25  ;;  %v3549_v10 = vsub.f32 %v4390_v25, %v4804_v11 }
 0x4b1   : > { %3486 = vst [vmem:[%s7332_s24 + $0x1c8] sm:$0xff] %v4391_v20  ;;  %v3550_v53 = vsub.f32 %v4391_v20, %v4805_v7  ;;  %v3410_v29 = vpop.f32.mrb[18].mxu1  ;;  %v3702_v37 = vadd.f32 %v3612_v21, %v3611_v8 }
 0x4b2   : > { %v3613_v62 = vmul.f32 %v3549_v10, %v3549_v10  ;;  %v4392_v52 = vadd.f32 %v3410_v29, %v7274_v48  ;;  %v3412_v45 = vpop.f32.mrb[19].mxu1 }
 0x4b3   : > { %v3614_v23 = vmul.f32 %v3550_v53, %v3550_v53  ;;  %v4393_v28 = vadd.f32 %v3412_v45, %v7276_v38  ;;  %3703 = vadd.xlane.f32.xlu0 %v3702_v37 }
 0x4b4   : > { %3487 = vst [vmem:[%s7332_s24 + $0x1d0] sm:$0xff] %v4392_v52  ;;  %v3551_v44 = vsub.f32 %v4392_v52, %v4806_v55 }
 0x4b5   : > { %3488 = vst [vmem:[%s7332_s24 + $0x1d8] sm:$0xff] %v4393_v28  ;;  %v3552_v46 = vsub.f32 %v4393_v28, %v4807_v50  ;;  %v3417_v61 = vpop.f32.mrb[20].mxu1  ;;  %v3705_v56 = vadd.f32 %v3614_v23, %v3613_v62 }
 0x4b6   : > { %v3615_v35 = vmul.f32 %v3551_v44, %v3551_v44  ;;  %v4394_v48 = vadd.f32 %v3417_v61, %v8136_v30  ;;  %v3419_v59 = vpop.f32.mrb[21].mxu1 }
 0x4b7   : > { %v3616_v33 = vmul.f32 %v3552_v46, %v3552_v46  ;;  %v4395_v38 = vadd.f32 %v3419_v59, %v8137_v14  ;;  %3706 = vadd.xlane.f32.xlu1 %v3705_v56 }
 0x4b8   : > { %3489 = vst [vmem:[%s7332_s24 + $0x1e0] sm:$0xff] %v4394_v48  ;;  %v3553_v27 = vsub.f32 %v4394_v48, %v4808_v34 }
 0x4b9   : > { %3490 = vst [vmem:[%s7332_s24 + $0x1e8] sm:$0xff] %v4395_v38  ;;  %v3554_v42 = vsub.f32 %v4395_v38, %v4809_v43  ;;  %v3424_v15 = vpop.f32.mrb[22].mxu1  ;;  %v3708_v22 = vadd.f32 %v3616_v33, %v3615_v35 }
 0x4ba   : > { %v3617_v58 = vmul.f32 %v3553_v27, %v3553_v27  ;;  %v4396_v3 = vadd.f32 %v3424_v15, %v8138_v9  ;;  %v3426_v54 = vpop.f32.mrb[23].mxu1 }
 0x4bb   : > { %v3618_v1 = vmul.f32 %v3554_v42, %v3554_v42  ;;  %v4397_v32 = vadd.f32 %v3426_v54, %v8139_v18  ;;  %3709 = vadd.xlane.f32.xlu0 %v3708_v22 }
 0x4bc   : > { %3491 = vst [vmem:[%s7332_s24 + $0x1f0] sm:$0xff] %v4396_v3  ;;  %v3555_v6 = vsub.f32 %v4396_v3, %v4810_v26 }
 0x4bd   : > { %3492 = vst [vmem:[%s7332_s24 + $0x1f8] sm:$0xff] %v4397_v32  ;;  %v3556_v49 = vsub.f32 %v4397_v32, %v4811_v63  ;;  %v3711_v51 = vadd.f32 %v3618_v1, %v3617_v58 }
 0x4be   : > { %v3619_v13 = vmul.f32 %v3555_v6, %v3555_v6 }
 0x4bf   : > { %v3620_v39 = vmul.f32 %v3556_v49, %v3556_v49  ;;  %3712 = vadd.xlane.f32.xlu1 %v3711_v51 }
 0x4c1   : > { %v3714_v12 = vadd.f32 %v3620_v39, %v3619_v13 }
 0x4c3   : > { %3715 = vadd.xlane.f32.xlu0 %v3714_v12 }
 0x4c4   : > { %4911 = shalt.err (!%p4908_p11)
}
 0x4c5   : > { %s4912_s13 = scalar_lea.hbm %s7548_s17, 8192  ;;  %s4916_s24 = scalar_lea.hbm %s7609_s4, 16384 }
 0x4c6   : > { %p4913_p0 = scmp.ne.s32.totalorder %s7548_s17, %s4912_s13  ;;  %p4917_p6 = scmp.lt.u32.totalorder %s7548_s17, %s7609_s4 }
 0x4c7   : > { %p4918_p7 = scmp.lt.u32.totalorder %s4916_s24, %s4912_s13  ;;  %p4920_p8 = scmp.lt.u32.totalorder %s4912_s13, %s7548_s17 }
 0x4c8   : > { %p4914_p4 = pnand %p4913_p0, %p8140_p12 }
 0x4c9   : > { %p4919_p2 = por %p4918_p7, %p4917_p6 }
 0x4ca   : > { %p4915_p13 = pneg %p4914_p4 }
 0x4cb   : > { %p4921_p1 = por %p4920_p8, %p4919_p2 }
 0x4cd   : > { %p4922_p10 = pnand %p4921_p1, %p4915_p13 }
 0x4cf   : > { %4925 = shalt.err (!%p4922_p10)
}
 0x4d0   : > { %s4997_s8 = smov 256   ;;  %s4998_s28 = smov 16   ;;  %vm3754_vm0 = vcmask 0  }
 0x4d1   : > { %4664 = dma.vmem_to_hbm [thread:$0]  (%p8140_p12), %s7551_s26, 8192, %s7548_s17, %s3757_s25, %s4997_s8, %s4997_s8, %s4998_s28  }
 0x4d2   : > { %p303_p12 = scmp.lt.s32.totalorder %s4976_s21, 1 }
 0x4d4   : > { %v3623_v41 = vpop.xlane.xlu0 %3622  ;;  %s8151_s21 = smov (!%p303_p12, %s4976_s21), 1 }
 0x4d5   : > { %s308_s17 = scalar_lea.vmem %s7610_s5, %s8151_s21 }
 0x4d8   : > { %v3626_v19 = vpop.xlane.xlu1 %3625 }
 0x4d9   : > { %v3717_v31 = vadd.f32 %v3626_v19, %v3623_v41 }
 0x4dc   : > { %v3629_v40 = vpop.xlane.xlu0 %3628 }
 0x4dd   : > { %v3718_v2 = vadd.f32 %v3717_v31, %v3629_v40 }
 0x4e0   : > { %v3632_v17 = vpop.xlane.xlu0 %3631 }
 0x4e1   : > { %v3719_v57 = vadd.f32 %v3718_v2, %v3632_v17 }
 0x4e4   : > { %v3635_v5 = vpop.xlane.xlu1 %3634 }
 0x4e5   : > { %v3720_v24 = vadd.f32 %v3719_v57, %v3635_v5 }
 0x4e8   : > { %v3638_v16 = vpop.xlane.xlu0 %3637 }
 0x4e9   : > { %v3721_v60 = vadd.f32 %v3720_v24, %v3638_v16 }
 0x4ec   : > { %v3641_v4 = vpop.xlane.xlu1 %3640 }
 0x4ed   : > { %v3722_v47 = vadd.f32 %v3721_v60, %v3641_v4 }
 0x4f0   : > { %v3644_v36 = vpop.xlane.xlu0 %3643 }
 0x4f1   : > { %v3723_v25 = vadd.f32 %v3722_v47, %v3644_v36 }
 0x4f4   : > { %v3647_v8 = vpop.xlane.xlu1 %3646 }
 0x4f5   : > { %v3724_v21 = vadd.f32 %v3723_v25, %v3647_v8 }
 0x4f8   : > { %v3650_v0 = vpop.xlane.xlu0 %3649 }
 0x4f9   : > { %v3725_v11 = vadd.f32 %v3724_v21, %v3650_v0 }
 0x4fc   : > { %v3653_v20 = vpop.xlane.xlu1 %3652 }
 0x4fd   : > { %v3726_v7 = vadd.f32 %v3725_v11, %v3653_v20 }
 0x500   : > { %v3656_v10 = vpop.xlane.xlu0 %3655 }
 0x501   : > { %v3727_v29 = vadd.f32 %v3726_v7, %v3656_v10 }
 0x504   : > { %v3659_v53 = vpop.xlane.xlu1 %3658 }
 0x505   : > { %v3728_v62 = vadd.f32 %v3727_v29, %v3659_v53 }
 0x508   : > { %v3662_v37 = vpop.xlane.xlu0 %3661 }
 0x509   : > { %v3729_v45 = vadd.f32 %v3728_v62, %v3662_v37 }
 0x50c   : > { %v3665_v52 = vpop.xlane.xlu1 %3664 }
 0x50d   : > { %v3730_v28 = vadd.f32 %v3729_v45, %v3665_v52 }
 0x510   : > { %v3668_v23 = vpop.xlane.xlu0 %3667 }
 0x511   : > { %v3731_v44 = vadd.f32 %v3730_v28, %v3668_v23 }
 0x514   : > { %v3671_v55 = vpop.xlane.xlu1 %3670 }
 0x515   : > { %v3732_v46 = vadd.f32 %v3731_v44, %v3671_v55 }
 0x518   : > { %v3674_v50 = vpop.xlane.xlu0 %3673 }
 0x519   : > { %v3733_v56 = vadd.f32 %v3732_v46, %v3674_v50 }
 0x51c   : > { %v3677_v61 = vpop.xlane.xlu1 %3676 }
 0x51d   : > { %v3734_v30 = vadd.f32 %v3733_v56, %v3677_v61 }
 0x520   : > { %v3680_v35 = vpop.xlane.xlu0 %3679 }
 0x521   : > { %v3735_v59 = vadd.f32 %v3734_v30, %v3680_v35 }
 0x524   : > { %v3683_v48 = vpop.xlane.xlu1 %3682 }
 0x525   : > { %v3736_v14 = vadd.f32 %v3735_v59, %v3683_v48 }
 0x528   : > { %v3686_v33 = vpop.xlane.xlu0 %3685 }
 0x529   : > { %v3737_v34 = vadd.f32 %v3736_v14, %v3686_v33 }
 0x52c   : > { %v3689_v38 = vpop.xlane.xlu1 %3688 }
 0x52d   : > { %v3738_v43 = vadd.f32 %v3737_v34, %v3689_v38 }
 0x530   : > { %v3692_v27 = vpop.xlane.xlu0 %3691 }
 0x531   : > { %v3739_v15 = vadd.f32 %v3738_v43, %v3692_v27 }
 0x534   : > { %v3695_v42 = vpop.xlane.xlu1 %3694 }
 0x535   : > { %v3740_v58 = vadd.f32 %v3739_v15, %v3695_v42 }
 0x538   : > { %v3698_v22 = vpop.xlane.xlu0 %3697 }
 0x539   : > { %v3741_v3 = vadd.f32 %v3740_v58, %v3698_v22 }
 0x53c   : > { %v3701_v9 = vpop.xlane.xlu1 %3700 }
 0x53d   : > { %v3742_v1 = vadd.f32 %v3741_v3, %v3701_v9 }
 0x540   : > { %v3704_v54 = vpop.xlane.xlu0 %3703 }
 0x541   : > { %v3743_v32 = vadd.f32 %v3742_v1, %v3704_v54 }
 0x544   : > { %v3707_v18 = vpop.xlane.xlu1 %3706 }
 0x545   : > { %v3744_v6 = vadd.f32 %v3743_v32, %v3707_v18 }
 0x548   : > { %v3710_v26 = vpop.xlane.xlu0 %3709 }
 0x549   : > { %v3745_v49 = vadd.f32 %v3744_v6, %v3710_v26 }
 0x54c   : > { %v3713_v63 = vpop.xlane.xlu1 %3712 }
 0x54d   : > { %v3746_v51 = vadd.f32 %v3745_v49, %v3713_v63 }
 0x550   : > { %v3716_v13 = vpop.xlane.xlu0 %3715 }
 0x551   : > { %v3747_v39 = vadd.f32 %v3746_v51, %v3716_v13 }
 0x553   : > { %v3748_v12 = vrot.slane %v3747_v39, 4 }
 0x555   : > { %v3749_v41 = vadd.f32 %v3748_v12, %v3747_v39 }
 0x557   : > { %v3750_v40 = vrot.slane %v3749_v41, 2 }
 0x559   : > { %v3751_v19 = vadd.f32 %v3750_v40, %v3749_v41 }
 0x55b   : > { %v3752_v31 = vrot.slane %v3751_v19, 1 }
 0x55d   : > { %v3753_v17 = vadd.f32 %v3752_v31, %v3751_v19 }
 0x55f   : > { %3755 = vst.msk [vmem:[%s308_s17] sm:$0x1] %vm3754_vm0, %v3753_v17 }
 0x560 PF: > { %s3796_s26 = sand.u32 1, %s4964_s18   ;;  %p8141_p3 = scmp.ne.s32.totalorder %s7792_s29, 0 }
 0x561   : > { %p8142_p5 = scmp.ge.s32.totalorder %s4984_s23, 2  ;;  %s3797_s25 = scalar_lea.sflag [#allocation4], %s3796_s26 }
 0x563   : > { %p4678_p9 = pnand %p8142_p5, %p8141_p3 }
 0x565   : > { %4959 = dma.done.wait (!%p4678_p9), %s3797_s25, 8192  }
 0x566   : > { %4961 = vsyncadd (!%p4678_p9), %s3797_s25, 4294959104  ;;  %s23_s23 = sadd.s32 1, %s4984_s23   ;;  %s8143_s18 = smov %s4968_s19 }
 0x567   : > { %p20_p11 = scmp.ge.s32.totalorder %s23_s23, 4   ;;  %s8144_s19 = smov %s4972_s20 }
 0x568   : > { %s8145_s20 = smov %s5174_s7  ;;  %s8146_s21 = smov %s4980_s22 }
 0x569   : > { %s8147_s22 = smov %s8149_s14  ;;  %22 = sbr.rel (!%p20_p11) target bundleno = 7 (0x7), region = 101 }
 0x570   :  { %3811 = vsyncpa [#allocation3], 1 }
 0x571   :  { %3813 = vsyncpa [#allocation3 + $0x1], 1 }
 0x572   :  { %3814 = vsyncpa [#allocation6], 1 }
 0x573   :  { %3815 = vsyncpa [#allocation4], 1 }
 0x574   :  { %3817 = vsyncpa [#allocation4 + $0x1], 1 }

</bundles_post_ra>
